<compile_context>
chip_gen: v7x
topology: tpu7x:2x2x1
jax: 0.10.0
libtpu: 0.0.40
codegen_flags: <defaults>
</compile_context>

<pallas_src>
import math
import functools
import numpy as np

import jax
import jax.numpy as jnp
from jax.experimental import pallas as pl
from jax.experimental.pallas import tpu as pltpu

_NEG_INF = -1e18
_LN_EPS = 1e-6
_ACT_DTYPE = jnp.bfloat16          # inter-kernel activation dtype


def _row_tile(m, cap=256):
    """Row tile: multiple of 8, >=2 grid steps when possible (v7x has 2 TCs), <= cap."""
    if m <= 8:
        return m
    half = ((m + 1) // 2 + 7) // 8 * 8
    return int(min(cap, half, m))


def _params(n_parallel):
    return pltpu.CompilerParams(dimension_semantics=("parallel",) * n_parallel)


def _ln_f32(x, g, b, eps):
    mean = jnp.mean(x, axis=-1, keepdims=True)
    var = jnp.mean((x - mean) ** 2, axis=-1, keepdims=True)
    return (x - mean) * jax.lax.rsqrt(var + eps) * g + b


# ----------------------------- Pallas kernels -----------------------------

def _ln_matmul_kernel(x_ref, g_ref, b_ref, w_ref, wb_ref, o_ref, *, eps):
    """o = LN(x) @ W + b   (x bf16 in, o bf16 out, LN math f32)."""
    xn = _ln_f32(x_ref[...].astype(jnp.float32), g_ref[...], b_ref[...], eps)
    y = jnp.dot(xn.astype(jnp.bfloat16), w_ref[...], preferred_element_type=jnp.float32)
    o_ref[...] = (y + wb_ref[...]).astype(o_ref.dtype)


def _proj_res_ln_matmul_kernel(x_ref, wo_ref, bo_ref, res_ref, g_ref, b_ref,
                               w_ref, wb_ref, y_ref, o_ref, *, eps):
    """Fused steps (3)+(4): y = x@Wo + bo + res ; o = LN(y) @ W + wb."""
    y = (jnp.dot(x_ref[...], wo_ref[...], preferred_element_type=jnp.float32)
         + bo_ref[...] + res_ref[...].astype(jnp.float32))
    y_ref[...] = y.astype(y_ref.dtype)
    xn = _ln_f32(y, g_ref[...], b_ref[...], eps)
    o = jnp.dot(xn.astype(jnp.bfloat16), w_ref[...], preferred_element_type=jnp.float32)
    o_ref[...] = (o + wb_ref[...]).astype(o_ref.dtype)


def _proj_res_ffn_kernel(x_ref, wo_ref, bo_ref, res_ref, g_ref, b_ref,
                         w1_ref, b1_ref, w2_ref, b2_ref, o_ref, *, eps):
    """Fused steps (7)+(8): mid = x@Wo + bo + res ; o = mid + W2(relu(W1(LN(mid))))."""
    mid = (jnp.dot(x_ref[...], wo_ref[...], preferred_element_type=jnp.float32)
           + bo_ref[...] + res_ref[...].astype(jnp.float32))
    xn = _ln_f32(mid, g_ref[...], b_ref[...], eps)
    h = jnp.dot(xn.astype(jnp.bfloat16), w1_ref[...],
                preferred_element_type=jnp.float32) + b1_ref[...]
    h = jnp.maximum(h, 0.0)
    y = jnp.dot(h.astype(jnp.bfloat16), w2_ref[...],
                preferred_element_type=jnp.float32) + b2_ref[...]
    o_ref[...] = (y + mid).astype(o_ref.dtype)


def _kv_proj_kernel(x_ref, w_ref, wb_ref, o_ref):
    """All-layer memory K|V projection, grid = (layer, row_tile)."""
    y = jnp.dot(x_ref[...], w_ref[0], preferred_element_type=jnp.float32) + wb_ref[0]
    o_ref[0] = y.astype(o_ref.dtype)


def _layernorm_kernel(x_ref, g_ref, b_ref, o_ref, *, eps):
    o_ref[...] = _ln_f32(x_ref[...].astype(jnp.float32),
                         g_ref[...], b_ref[...], eps).astype(o_ref.dtype)


def _self_attn_kernel(qkv_ref, pad_ref, ctx_ref, acc_ref, *, heads, d_model):
    """Causal self-attention for one batch element.

    qkv_ref: (1, T, 3D) bf16 fused Q|K|V (Q pre-scaled by 1/sqrt(dk)).
    pad_ref: (1, 1, T) bf16 target pad mask (1 = pad).  Causal triangle built in-kernel.
    acc_ref: (T, D) f32 VMEM scratch — head outputs accumulate here; one lane-dense
             store to ctx_ref at the end (no jnp.concatenate).
    """
    qkv = qkv_ref[0]                                    # (T, 3D) bf16
    T = qkv.shape[0]
    dk = d_model // heads
    row = jax.lax.broadcasted_iota(jnp.int32, (T, T), 0)
    col = jax.lax.broadcasted_iota(jnp.int32, (T, T), 1)
    blocked = jnp.logical_or(col > row, pad_ref[0] > 0.5)       # (T, T)
    for h in range(heads):                              # static unroll, plain 2-D MXU dots
        q = qkv[:, h * dk:(h + 1) * dk]
        k = qkv[:, d_model + h * dk:d_model + (h + 1) * dk]
        v = qkv[:, 2 * d_model + h * dk:2 * d_model + (h + 1) * dk]
        s = jax.lax.dot_general(q, k, (((1,), (1,)), ((), ())),
                                preferred_element_type=jnp.float32)
        s = jnp.where(blocked, _NEG_INF, s)             # masked_fill(-1e18) semantics
        s_max = jnp.max(s, axis=-1, keepdims=True)
        e = jnp.exp(s - s_max)
        p = e * pl.reciprocal(jnp.sum(e, axis=-1, keepdims=True), approx=True)
        acc_ref[:, h * dk:(h + 1) * dk] = jnp.dot(p.astype(jnp.bfloat16), v,
                                                  preferred_element_type=jnp.float32)
    ctx_ref[0] = acc_ref[...].astype(ctx_ref.dtype)     # single lane-dense store


def _ctx_attn_kernel(q_ref, kv_ref, pad_ref, ctx_ref, *rest,
                     heads, d_model, return_attn):
    """Context attention for one batch element (layer's K|V block chosen by BlockSpec)."""
    if return_attn:
        attn_ref, acc_ref = rest
    else:
        (acc_ref,) = rest
    q = q_ref[0]                                        # (T, D) bf16
    kv = kv_ref[0, 0]                                   # (S, 2D) bf16
    dk = d_model // heads
    blocked = pad_ref[0] > 0.5                          # (1, S), broadcasts over rows
    for h in range(heads):
        qh = q[:, h * dk:(h + 1) * dk]
        kh = kv[:, h * dk:(h + 1) * dk]
        vh = kv[:, d_model + h * dk:d_model + (h + 1) * dk]
        s = jax.lax.dot_general(qh, kh, (((1,), (1,)), ((), ())),
                                preferred_element_type=jnp.float32)
        s = jnp.where(blocked, _NEG_INF, s)
        s_max = jnp.max(s, axis=-1, keepdims=True)
        e = jnp.exp(s - s_max)
        denom = jnp.sum(e, axis=-1, keepdims=True)
        if return_attn:
            p = e / denom                               # exact: returned pointer distribution
            attn_ref[0, h] = p.astype(attn_ref.dtype)
        else:
            p = e * pl.reciprocal(denom, approx=True)
        acc_ref[:, h * dk:(h + 1) * dk] = jnp.dot(p.astype(jnp.bfloat16), vh,
                                                  preferred_element_type=jnp.float32)
    ctx_ref[0] = acc_ref[...].astype(ctx_ref.dtype)


# ----------------------------- Kernel wrappers -----------------------------

def ln_matmul(x, g, b, w, wb):
    m, d = x.shape
    n = w.shape[1]
    bm = _row_tile(m)
    return pl.pallas_call(
        functools.partial(_ln_matmul_kernel, eps=_LN_EPS),
        out_shape=jax.ShapeDtypeStruct((m, n), _ACT_DTYPE),
        grid=(pl.cdiv(m, bm),),
        in_specs=[
            pl.BlockSpec((bm, d), lambda i: (i, 0)),
            pl.BlockSpec((1, d), lambda i: (0, 0)),
            pl.BlockSpec((1, d), lambda i: (0, 0)),
            pl.BlockSpec((d, n), lambda i: (0, 0)),
            pl.BlockSpec((1, n), lambda i: (0, 0)),
        ],
        out_specs=pl.BlockSpec((bm, n), lambda i: (i, 0)),
        compiler_params=_params(1),
    )(x, g.reshape(1, d), b.reshape(1, d), w, wb.reshape(1, n))


def proj_res_ln_matmul(x, wo, bo, res, g, b, w, wb):
    m, d = x.shape
    n = w.shape[1]
    bm = _row_tile(m)
    return pl.pallas_call(
        functools.partial(_proj_res_ln_matmul_kernel, eps=_LN_EPS),
        out_shape=(jax.ShapeDtypeStruct((m, d), _ACT_DTYPE),
                   jax.ShapeDtypeStruct((m, n), _ACT_DTYPE)),
        grid=(pl.cdiv(m, bm),),
        in_specs=[
            pl.BlockSpec((bm, d), lambda i: (i, 0)),   # attention context
            pl.BlockSpec((d, d), lambda i: (0, 0)),    # Wo
            pl.BlockSpec((1, d), lambda i: (0, 0)),    # bo
            pl.BlockSpec((bm, d), lambda i: (i, 0)),   # residual
            pl.BlockSpec((1, d), lambda i: (0, 0)),    # LN gamma
            pl.BlockSpec((1, d), lambda i: (0, 0)),    # LN beta
            pl.BlockSpec((d, n), lambda i: (0, 0)),    # W (ctx query proj)
            pl.BlockSpec((1, n), lambda i: (0, 0)),    # b
        ],
        out_specs=(pl.BlockSpec((bm, d), lambda i: (i, 0)),
                   pl.BlockSpec((bm, n), lambda i: (i, 0))),
        compiler_params=_params(1),
    )(x, wo, bo.reshape(1, d), res, g.reshape(1, d), b.reshape(1, d), w, wb.reshape(1, n))


def proj_res_ffn(x, wo, bo, res, g, b, w1, b1, w2, b2):
    m, d = x.shape
    f = w1.shape[1]
    bm = _row_tile(m)
    return pl.pallas_call(
        functools.partial(_proj_res_ffn_kernel, eps=_LN_EPS),
        out_shape=jax.ShapeDtypeStruct((m, d), _ACT_DTYPE),
        grid=(pl.cdiv(m, bm),),
        in_specs=[
            pl.BlockSpec((bm, d), lambda i: (i, 0)),
            pl.BlockSpec((d, d), lambda i: (0, 0)),
            pl.BlockSpec((1, d), lambda i: (0, 0)),
            pl.BlockSpec((bm, d), lambda i: (i, 0)),
            pl.BlockSpec((1, d), lambda i: (0, 0)),
            pl.BlockSpec((1, d), lambda i: (0, 0)),
            pl.BlockSpec((d, f), lambda i: (0, 0)),
            pl.BlockSpec((1, f), lambda i: (0, 0)),
            pl.BlockSpec((f, d), lambda i: (0, 0)),
            pl.BlockSpec((1, d), lambda i: (0, 0)),
        ],
        out_specs=pl.BlockSpec((bm, d), lambda i: (i, 0)),
        compiler_params=_params(1),
    )(x, wo, bo.reshape(1, d), res, g.reshape(1, d), b.reshape(1, d),
      w1, b1.reshape(1, f), w2, b2.reshape(1, d))


def memory_kv_proj(x, w_stack, b_stack):
    """x: [B*S, D] bf16; w_stack: [L, D, 2D] bf16; b_stack: [L, 1, 2D] f32 -> [L, B*S, 2D] bf16."""
    m, d = x.shape
    L, _, n2 = w_stack.shape
    bm = _row_tile(m)
    return pl.pallas_call(
        _kv_proj_kernel,
        out_shape=jax.ShapeDtypeStruct((L, m, n2), _ACT_DTYPE),
        grid=(L, pl.cdiv(m, bm)),
        in_specs=[
            pl.BlockSpec((bm, d), lambda l, i: (i, 0)),
            pl.BlockSpec((1, d, n2), lambda l, i: (l, 0, 0)),
            pl.BlockSpec((1, 1, n2), lambda l, i: (l, 0, 0)),
        ],
        out_specs=pl.BlockSpec((1, bm, n2), lambda l, i: (l, i, 0)),
        compiler_params=_params(2),
    )(x, w_stack, b_stack)


def layer_norm(x, g, b):
    m, d = x.shape
    bm = _row_tile(m)
    return pl.pallas_call(
        functools.partial(_layernorm_kernel, eps=_LN_EPS),
        out_shape=jax.ShapeDtypeStruct((m, d), jnp.float32),
        grid=(pl.cdiv(m, bm),),
        in_specs=[
            pl.BlockSpec((bm, d), lambda i: (i, 0)),
            pl.BlockSpec((1, d), lambda i: (0, 0)),
            pl.BlockSpec((1, d), lambda i: (0, 0)),
        ],
        out_specs=pl.BlockSpec((bm, d), lambda i: (i, 0)),
        compiler_params=_params(1),
    )(x, g.reshape(1, d), b.reshape(1, d))


def self_attention(qkv, tgt_pad, heads, d_model):
    """qkv: [B, T, 3D] bf16; tgt_pad: [B, 1, T] bf16 (1 = pad)."""
    B, T, D3 = qkv.shape
    return pl.pallas_call(
        functools.partial(_self_attn_kernel, heads=heads, d_model=d_model),
        out_shape=jax.ShapeDtypeStruct((B, T, d_model), _ACT_DTYPE),
        grid=(B,),
        in_specs=[
            pl.BlockSpec((1, T, D3), lambda b: (b, 0, 0)),
            pl.BlockSpec((1, 1, T), lambda b: (b, 0, 0)),
        ],
        out_specs=pl.BlockSpec((1, T, d_model), lambda b: (b, 0, 0)),
        scratch_shapes=[pltpu.VMEM((T, d_model), jnp.float32)],
        compiler_params=_params(1),
    )(qkv, tgt_pad)


def context_attention(q, kv_all, src_pad, layer_idx, heads, d_model, return_attn):
    """q: [B, T, D] bf16; kv_all: [L, B, S, 2D] bf16; src_pad: [B, 1, S] bf16."""
    B, T, D = q.shape
    L, _, S, D2 = kv_all.shape
    in_specs = [
        pl.BlockSpec((1, T, D), lambda b: (b, 0, 0)),
        pl.BlockSpec((1, 1, S, D2), lambda b, li=layer_idx: (li, b, 0, 0)),
        pl.BlockSpec((1, 1, S), lambda b: (b, 0, 0)),
    ]
    scratch = [pltpu.VMEM((T, d_model), jnp.float32)]
    if return_attn:
        out_shape = (jax.ShapeDtypeStruct((B, T, d_model), _ACT_DTYPE),
                     jax.ShapeDtypeStruct((B, heads, T, S), _ACT_DTYPE))
        out_specs = (pl.BlockSpec((1, T, d_model), lambda b: (b, 0, 0)),
                     pl.BlockSpec((1, heads, T, S), lambda b: (b, 0, 0, 0)))
    else:
        out_shape = jax.ShapeDtypeStruct((B, T, d_model), _ACT_DTYPE)
        out_specs = pl.BlockSpec((1, T, d_model), lambda b: (b, 0, 0))
    return pl.pallas_call(
        functools.partial(_ctx_attn_kernel, heads=heads, d_model=d_model,
                          return_attn=return_attn),
        out_shape=out_shape,
        grid=(B,),
        in_specs=in_specs,
        out_specs=out_specs,
        scratch_shapes=scratch,
        compiler_params=_params(1),
    )(q, kv_all, src_pad)


# ----------------------------- Model glue ---------------------------------

def transformer_decoder_layer(lp, x, kv_all, layer_idx, tgt_pad, src_pad,
                              heads, d_model, need_attn):
    """x: [B*T, D] bf16 running activation."""
    B = tgt_pad.shape[0]
    T = tgt_pad.shape[-1]

    # (A) LN1 + fused QKV projection.
    qkv = ln_matmul(x, lp["ln1_g"], lp["ln1_b"],
                    lp["w_qkv"], lp["b_qkv"]).reshape(B, T, 3 * d_model)

    # (B) causal self-attention.
    ctx = self_attention(qkv, tgt_pad, heads, d_model).reshape(B * T, d_model)

    # (C) self-attn output proj + residual + LN2 + ctx query proj (fused).
    query, q2 = proj_res_ln_matmul(ctx, lp["w_self_o"], lp["b_self_o"], x,
                                   lp["ln2_g"], lp["ln2_b"],
                                   lp["w_ctx_q"], lp["b_ctx_q"])
    q2 = q2.reshape(B, T, d_model)

    # (E) context attention; probs materialized only when needed (last layer, exact recip).
    if need_attn:
        ctx2, attn = context_attention(q2, kv_all, src_pad, layer_idx, heads, d_model, True)
    else:
        ctx2 = context_attention(q2, kv_all, src_pad, layer_idx, heads, d_model, False)
        attn = None

    # (F) ctx output proj + residual + fused FFN.
    out = proj_res_ffn(ctx2.reshape(B * T, d_model), lp["w_ctx_o"], lp["b_ctx_o"], query,
                       lp["ffn_ln_g"], lp["ffn_ln_b"],
                       lp["w1"], lp["b1"], lp["w2"], lp["b2"])
    return out, attn


def positional_encoding(length, dim):
    pos = np.arange(length)[:, None].astype(np.float32)
    div = np.exp(np.arange(0, dim, 2).astype(np.float32) * -(math.log(10000.0) / dim))
    pe = np.zeros((length, dim), np.float32)
    pe[:, 0::2] = np.sin(pos * div)
    pe[:, 1::2] = np.cos(pos * div)
    return jnp.asarray(pe)


def pointer_decoder_forward(params, tgt, memory_bank, src, heads, padding_idx=0):
    """PointerDecoder.forward (inference, no layer cache, step=None, no memory_masks)."""
    B, S, D = memory_bank.shape
    T = tgt.shape[0]
    L = len(params["layers"])
    tgt_words = tgt.T          # [B, T]
    src_words = src.T          # [B, S]

    # Pointer embedding: gather pointed-to block representations, right-shift with a
    # zero "start" vector (teacher forcing).
    # TODO(synk): original `index_select(0, tgt)` + `cat(..., -1)` is shape-inconsistent
    # as written; implemented the intended per-batch gather + right shift.
    gathered = jnp.take_along_axis(memory_bank, tgt_words[:, :, None], axis=1)   # [B, T, D]
    emb = jnp.concatenate([jnp.zeros((B, 1, D), jnp.float32), gathered], axis=1)[:, :-1, :]

    # PositionalEncoding (step=None): emb * sqrt(D) + pe[:T]
    output = emb * math.sqrt(D) + positional_encoding(T, D)[None, :, :]
    x = output.reshape(B * T, D).astype(_ACT_DTYPE)

    # Tiny bf16 pad vectors ([B,1,T] / [B,1,S]); the TxT causal triangle is built in-kernel.
    tgt_pad = (tgt_words == padding_idx).astype(jnp.bfloat16).reshape(B, 1, T)
    # TODO(synk): the literal original passes (1 - src_pad_mask) to context attention,
    # which under masked_fill(mask, -1e18) semantics would block NON-pad positions;
    # implemented the standard polarity (pad positions blocked) per review feedback.
    src_pad = (src_words == padding_idx).astype(jnp.bfloat16).reshape(B, 1, S)

    # Memory K|V projection for ALL layers, hoisted out of the layer loop.
    mem_flat = memory_bank.reshape(B * S, D).astype(_ACT_DTYPE)
    kv_all = memory_kv_proj(mem_flat, params["w_ctx_kv"], params["b_ctx_kv"])
    kv_all = kv_all.reshape(L, B, S, 2 * D)

    attn = None
    for li, lp in enumerate(params["layers"]):
        x, attn_l = transformer_decoder_layer(
            lp, x, kv_all, li, tgt_pad, src_pad, heads, D, need_attn=(li == L - 1))
        if attn_l is not None:
            attn = attn_l

    out = layer_norm(x, params["ln_g"], params["ln_b"]).reshape(B, T, D)
    outputs = out.transpose(1, 0, 2)   # [T, B, D] (time-major, parent-class convention)
    return outputs, attn


# ----------------------------- Param init / prep ----------------------------

def init_raw_params(key, num_layers, d_model, d_ff):
    def dense(k, fan_in, fan_out):
        k1, k2 = jax.random.split(k)
        w = jax.random.normal(k1, (fan_in, fan_out), jnp.float32) * 0.05
        b = jax.random.normal(k2, (fan_out,), jnp.float32) * 0.05
        return w, b

    def mha(k):
        ks = jax.random.split(k, 4)
        return {n: dense(ks[i], d_model, d_model) for i, n in enumerate(["q", "k", "v", "o"])}

    ones = jnp.ones((d_model,), jnp.float32)
    zeros = jnp.zeros((d_model,), jnp.float32)
    layers = []
    keys = jax.random.split(key, num_layers)
    for l in range(num_layers):
        ks = jax.random.split(keys[l], 4)
        w1, b1 = dense(ks[2], d_model, d_ff)
        w2, b2 = dense(ks[3], d_ff, d_model)
        layers.append(dict(
            self_attn=mha(ks[0]), context_attn=mha(ks[1]),
            ffn=dict(ln_g=ones, ln_b=zeros, w1=w1, b1=b1, w2=w2, b2=b2),
            ln1_g=ones, ln1_b=zeros, ln2_g=ones, ln2_b=zeros))
    return dict(layers=layers, ln_g=ones, ln_b=zeros)


def prepare_params(raw, heads):
    """Fold 1/sqrt(dk) into Q projections, fuse Q|K|V (self) weights, stack the context
    K|V projections across layers for the hoisted all-layer kernel, cast matmul weights
    to bf16 (biases / LN params stay f32)."""
    d_model = raw["ln_g"].shape[0]
    scale = 1.0 / math.sqrt(d_model // heads)
    bf16 = lambda w: w.astype(jnp.bfloat16)

    layers, w_kv_stack, b_kv_stack = [], [], []
    for lp in raw["layers"]:
        sa, ca, ff = lp["self_attn"], lp["context_attn"], lp["ffn"]
        (wq, bq), (wk, bk), (wv, bv), (wo, bo) = sa["q"], sa["k"], sa["v"], sa["o"]
        (cwq, cbq), (cwk, cbk), (cwv, cbv), (cwo, cbo) = ca["q"], ca["k"], ca["v"], ca["o"]
        layers.append(dict(
            ln1_g=lp["ln1_g"], ln1_b=lp["ln1_b"],
            w_qkv=bf16(jnp.concatenate([wq * scale, wk, wv], axis=1)),
            b_qkv=jnp.concatenate([bq * scale, bk, bv], axis=0),
            w_self_o=bf16(wo), b_self_o=bo,
            ln2_g=lp["ln2_g"], ln2_b=lp["ln2_b"],
            w_ctx_q=bf16(cwq * scale), b_ctx_q=cbq * scale,
            w_ctx_o=bf16(cwo), b_ctx_o=cbo,
            ffn_ln_g=ff["ln_g"], ffn_ln_b=ff["ln_b"],
            w1=bf16(ff["w1"]), b1=ff["b1"], w2=bf16(ff["w2"]), b2=ff["b2"]))
        w_kv_stack.append(jnp.concatenate([cwk, cwv], axis=1))
        b_kv_stack.append(jnp.concatenate([cbk, cbv], axis=0).reshape(1, -1))
    return dict(layers=layers,
                w_ctx_kv=bf16(jnp.stack(w_kv_stack, axis=0)),       # [L, D, 2D]
                b_ctx_kv=jnp.stack(b_kv_stack, axis=0),             # [L, 1, 2D]
                ln_g=raw["ln_g"], ln_b=raw["ln_b"])


# ----------------------------- Demo ----------------------------------------

if __name__ == "__main__":
    B, S, D, H, F, T, L = 2, 8, 32, 4, 64, 8, 2   # batch, n_blocks, d_model, heads, d_ff, tgt_len, layers
    key = jax.random.PRNGKey(0)
    kp, km, kt, ks = jax.random.split(key, 4)

    params = prepare_params(init_raw_params(kp, L, D, F), heads=H)
    memory_bank = jax.random.normal(km, (B, S, D), jnp.float32)          # [B, n_blocks, d_model]
    tgt = jax.random.randint(kt, (T, B), 0, S, dtype=jnp.int32)          # pointer targets [T, B]
    src = jax.random.randint(ks, (S, B), 1, 100, dtype=jnp.int32)        # state.src [src_len, B]

    fwd = jax.jit(pointer_decoder_forward, static_argnames=("heads", "padding_idx"))
    outputs, attn = fwd(params, tgt, memory_bank, src, heads=H)
    jax.block_until_ready((outputs, attn))
    assert outputs.shape == (T, B, D)
    assert attn.shape == (B, H, T, S)
    assert bool(jnp.all(jnp.isfinite(outputs))) and bool(jnp.all(jnp.isfinite(attn.astype(jnp.float32))))
    print("KERNEL_OK")
</pallas_src>

<mosaic_0001>
module attributes {stable_mosaic.version = 11 : i64} {
  func.func @_kv_proj_kernel(%arg0: i32, %arg1: i32, %arg2: memref<8x32xbf16, #tpu.memory_space<vmem>>, %arg3: memref<1x32x64xbf16, #tpu.memory_space<vmem>>, %arg4: memref<1x1x64xf32, #tpu.memory_space<vmem>>, %arg5: memref<1x8x64xbf16, #tpu.memory_space<vmem>>) attributes {dimension_semantics = [#tpu.dimension_semantics<parallel>, #tpu.dimension_semantics<parallel>], iteration_bounds = array<i64: 2, 2>, scalar_prefetch = 0 : i64, scratch_operands = 0 : i64, tpu.core_type = #tpu.core_type<tc>, window_params = [{transform_indices = @transform_0, window_bounds = array<i64: 8, 32>}, {transform_indices = @transform_1, window_bounds = array<i64: 1, 32, 64>}, {transform_indices = @transform_2, window_bounds = array<i64: 1, 1, 64>}, {transform_indices = @transform_3, window_bounds = array<i64: 1, 8, 64>}]} {
    %c0 = arith.constant 0 : index
    %c0_0 = arith.constant 0 : index
    %0 = vector.load %arg2[%c0, %c0_0] : memref<8x32xbf16, #tpu.memory_space<vmem>>, vector<8x32xbf16>
    %c0_1 = arith.constant 0 : index
    %c0_2 = arith.constant 0 : index
    %c0_3 = arith.constant 0 : index
    %1 = vector.load %arg3[%c0_1, %c0_2, %c0_3] : memref<1x32x64xbf16, #tpu.memory_space<vmem>>, vector<1x32x64xbf16>
    %2 = vector.shape_cast %1 : vector<1x32x64xbf16> to vector<32x64xbf16>
    %cst = arith.constant dense<0.000000e+00> : vector<8x64xf32>
    %3 = tpu.matmul %0, %2, %cst {dimension_numbers = #tpu.dot_dimension_numbers<[1], [0], [0], [1], [0, 0, 1, 1], [], []>} : vector<8x32xbf16>, vector<32x64xbf16>, vector<8x64xf32> -> vector<8x64xf32>
    %c0_4 = arith.constant 0 : index
    %c0_5 = arith.constant 0 : index
    %c0_6 = arith.constant 0 : index
    %4 = vector.load %arg4[%c0_4, %c0_5, %c0_6] : memref<1x1x64xf32, #tpu.memory_space<vmem>>, vector<1x1x64xf32>
    %5 = vector.shape_cast %4 : vector<1x1x64xf32> to vector<1x64xf32>
    %6 = vector.broadcast %5 : vector<1x64xf32> to vector<8x64xf32>
    %7 = arith.addf %3, %6 : vector<8x64xf32>
    %8 = arith.truncf %7 : vector<8x64xf32> to vector<8x64xbf16>
    %c0_7 = arith.constant 0 : index
    %c0_8 = arith.constant 0 : index
    %c0_9 = arith.constant 0 : index
    %9 = vector.load %arg5[%c0_7, %c0_8, %c0_9] : memref<1x8x64xbf16, #tpu.memory_space<vmem>>, vector<1x8x64xbf16>
    %10 = vector.shape_cast %9 : vector<1x8x64xbf16> to vector<8x64xbf16>
    %11 = vector.shape_cast %8 : vector<8x64xbf16> to vector<1x8x64xbf16>
    tpu.vector_store %arg5[%c0_7, %c0_8, %c0_9], %11 {strides = array<i32>} : memref<1x8x64xbf16, #tpu.memory_space<vmem>>, vector<1x8x64xbf16>,
    return
  }
  func.func @transform_0(%arg0: i32, %arg1: i32) -> (i32, i32) {
    %c0_i32 = arith.constant 0 : i32
    %c0_i32_0 = arith.constant 0 : i32
    return %arg1, %c0_i32 : i32, i32
  }
  func.func @transform_1(%arg0: i32, %arg1: i32) -> (i32, i32, i32) {
    %c0_i32 = arith.constant 0 : i32
    %c0_i32_0 = arith.constant 0 : i32
    %c0_i32_1 = arith.constant 0 : i32
    return %arg0, %c0_i32, %c0_i32_0 : i32, i32, i32
  }
  func.func @transform_2(%arg0: i32, %arg1: i32) -> (i32, i32, i32) {
    %c0_i32 = arith.constant 0 : i32
    %c0_i32_0 = arith.constant 0 : i32
    %c0_i32_1 = arith.constant 0 : i32
    return %arg0, %c0_i32, %c0_i32_0 : i32, i32, i32
  }
  func.func @transform_3(%arg0: i32, %arg1: i32) -> (i32, i32, i32) {
    %c0_i32 = arith.constant 0 : i32
    %c0_i32_0 = arith.constant 0 : i32
    return %arg0, %arg1, %c0_i32 : i32, i32, i32
  }
}

module attributes {stable_mosaic.version = 11 : i64} {
  func.func @_ln_matmul_kernel(%arg0: i32, %arg1: memref<8x32xbf16, #tpu.memory_space<vmem>>, %arg2: memref<1x32xf32, #tpu.memory_space<vmem>>, %arg3: memref<1x32xf32, #tpu.memory_space<vmem>>, %arg4: memref<32x96xbf16, #tpu.memory_space<vmem>>, %arg5: memref<1x96xf32, #tpu.memory_space<vmem>>, %arg6: memref<8x96xbf16, #tpu.memory_space<vmem>>) attributes {dimension_semantics = [#tpu.dimension_semantics<parallel>], iteration_bounds = array<i64: 2>, scalar_prefetch = 0 : i64, scratch_operands = 0 : i64, tpu.core_type = #tpu.core_type<tc>, window_params = [{transform_indices = @transform_0, window_bounds = array<i64: 8, 32>}, {pipeline_mode = #tpu.pipeline_mode<synchronous>, transform_indices = @transform_1, window_bounds = array<i64: 1, 32>}, {pipeline_mode = #tpu.pipeline_mode<synchronous>, transform_indices = @transform_2, window_bounds = array<i64: 1, 32>}, {pipeline_mode = #tpu.pipeline_mode<synchronous>, transform_indices = @transform_3, window_bounds = array<i64: 32, 96>}, {pipeline_mode = #tpu.pipeline_mode<synchronous>, transform_indices = @transform_4, window_bounds = array<i64: 1, 96>}, {transform_indices = @transform_5, window_bounds = array<i64: 8, 96>}]} {
    %c0 = arith.constant 0 : index
    %c0_0 = arith.constant 0 : index
    %0 = vector.load %arg1[%c0, %c0_0] : memref<8x32xbf16, #tpu.memory_space<vmem>>, vector<8x32xbf16>
    %1 = arith.extf %0 : vector<8x32xbf16> to vector<8x32xf32>
    %c0_1 = arith.constant 0 : index
    %c0_2 = arith.constant 0 : index
    %2 = vector.load %arg2[%c0_1, %c0_2] : memref<1x32xf32, #tpu.memory_space<vmem>>, vector<1x32xf32>
    %c0_3 = arith.constant 0 : index
    %c0_4 = arith.constant 0 : index
    %3 = vector.load %arg3[%c0_3, %c0_4] : memref<1x32xf32, #tpu.memory_space<vmem>>, vector<1x32xf32>
    %cst = arith.constant dense<0.000000e+00> : vector<8xf32>
    %4 = vector.multi_reduction <add>, %1, %cst [1] : vector<8x32xf32> to vector<8xf32>
    %5 = vector.shape_cast %4 : vector<8xf32> to vector<8x1xf32>
    %cst_5 = arith.constant 3.200000e+01 : f32
    %6 = vector.broadcast %cst_5 : f32 to vector<8x1xf32>
    %7 = arith.divf %5, %6 : vector<8x1xf32>
    %8 = vector.broadcast %7 : vector<8x1xf32> to vector<8x32xf32>
    %9 = arith.subf %1, %8 : vector<8x32xf32>
    %10 = arith.mulf %9, %9 : vector<8x32xf32>
    %cst_6 = arith.constant dense<0.000000e+00> : vector<8xf32>
    %11 = vector.multi_reduction <add>, %10, %cst_6 [1] : vector<8x32xf32> to vector<8xf32>
    %12 = vector.shape_cast %11 : vector<8xf32> to vector<8x1xf32>
    %cst_7 = arith.constant 3.200000e+01 : f32
    %13 = vector.broadcast %cst_7 : f32 to vector<8x1xf32>
    %14 = arith.divf %12, %13 : vector<8x1xf32>
    %15 = vector.broadcast %7 : vector<8x1xf32> to vector<8x32xf32>
    %16 = arith.subf %1, %15 : vector<8x32xf32>
    %cst_8 = arith.constant 9.99999997E-7 : f32
    %17 = vector.broadcast %cst_8 : f32 to vector<8x1xf32>
    %18 = arith.addf %14, %17 : vector<8x1xf32>
    %19 = math.rsqrt %18 : vector<8x1xf32>
    %20 = vector.broadcast %19 : vector<8x1xf32> to vector<8x32xf32>
    %21 = arith.mulf %16, %20 : vector<8x32xf32>
    %22 = vector.broadcast %2 : vector<1x32xf32> to vector<8x32xf32>
    %23 = arith.mulf %21, %22 : vector<8x32xf32>
    %24 = vector.broadcast %3 : vector<1x32xf32> to vector<8x32xf32>
    %25 = arith.addf %23, %24 : vector<8x32xf32>
    %26 = arith.truncf %25 : vector<8x32xf32> to vector<8x32xbf16>
    %c0_9 = arith.constant 0 : index
    %c0_10 = arith.constant 0 : index
    %27 = vector.load %arg4[%c0_9, %c0_10] : memref<32x96xbf16, #tpu.memory_space<vmem>>, vector<32x96xbf16>
    %cst_11 = arith.constant dense<0.000000e+00> : vector<8x96xf32>
    %28 = tpu.matmul %26, %27, %cst_11 {dimension_numbers = #tpu.dot_dimension_numbers<[1], [0], [0], [1], [0, 0, 1, 1], [], []>} : vector<8x32xbf16>, vector<32x96xbf16>, vector<8x96xf32> -> vector<8x96xf32>
    %c0_12 = arith.constant 0 : index
    %c0_13 = arith.constant 0 : index
    %29 = vector.load %arg5[%c0_12, %c0_13] : memref<1x96xf32, #tpu.memory_space<vmem>>, vector<1x96xf32>
    %30 = vector.broadcast %29 : vector<1x96xf32> to vector<8x96xf32>
    %31 = arith.addf %28, %30 : vector<8x96xf32>
    %32 = arith.truncf %31 : vector<8x96xf32> to vector<8x96xbf16>
    %c0_14 = arith.constant 0 : index
    %c0_15 = arith.constant 0 : index
    %33 = vector.load %arg6[%c0_14, %c0_15] : memref<8x96xbf16, #tpu.memory_space<vmem>>, vector<8x96xbf16>
    tpu.vector_store %arg6[%c0_14, %c0_15], %32 {strides = array<i32>} : memref<8x96xbf16, #tpu.memory_space<vmem>>, vector<8x96xbf16>,
    return
  }
  func.func @transform_0(%arg0: i32) -> (i32, i32) {
    %c0_i32 = arith.constant 0 : i32
    %c0_i32_0 = arith.constant 0 : i32
    return %arg0, %c0_i32 : i32, i32
  }
  func.func @transform_1(%arg0: i32) -> (i32, i32) {
    %c0_i32 = arith.constant 0 : i32
    %c0_i32_0 = arith.constant 0 : i32
    %c0_i32_1 = arith.constant 0 : i32
    return %c0_i32, %c0_i32_0 : i32, i32
  }
  func.func @transform_2(%arg0: i32) -> (i32, i32) {
    %c0_i32 = arith.constant 0 : i32
    %c0_i32_0 = arith.constant 0 : i32
    %c0_i32_1 = arith.constant 0 : i32
    return %c0_i32, %c0_i32_0 : i32, i32
  }
  func.func @transform_3(%arg0: i32) -> (i32, i32) {
    %c0_i32 = arith.constant 0 : i32
    %c0_i32_0 = arith.constant 0 : i32
    %c0_i32_1 = arith.constant 0 : i32
    return %c0_i32, %c0_i32_0 : i32, i32
  }
  func.func @transform_4(%arg0: i32) -> (i32, i32) {
    %c0_i32 = arith.constant 0 : i32
    %c0_i32_0 = arith.constant 0 : i32
    %c0_i32_1 = arith.constant 0 : i32
    return %c0_i32, %c0_i32_0 : i32, i32
  }
  func.func @transform_5(%arg0: i32) -> (i32, i32) {
    %c0_i32 = arith.constant 0 : i32
    %c0_i32_0 = arith.constant 0 : i32
    return %arg0, %c0_i32 : i32, i32
  }
}

module attributes {stable_mosaic.version = 11 : i64} {
  func.func @_self_attn_kernel(%arg0: i32, %arg1: memref<1x8x96xbf16, #tpu.memory_space<vmem>>, %arg2: memref<1x1x8xbf16, #tpu.memory_space<vmem>>, %arg3: memref<1x8x32xbf16, #tpu.memory_space<vmem>>, %arg4: memref<8x32xf32, #tpu.memory_space<vmem>>) attributes {dimension_semantics = [#tpu.dimension_semantics<parallel>], iteration_bounds = array<i64: 2>, scalar_prefetch = 0 : i64, scratch_operands = 1 : i64, tpu.core_type = #tpu.core_type<tc>, window_params = [{transform_indices = @transform_0, window_bounds = array<i64: 1, 8, 96>}, {transform_indices = @transform_1, window_bounds = array<i64: 1, 1, 8>}, {transform_indices = @transform_2, window_bounds = array<i64: 1, 8, 32>}]} {
    %c0 = arith.constant 0 : index
    %c0_0 = arith.constant 0 : index
    %c0_1 = arith.constant 0 : index
    %0 = vector.load %arg1[%c0, %c0_0, %c0_1] : memref<1x8x96xbf16, #tpu.memory_space<vmem>>, vector<1x8x96xbf16>
    %1 = vector.shape_cast %0 : vector<1x8x96xbf16> to vector<8x96xbf16>
    %2 = tpu.iota {dimensions = array<i32: 0>} : vector<8x8xi32>
    %3 = tpu.iota {dimensions = array<i32: 1>} : vector<8x8xi32>
    %4 = arith.cmpi sgt, %3, %2 : vector<8x8xi32>
    %c0_2 = arith.constant 0 : index
    %c0_3 = arith.constant 0 : index
    %c0_4 = arith.constant 0 : index
    %5 = vector.load %arg2[%c0_2, %c0_3, %c0_4] : memref<1x1x8xbf16, #tpu.memory_space<vmem>>, vector<1x1x8xbf16>
    %6 = vector.shape_cast %5 : vector<1x1x8xbf16> to vector<1x8xbf16>
    %cst = arith.constant 5.000000e-01 : bf16
    %7 = vector.broadcast %cst : bf16 to vector<1x8xbf16>
    %8 = arith.cmpf ogt, %6, %7 : vector<1x8xbf16>
    %9 = vector.broadcast %8 : vector<1x8xi1> to vector<8x8xi1>
    %10 = arith.ori %4, %9 : vector<8x8xi1>
    %11 = vector.extract_strided_slice %1 {offsets = [0, 0], sizes = [8, 8], strides = [1, 1]} : vector<8x96xbf16> to vector<8x8xbf16>
    %12 = vector.extract_strided_slice %1 {offsets = [0, 32], sizes = [8, 8], strides = [1, 1]} : vector<8x96xbf16> to vector<8x8xbf16>
    %13 = vector.extract_strided_slice %1 {offsets = [0, 64], sizes = [8, 8], strides = [1, 1]} : vector<8x96xbf16> to vector<8x8xbf16>
    %cst_5 = arith.constant dense<0.000000e+00> : vector<8x8xf32>
    %14 = tpu.matmul %11, %12, %cst_5 {dimension_numbers = #tpu.dot_dimension_numbers<[1], [1], [0], [0], [0, 0, 1, 0], [], []>} : vector<8x8xbf16>, vector<8x8xbf16>, vector<8x8xf32> -> vector<8x8xf32>
    %cst_6 = arith.constant -9.99999984E+17 : f32
    %15 = vector.broadcast %cst_6 : f32 to vector<8x8xf32>
    %16 = arith.select %10, %15, %14 : vector<8x8xi1>, vector<8x8xf32>
    %cst_7 = arith.constant dense<0xFF800000> : vector<8xf32>
    %17 = vector.multi_reduction <maximumf>, %16, %cst_7 [1] : vector<8x8xf32> to vector<8xf32>
    %18 = vector.shape_cast %17 : vector<8xf32> to vector<8x1xf32>
    %19 = vector.broadcast %18 : vector<8x1xf32> to vector<8x8xf32>
    %20 = arith.subf %16, %19 : vector<8x8xf32>
    %21 = math.exp %20 : vector<8x8xf32>
    %cst_8 = arith.constant dense<0.000000e+00> : vector<8xf32>
    %22 = vector.multi_reduction <add>, %21, %cst_8 [1] : vector<8x8xf32> to vector<8xf32>
    %23 = vector.shape_cast %22 : vector<8xf32> to vector<8x1xf32>
    %24 = tpu.reciprocal %23 {approx = true} : vector<8x1xf32> -> vector<8x1xf32>
    %25 = vector.broadcast %24 : vector<8x1xf32> to vector<8x8xf32>
    %26 = arith.mulf %21, %25 : vector<8x8xf32>
    %27 = arith.truncf %26 : vector<8x8xf32> to vector<8x8xbf16>
    %cst_9 = arith.constant dense<0.000000e+00> : vector<8x8xf32>
    %28 = tpu.matmul %27, %13, %cst_9 {dimension_numbers = #tpu.dot_dimension_numbers<[1], [0], [0], [1], [0, 0, 1, 1], [], []>} : vector<8x8xbf16>, vector<8x8xbf16>, vector<8x8xf32> -> vector<8x8xf32>
    %c0_10 = arith.constant 0 : index
    %c0_11 = arith.constant 0 : index
    %29 = vector.load %arg4[%c0_10, %c0_11] : memref<8x32xf32, #tpu.memory_space<vmem>>, vector<8x8xf32>
    tpu.vector_store %arg4[%c0_10, %c0_11], %28 {strides = array<i32>} : memref<8x32xf32, #tpu.memory_space<vmem>>, vector<8x8xf32>,
    %30 = vector.extract_strided_slice %1 {offsets = [0, 8], sizes = [8, 8], strides = [1, 1]} : vector<8x96xbf16> to vector<8x8xbf16>
    %31 = vector.extract_strided_slice %1 {offsets = [0, 40], sizes = [8, 8], strides = [1, 1]} : vector<8x96xbf16> to vector<8x8xbf16>
    %32 = vector.extract_strided_slice %1 {offsets = [0, 72], sizes = [8, 8], strides = [1, 1]} : vector<8x96xbf16> to vector<8x8xbf16>
    %cst_12 = arith.constant dense<0.000000e+00> : vector<8x8xf32>
    %33 = tpu.matmul %30, %31, %cst_12 {dimension_numbers = #tpu.dot_dimension_numbers<[1], [1], [0], [0], [0, 0, 1, 0], [], []>} : vector<8x8xbf16>, vector<8x8xbf16>, vector<8x8xf32> -> vector<8x8xf32>
    %cst_13 = arith.constant -9.99999984E+17 : f32
    %34 = vector.broadcast %cst_13 : f32 to vector<8x8xf32>
    %35 = arith.select %10, %34, %33 : vector<8x8xi1>, vector<8x8xf32>
    %cst_14 = arith.constant dense<0xFF800000> : vector<8xf32>
    %36 = vector.multi_reduction <maximumf>, %35, %cst_14 [1] : vector<8x8xf32> to vector<8xf32>
    %37 = vector.shape_cast %36 : vector<8xf32> to vector<8x1xf32>
    %38 = vector.broadcast %37 : vector<8x1xf32> to vector<8x8xf32>
    %39 = arith.subf %35, %38 : vector<8x8xf32>
    %40 = math.exp %39 : vector<8x8xf32>
    %cst_15 = arith.constant dense<0.000000e+00> : vector<8xf32>
    %41 = vector.multi_reduction <add>, %40, %cst_15 [1] : vector<8x8xf32> to vector<8xf32>
    %42 = vector.shape_cast %41 : vector<8xf32> to vector<8x1xf32>
    %43 = tpu.reciprocal %42 {approx = true} : vector<8x1xf32> -> vector<8x1xf32>
    %44 = vector.broadcast %43 : vector<8x1xf32> to vector<8x8xf32>
    %45 = arith.mulf %40, %44 : vector<8x8xf32>
    %46 = arith.truncf %45 : vector<8x8xf32> to vector<8x8xbf16>
    %cst_16 = arith.constant dense<0.000000e+00> : vector<8x8xf32>
    %47 = tpu.matmul %46, %32, %cst_16 {dimension_numbers = #tpu.dot_dimension_numbers<[1], [0], [0], [1], [0, 0, 1, 1], [], []>} : vector<8x8xbf16>, vector<8x8xbf16>, vector<8x8xf32> -> vector<8x8xf32>
    %c0_17 = arith.constant 0 : index
    %c8 = arith.constant 8 : index
    %48 = vector.load %arg4[%c0_17, %c8] : memref<8x32xf32, #tpu.memory_space<vmem>>, vector<8x8xf32>
    tpu.vector_store %arg4[%c0_17, %c8], %47 {strides = array<i32>} : memref<8x32xf32, #tpu.memory_space<vmem>>, vector<8x8xf32>,
    %49 = vector.extract_strided_slice %1 {offsets = [0, 16], sizes = [8, 8], strides = [1, 1]} : vector<8x96xbf16> to vector<8x8xbf16>
    %50 = vector.extract_strided_slice %1 {offsets = [0, 48], sizes = [8, 8], strides = [1, 1]} : vector<8x96xbf16> to vector<8x8xbf16>
    %51 = vector.extract_strided_slice %1 {offsets = [0, 80], sizes = [8, 8], strides = [1, 1]} : vector<8x96xbf16> to vector<8x8xbf16>
    %cst_18 = arith.constant dense<0.000000e+00> : vector<8x8xf32>
    %52 = tpu.matmul %49, %50, %cst_18 {dimension_numbers = #tpu.dot_dimension_numbers<[1], [1], [0], [0], [0, 0, 1, 0], [], []>} : vector<8x8xbf16>, vector<8x8xbf16>, vector<8x8xf32> -> vector<8x8xf32>
    %cst_19 = arith.constant -9.99999984E+17 : f32
    %53 = vector.broadcast %cst_19 : f32 to vector<8x8xf32>
    %54 = arith.select %10, %53, %52 : vector<8x8xi1>, vector<8x8xf32>
    %cst_20 = arith.constant dense<0xFF800000> : vector<8xf32>
    %55 = vector.multi_reduction <maximumf>, %54, %cst_20 [1] : vector<8x8xf32> to vector<8xf32>
    %56 = vector.shape_cast %55 : vector<8xf32> to vector<8x1xf32>
    %57 = vector.broadcast %56 : vector<8x1xf32> to vector<8x8xf32>
    %58 = arith.subf %54, %57 : vector<8x8xf32>
    %59 = math.exp %58 : vector<8x8xf32>
    %cst_21 = arith.constant dense<0.000000e+00> : vector<8xf32>
    %60 = vector.multi_reduction <add>, %59, %cst_21 [1] : vector<8x8xf32> to vector<8xf32>
    %61 = vector.shape_cast %60 : vector<8xf32> to vector<8x1xf32>
    %62 = tpu.reciprocal %61 {approx = true} : vector<8x1xf32> -> vector<8x1xf32>
    %63 = vector.broadcast %62 : vector<8x1xf32> to vector<8x8xf32>
    %64 = arith.mulf %59, %63 : vector<8x8xf32>
    %65 = arith.truncf %64 : vector<8x8xf32> to vector<8x8xbf16>
    %cst_22 = arith.constant dense<0.000000e+00> : vector<8x8xf32>
    %66 = tpu.matmul %65, %51, %cst_22 {dimension_numbers = #tpu.dot_dimension_numbers<[1], [0], [0], [1], [0, 0, 1, 1], [], []>} : vector<8x8xbf16>, vector<8x8xbf16>, vector<8x8xf32> -> vector<8x8xf32>
    %c0_23 = arith.constant 0 : index
    %c16 = arith.constant 16 : index
    %67 = vector.load %arg4[%c0_23, %c16] : memref<8x32xf32, #tpu.memory_space<vmem>>, vector<8x8xf32>
    tpu.vector_store %arg4[%c0_23, %c16], %66 {strides = array<i32>} : memref<8x32xf32, #tpu.memory_space<vmem>>, vector<8x8xf32>,
    %68 = vector.extract_strided_slice %1 {offsets = [0, 24], sizes = [8, 8], strides = [1, 1]} : vector<8x96xbf16> to vector<8x8xbf16>
    %69 = vector.extract_strided_slice %1 {offsets = [0, 56], sizes = [8, 8], strides = [1, 1]} : vector<8x96xbf16> to vector<8x8xbf16>
    %70 = vector.extract_strided_slice %1 {offsets = [0, 88], sizes = [8, 8], strides = [1, 1]} : vector<8x96xbf16> to vector<8x8xbf16>
    %cst_24 = arith.constant dense<0.000000e+00> : vector<8x8xf32>
    %71 = tpu.matmul %68, %69, %cst_24 {dimension_numbers = #tpu.dot_dimension_numbers<[1], [1], [0], [0], [0, 0, 1, 0], [], []>} : vector<8x8xbf16>, vector<8x8xbf16>, vector<8x8xf32> -> vector<8x8xf32>
    %cst_25 = arith.constant -9.99999984E+17 : f32
    %72 = vector.broadcast %cst_25 : f32 to vector<8x8xf32>
    %73 = arith.select %10, %72, %71 : vector<8x8xi1>, vector<8x8xf32>
    %cst_26 = arith.constant dense<0xFF800000> : vector<8xf32>
    %74 = vector.multi_reduction <maximumf>, %73, %cst_26 [1] : vector<8x8xf32> to vector<8xf32>
    %75 = vector.shape_cast %74 : vector<8xf32> to vector<8x1xf32>
    %76 = vector.broadcast %75 : vector<8x1xf32> to vector<8x8xf32>
    %77 = arith.subf %73, %76 : vector<8x8xf32>
    %78 = math.exp %77 : vector<8x8xf32>
    %cst_27 = arith.constant dense<0.000000e+00> : vector<8xf32>
    %79 = vector.multi_reduction <add>, %78, %cst_27 [1] : vector<8x8xf32> to vector<8xf32>
    %80 = vector.shape_cast %79 : vector<8xf32> to vector<8x1xf32>
    %81 = tpu.reciprocal %80 {approx = true} : vector<8x1xf32> -> vector<8x1xf32>
    %82 = vector.broadcast %81 : vector<8x1xf32> to vector<8x8xf32>
    %83 = arith.mulf %78, %82 : vector<8x8xf32>
    %84 = arith.truncf %83 : vector<8x8xf32> to vector<8x8xbf16>
    %cst_28 = arith.constant dense<0.000000e+00> : vector<8x8xf32>
    %85 = tpu.matmul %84, %70, %cst_28 {dimension_numbers = #tpu.dot_dimension_numbers<[1], [0], [0], [1], [0, 0, 1, 1], [], []>} : vector<8x8xbf16>, vector<8x8xbf16>, vector<8x8xf32> -> vector<8x8xf32>
    %c0_29 = arith.constant 0 : index
    %c24 = arith.constant 24 : index
    %86 = vector.load %arg4[%c0_29, %c24] : memref<8x32xf32, #tpu.memory_space<vmem>>, vector<8x8xf32>
    tpu.vector_store %arg4[%c0_29, %c24], %85 {strides = array<i32>} : memref<8x32xf32, #tpu.memory_space<vmem>>, vector<8x8xf32>,
    %c0_30 = arith.constant 0 : index
    %c0_31 = arith.constant 0 : index
    %87 = vector.load %arg4[%c0_30, %c0_31] : memref<8x32xf32, #tpu.memory_space<vmem>>, vector<8x32xf32>
    %88 = arith.truncf %87 : vector<8x32xf32> to vector<8x32xbf16>
    %c0_32 = arith.constant 0 : index
    %c0_33 = arith.constant 0 : index
    %c0_34 = arith.constant 0 : index
    %89 = vector.load %arg3[%c0_32, %c0_33, %c0_34] : memref<1x8x32xbf16, #tpu.memory_space<vmem>>, vector<1x8x32xbf16>
    %90 = vector.shape_cast %89 : vector<1x8x32xbf16> to vector<8x32xbf16>
    %91 = vector.shape_cast %88 : vector<8x32xbf16> to vector<1x8x32xbf16>
    tpu.vector_store %arg3[%c0_32, %c0_33, %c0_34], %91 {strides = array<i32>} : memref<1x8x32xbf16, #tpu.memory_space<vmem>>, vector<1x8x32xbf16>,
    return
  }
  func.func @transform_0(%arg0: i32) -> (i32, i32, i32) {
    %c0_i32 = arith.constant 0 : i32
    %c0_i32_0 = arith.constant 0 : i32
    %c0_i32_1 = arith.constant 0 : i32
    return %arg0, %c0_i32, %c0_i32_0 : i32, i32, i32
  }
  func.func @transform_1(%arg0: i32) -> (i32, i32, i32) {
    %c0_i32 = arith.constant 0 : i32
    %c0_i32_0 = arith.constant 0 : i32
    %c0_i32_1 = arith.constant 0 : i32
    return %arg0, %c0_i32, %c0_i32_0 : i32, i32, i32
  }
  func.func @transform_2(%arg0: i32) -> (i32, i32, i32) {
    %c0_i32 = arith.constant 0 : i32
    %c0_i32_0 = arith.constant 0 : i32
    %c0_i32_1 = arith.constant 0 : i32
    return %arg0, %c0_i32, %c0_i32_0 : i32, i32, i32
  }
}

module attributes {stable_mosaic.version = 11 : i64} {
  func.func @_proj_res_ln_matmul_kernel(%arg0: i32, %arg1: memref<8x32xbf16, #tpu.memory_space<vmem>>, %arg2: memref<32x32xbf16, #tpu.memory_space<vmem>>, %arg3: memref<1x32xf32, #tpu.memory_space<vmem>>, %arg4: memref<8x32xbf16, #tpu.memory_space<vmem>>, %arg5: memref<1x32xf32, #tpu.memory_space<vmem>>, %arg6: memref<1x32xf32, #tpu.memory_space<vmem>>, %arg7: memref<32x32xbf16, #tpu.memory_space<vmem>>, %arg8: memref<1x32xf32, #tpu.memory_space<vmem>>, %arg9: memref<8x32xbf16, #tpu.memory_space<vmem>>, %arg10: memref<8x32xbf16, #tpu.memory_space<vmem>>) attributes {dimension_semantics = [#tpu.dimension_semantics<parallel>], iteration_bounds = array<i64: 2>, scalar_prefetch = 0 : i64, scratch_operands = 0 : i64, tpu.core_type = #tpu.core_type<tc>, window_params = [{transform_indices = @transform_0, window_bounds = array<i64: 8, 32>}, {pipeline_mode = #tpu.pipeline_mode<synchronous>, transform_indices = @transform_1, window_bounds = array<i64: 32, 32>}, {pipeline_mode = #tpu.pipeline_mode<synchronous>, transform_indices = @transform_2, window_bounds = array<i64: 1, 32>}, {transform_indices = @transform_3, window_bounds = array<i64: 8, 32>}, {pipeline_mode = #tpu.pipeline_mode<synchronous>, transform_indices = @transform_4, window_bounds = array<i64: 1, 32>}, {pipeline_mode = #tpu.pipeline_mode<synchronous>, transform_indices = @transform_5, window_bounds = array<i64: 1, 32>}, {pipeline_mode = #tpu.pipeline_mode<synchronous>, transform_indices = @transform_6, window_bounds = array<i64: 32, 32>}, {pipeline_mode = #tpu.pipeline_mode<synchronous>, transform_indices = @transform_7, window_bounds = array<i64: 1, 32>}, {transform_indices = @transform_8, window_bounds = array<i64: 8, 32>}, {transform_indices = @transform_9, window_bounds = array<i64: 8, 32>}]} {
    %c0 = arith.constant 0 : index
    %c0_0 = arith.constant 0 : index
    %0 = vector.load %arg1[%c0, %c0_0] : memref<8x32xbf16, #tpu.memory_space<vmem>>, vector<8x32xbf16>
    %c0_1 = arith.constant 0 : index
    %c0_2 = arith.constant 0 : index
    %1 = vector.load %arg2[%c0_1, %c0_2] : memref<32x32xbf16, #tpu.memory_space<vmem>>, vector<32x32xbf16>
    %cst = arith.constant dense<0.000000e+00> : vector<8x32xf32>
    %2 = tpu.matmul %0, %1, %cst {dimension_numbers = #tpu.dot_dimension_numbers<[1], [0], [0], [1], [0, 0, 1, 1], [], []>} : vector<8x32xbf16>, vector<32x32xbf16>, vector<8x32xf32> -> vector<8x32xf32>
    %c0_3 = arith.constant 0 : index
    %c0_4 = arith.constant 0 : index
    %3 = vector.load %arg3[%c0_3, %c0_4] : memref<1x32xf32, #tpu.memory_space<vmem>>, vector<1x32xf32>
    %4 = vector.broadcast %3 : vector<1x32xf32> to vector<8x32xf32>
    %5 = arith.addf %2, %4 : vector<8x32xf32>
    %c0_5 = arith.constant 0 : index
    %c0_6 = arith.constant 0 : index
    %6 = vector.load %arg4[%c0_5, %c0_6] : memref<8x32xbf16, #tpu.memory_space<vmem>>, vector<8x32xbf16>
    %7 = arith.extf %6 : vector<8x32xbf16> to vector<8x32xf32>
    %8 = arith.addf %5, %7 : vector<8x32xf32>
    %9 = arith.truncf %8 : vector<8x32xf32> to vector<8x32xbf16>
    %c0_7 = arith.constant 0 : index
    %c0_8 = arith.constant 0 : index
    %10 = vector.load %arg9[%c0_7, %c0_8] : memref<8x32xbf16, #tpu.memory_space<vmem>>, vector<8x32xbf16>
    tpu.vector_store %arg9[%c0_7, %c0_8], %9 {strides = array<i32>} : memref<8x32xbf16, #tpu.memory_space<vmem>>, vector<8x32xbf16>,
    %c0_9 = arith.constant 0 : index
    %c0_10 = arith.constant 0 : index
    %11 = vector.load %arg5[%c0_9, %c0_10] : memref<1x32xf32, #tpu.memory_space<vmem>>, vector<1x32xf32>
    %c0_11 = arith.constant 0 : index
    %c0_12 = arith.constant 0 : index
    %12 = vector.load %arg6[%c0_11, %c0_12] : memref<1x32xf32, #tpu.memory_space<vmem>>, vector<1x32xf32>
    %cst_13 = arith.constant dense<0.000000e+00> : vector<8xf32>
    %13 = vector.multi_reduction <add>, %8, %cst_13 [1] : vector<8x32xf32> to vector<8xf32>
    %14 = vector.shape_cast %13 : vector<8xf32> to vector<8x1xf32>
    %cst_14 = arith.constant 3.200000e+01 : f32
    %15 = vector.broadcast %cst_14 : f32 to vector<8x1xf32>
    %16 = arith.divf %14, %15 : vector<8x1xf32>
    %17 = vector.broadcast %16 : vector<8x1xf32> to vector<8x32xf32>
    %18 = arith.subf %8, %17 : vector<8x32xf32>
    %19 = arith.mulf %18, %18 : vector<8x32xf32>
    %cst_15 = arith.constant dense<0.000000e+00> : vector<8xf32>
    %20 = vector.multi_reduction <add>, %19, %cst_15 [1] : vector<8x32xf32> to vector<8xf32>
    %21 = vector.shape_cast %20 : vector<8xf32> to vector<8x1xf32>
    %cst_16 = arith.constant 3.200000e+01 : f32
    %22 = vector.broadcast %cst_16 : f32 to vector<8x1xf32>
    %23 = arith.divf %21, %22 : vector<8x1xf32>
    %24 = vector.broadcast %16 : vector<8x1xf32> to vector<8x32xf32>
    %25 = arith.subf %8, %24 : vector<8x32xf32>
    %cst_17 = arith.constant 9.99999997E-7 : f32
    %26 = vector.broadcast %cst_17 : f32 to vector<8x1xf32>
    %27 = arith.addf %23, %26 : vector<8x1xf32>
    %28 = math.rsqrt %27 : vector<8x1xf32>
    %29 = vector.broadcast %28 : vector<8x1xf32> to vector<8x32xf32>
    %30 = arith.mulf %25, %29 : vector<8x32xf32>
    %31 = vector.broadcast %11 : vector<1x32xf32> to vector<8x32xf32>
    %32 = arith.mulf %30, %31 : vector<8x32xf32>
    %33 = vector.broadcast %12 : vector<1x32xf32> to vector<8x32xf32>
    %34 = arith.addf %32, %33 : vector<8x32xf32>
    %35 = arith.truncf %34 : vector<8x32xf32> to vector<8x32xbf16>
    %c0_18 = arith.constant 0 : index
    %c0_19 = arith.constant 0 : index
    %36 = vector.load %arg7[%c0_18, %c0_19] : memref<32x32xbf16, #tpu.memory_space<vmem>>, vector<32x32xbf16>
    %cst_20 = arith.constant dense<0.000000e+00> : vector<8x32xf32>
    %37 = tpu.matmul %35, %36, %cst_20 {dimension_numbers = #tpu.dot_dimension_numbers<[1], [0], [0], [1], [0, 0, 1, 1], [], []>} : vector<8x32xbf16>, vector<32x32xbf16>, vector<8x32xf32> -> vector<8x32xf32>
    %c0_21 = arith.constant 0 : index
    %c0_22 = arith.constant 0 : index
    %38 = vector.load %arg8[%c0_21, %c0_22] : memref<1x32xf32, #tpu.memory_space<vmem>>, vector<1x32xf32>
    %39 = vector.broadcast %38 : vector<1x32xf32> to vector<8x32xf32>
    %40 = arith.addf %37, %39 : vector<8x32xf32>
    %41 = arith.truncf %40 : vector<8x32xf32> to vector<8x32xbf16>
    %c0_23 = arith.constant 0 : index
    %c0_24 = arith.constant 0 : index
    %42 = vector.load %arg10[%c0_23, %c0_24] : memref<8x32xbf16, #tpu.memory_space<vmem>>, vector<8x32xbf16>
    tpu.vector_store %arg10[%c0_23, %c0_24], %41 {strides = array<i32>} : memref<8x32xbf16, #tpu.memory_space<vmem>>, vector<8x32xbf16>,
    return
  }
  func.func @transform_0(%arg0: i32) -> (i32, i32) {
    %c0_i32 = arith.constant 0 : i32
    %c0_i32_0 = arith.constant 0 : i32
    return %arg0, %c0_i32 : i32, i32
  }
  func.func @transform_1(%arg0: i32) -> (i32, i32) {
    %c0_i32 = arith.constant 0 : i32
    %c0_i32_0 = arith.constant 0 : i32
    %c0_i32_1 = arith.constant 0 : i32
    return %c0_i32, %c0_i32_0 : i32, i32
  }
  func.func @transform_2(%arg0: i32) -> (i32, i32) {
    %c0_i32 = arith.constant 0 : i32
    %c0_i32_0 = arith.constant 0 : i32
    %c0_i32_1 = arith.constant 0 : i32
    return %c0_i32, %c0_i32_0 : i32, i32
  }
  func.func @transform_3(%arg0: i32) -> (i32, i32) {
    %c0_i32 = arith.constant 0 : i32
    %c0_i32_0 = arith.constant 0 : i32
    return %arg0, %c0_i32 : i32, i32
  }
  func.func @transform_4(%arg0: i32) -> (i32, i32) {
    %c0_i32 = arith.constant 0 : i32
    %c0_i32_0 = arith.constant 0 : i32
    %c0_i32_1 = arith.constant 0 : i32
    return %c0_i32, %c0_i32_0 : i32, i32
  }
  func.func @transform_5(%arg0: i32) -> (i32, i32) {
    %c0_i32 = arith.constant 0 : i32
    %c0_i32_0 = arith.constant 0 : i32
    %c0_i32_1 = arith.constant 0 : i32
    return %c0_i32, %c0_i32_0 : i32, i32
  }
  func.func @transform_6(%arg0: i32) -> (i32, i32) {
    %c0_i32 = arith.constant 0 : i32
    %c0_i32_0 = arith.constant 0 : i32
    %c0_i32_1 = arith.constant 0 : i32
    return %c0_i32, %c0_i32_0 : i32, i32
  }
  func.func @transform_7(%arg0: i32) -> (i32, i32) {
    %c0_i32 = arith.constant 0 : i32
    %c0_i32_0 = arith.constant 0 : i32
    %c0_i32_1 = arith.constant 0 : i32
    return %c0_i32, %c0_i32_0 : i32, i32
  }
  func.func @transform_8(%arg0: i32) -> (i32, i32) {
    %c0_i32 = arith.constant 0 : i32
    %c0_i32_0 = arith.constant 0 : i32
    return %arg0, %c0_i32 : i32, i32
  }
  func.func @transform_9(%arg0: i32) -> (i32, i32) {
    %c0_i32 = arith.constant 0 : i32
    %c0_i32_0 = arith.constant 0 : i32
    return %arg0, %c0_i32 : i32, i32
  }
}

module attributes {stable_mosaic.version = 11 : i64} {
  func.func @_ctx_attn_kernel(%arg0: i32, %arg1: memref<1x8x32xbf16, #tpu.memory_space<vmem>>, %arg2: memref<1x1x8x64xbf16, #tpu.memory_space<vmem>>, %arg3: memref<1x1x8xbf16, #tpu.memory_space<vmem>>, %arg4: memref<1x8x32xbf16, #tpu.memory_space<vmem>>, %arg5: memref<8x32xf32, #tpu.memory_space<vmem>>) attributes {dimension_semantics = [#tpu.dimension_semantics<parallel>], iteration_bounds = array<i64: 2>, scalar_prefetch = 0 : i64, scratch_operands = 1 : i64, tpu.core_type = #tpu.core_type<tc>, window_params = [{transform_indices = @transform_0, window_bounds = array<i64: 1, 8, 32>}, {transform_indices = @transform_1, window_bounds = array<i64: 1, 1, 8, 64>}, {transform_indices = @transform_2, window_bounds = array<i64: 1, 1, 8>}, {transform_indices = @transform_3, window_bounds = array<i64: 1, 8, 32>}]} {
    %c0 = arith.constant 0 : index
    %c0_0 = arith.constant 0 : index
    %c0_1 = arith.constant 0 : index
    %0 = vector.load %arg1[%c0, %c0_0, %c0_1] : memref<1x8x32xbf16, #tpu.memory_space<vmem>>, vector<1x8x32xbf16>
    %1 = vector.shape_cast %0 : vector<1x8x32xbf16> to vector<8x32xbf16>
    %c0_2 = arith.constant 0 : index
    %c0_3 = arith.constant 0 : index
    %c0_4 = arith.constant 0 : index
    %c0_5 = arith.constant 0 : index
    %2 = vector.load %arg2[%c0_2, %c0_3, %c0_4, %c0_5] : memref<1x1x8x64xbf16, #tpu.memory_space<vmem>>, vector<1x1x8x64xbf16>
    %3 = vector.shape_cast %2 : vector<1x1x8x64xbf16> to vector<8x64xbf16>
    %c0_6 = arith.constant 0 : index
    %c0_7 = arith.constant 0 : index
    %c0_8 = arith.constant 0 : index
    %4 = vector.load %arg3[%c0_6, %c0_7, %c0_8] : memref<1x1x8xbf16, #tpu.memory_space<vmem>>, vector<1x1x8xbf16>
    %5 = vector.shape_cast %4 : vector<1x1x8xbf16> to vector<1x8xbf16>
    %cst = arith.constant 5.000000e-01 : bf16
    %6 = vector.broadcast %cst : bf16 to vector<1x8xbf16>
    %7 = arith.cmpf ogt, %5, %6 : vector<1x8xbf16>
    %8 = vector.extract_strided_slice %1 {offsets = [0, 0], sizes = [8, 8], strides = [1, 1]} : vector<8x32xbf16> to vector<8x8xbf16>
    %9 = vector.extract_strided_slice %3 {offsets = [0, 0], sizes = [8, 8], strides = [1, 1]} : vector<8x64xbf16> to vector<8x8xbf16>
    %10 = vector.extract_strided_slice %3 {offsets = [0, 32], sizes = [8, 8], strides = [1, 1]} : vector<8x64xbf16> to vector<8x8xbf16>
    %cst_9 = arith.constant dense<0.000000e+00> : vector<8x8xf32>
    %11 = tpu.matmul %8, %9, %cst_9 {dimension_numbers = #tpu.dot_dimension_numbers<[1], [1], [0], [0], [0, 0, 1, 0], [], []>} : vector<8x8xbf16>, vector<8x8xbf16>, vector<8x8xf32> -> vector<8x8xf32>
    %cst_10 = arith.constant -9.99999984E+17 : f32
    %12 = vector.shape_cast %7 : vector<1x8xi1> to vector<1x8xi1>
    %13 = vector.broadcast %12 : vector<1x8xi1> to vector<8x8xi1>
    %14 = vector.broadcast %cst_10 : f32 to vector<8x8xf32>
    %15 = arith.select %13, %14, %11 : vector<8x8xi1>, vector<8x8xf32>
    %cst_11 = arith.constant dense<0xFF800000> : vector<8xf32>
    %16 = vector.multi_reduction <maximumf>, %15, %cst_11 [1] : vector<8x8xf32> to vector<8xf32>
    %17 = vector.shape_cast %16 : vector<8xf32> to vector<8x1xf32>
    %18 = vector.broadcast %17 : vector<8x1xf32> to vector<8x8xf32>
    %19 = arith.subf %15, %18 : vector<8x8xf32>
    %20 = math.exp %19 : vector<8x8xf32>
    %cst_12 = arith.constant dense<0.000000e+00> : vector<8xf32>
    %21 = vector.multi_reduction <add>, %20, %cst_12 [1] : vector<8x8xf32> to vector<8xf32>
    %22 = vector.shape_cast %21 : vector<8xf32> to vector<8x1xf32>
    %23 = tpu.reciprocal %22 {approx = true} : vector<8x1xf32> -> vector<8x1xf32>
    %24 = vector.broadcast %23 : vector<8x1xf32> to vector<8x8xf32>
    %25 = arith.mulf %20, %24 : vector<8x8xf32>
    %26 = arith.truncf %25 : vector<8x8xf32> to vector<8x8xbf16>
    %cst_13 = arith.constant dense<0.000000e+00> : vector<8x8xf32>
    %27 = tpu.matmul %26, %10, %cst_13 {dimension_numbers = #tpu.dot_dimension_numbers<[1], [0], [0], [1], [0, 0, 1, 1], [], []>} : vector<8x8xbf16>, vector<8x8xbf16>, vector<8x8xf32> -> vector<8x8xf32>
    %c0_14 = arith.constant 0 : index
    %c0_15 = arith.constant 0 : index
    %28 = vector.load %arg5[%c0_14, %c0_15] : memref<8x32xf32, #tpu.memory_space<vmem>>, vector<8x8xf32>
    tpu.vector_store %arg5[%c0_14, %c0_15], %27 {strides = array<i32>} : memref<8x32xf32, #tpu.memory_space<vmem>>, vector<8x8xf32>,
    %29 = vector.extract_strided_slice %1 {offsets = [0, 8], sizes = [8, 8], strides = [1, 1]} : vector<8x32xbf16> to vector<8x8xbf16>
    %30 = vector.extract_strided_slice %3 {offsets = [0, 8], sizes = [8, 8], strides = [1, 1]} : vector<8x64xbf16> to vector<8x8xbf16>
    %31 = vector.extract_strided_slice %3 {offsets = [0, 40], sizes = [8, 8], strides = [1, 1]} : vector<8x64xbf16> to vector<8x8xbf16>
    %cst_16 = arith.constant dense<0.000000e+00> : vector<8x8xf32>
    %32 = tpu.matmul %29, %30, %cst_16 {dimension_numbers = #tpu.dot_dimension_numbers<[1], [1], [0], [0], [0, 0, 1, 0], [], []>} : vector<8x8xbf16>, vector<8x8xbf16>, vector<8x8xf32> -> vector<8x8xf32>
    %cst_17 = arith.constant -9.99999984E+17 : f32
    %33 = vector.shape_cast %7 : vector<1x8xi1> to vector<1x8xi1>
    %34 = vector.broadcast %33 : vector<1x8xi1> to vector<8x8xi1>
    %35 = vector.broadcast %cst_17 : f32 to vector<8x8xf32>
    %36 = arith.select %34, %35, %32 : vector<8x8xi1>, vector<8x8xf32>
    %cst_18 = arith.constant dense<0xFF800000> : vector<8xf32>
    %37 = vector.multi_reduction <maximumf>, %36, %cst_18 [1] : vector<8x8xf32> to vector<8xf32>
    %38 = vector.shape_cast %37 : vector<8xf32> to vector<8x1xf32>
    %39 = vector.broadcast %38 : vector<8x1xf32> to vector<8x8xf32>
    %40 = arith.subf %36, %39 : vector<8x8xf32>
    %41 = math.exp %40 : vector<8x8xf32>
    %cst_19 = arith.constant dense<0.000000e+00> : vector<8xf32>
    %42 = vector.multi_reduction <add>, %41, %cst_19 [1] : vector<8x8xf32> to vector<8xf32>
    %43 = vector.shape_cast %42 : vector<8xf32> to vector<8x1xf32>
    %44 = tpu.reciprocal %43 {approx = true} : vector<8x1xf32> -> vector<8x1xf32>
    %45 = vector.broadcast %44 : vector<8x1xf32> to vector<8x8xf32>
    %46 = arith.mulf %41, %45 : vector<8x8xf32>
    %47 = arith.truncf %46 : vector<8x8xf32> to vector<8x8xbf16>
    %cst_20 = arith.constant dense<0.000000e+00> : vector<8x8xf32>
    %48 = tpu.matmul %47, %31, %cst_20 {dimension_numbers = #tpu.dot_dimension_numbers<[1], [0], [0], [1], [0, 0, 1, 1], [], []>} : vector<8x8xbf16>, vector<8x8xbf16>, vector<8x8xf32> -> vector<8x8xf32>
    %c0_21 = arith.constant 0 : index
    %c8 = arith.constant 8 : index
    %49 = vector.load %arg5[%c0_21, %c8] : memref<8x32xf32, #tpu.memory_space<vmem>>, vector<8x8xf32>
    tpu.vector_store %arg5[%c0_21, %c8], %48 {strides = array<i32>} : memref<8x32xf32, #tpu.memory_space<vmem>>, vector<8x8xf32>,
    %50 = vector.extract_strided_slice %1 {offsets = [0, 16], sizes = [8, 8], strides = [1, 1]} : vector<8x32xbf16> to vector<8x8xbf16>
    %51 = vector.extract_strided_slice %3 {offsets = [0, 16], sizes = [8, 8], strides = [1, 1]} : vector<8x64xbf16> to vector<8x8xbf16>
    %52 = vector.extract_strided_slice %3 {offsets = [0, 48], sizes = [8, 8], strides = [1, 1]} : vector<8x64xbf16> to vector<8x8xbf16>
    %cst_22 = arith.constant dense<0.000000e+00> : vector<8x8xf32>
    %53 = tpu.matmul %50, %51, %cst_22 {dimension_numbers = #tpu.dot_dimension_numbers<[1], [1], [0], [0], [0, 0, 1, 0], [], []>} : vector<8x8xbf16>, vector<8x8xbf16>, vector<8x8xf32> -> vector<8x8xf32>
    %cst_23 = arith.constant -9.99999984E+17 : f32
    %54 = vector.shape_cast %7 : vector<1x8xi1> to vector<1x8xi1>
    %55 = vector.broadcast %54 : vector<1x8xi1> to vector<8x8xi1>
    %56 = vector.broadcast %cst_23 : f32 to vector<8x8xf32>
    %57 = arith.select %55, %56, %53 : vector<8x8xi1>, vector<8x8xf32>
    %cst_24 = arith.constant dense<0xFF800000> : vector<8xf32>
    %58 = vector.multi_reduction <maximumf>, %57, %cst_24 [1] : vector<8x8xf32> to vector<8xf32>
    %59 = vector.shape_cast %58 : vector<8xf32> to vector<8x1xf32>
    %60 = vector.broadcast %59 : vector<8x1xf32> to vector<8x8xf32>
    %61 = arith.subf %57, %60 : vector<8x8xf32>
    %62 = math.exp %61 : vector<8x8xf32>
    %cst_25 = arith.constant dense<0.000000e+00> : vector<8xf32>
    %63 = vector.multi_reduction <add>, %62, %cst_25 [1] : vector<8x8xf32> to vector<8xf32>
    %64 = vector.shape_cast %63 : vector<8xf32> to vector<8x1xf32>
    %65 = tpu.reciprocal %64 {approx = true} : vector<8x1xf32> -> vector<8x1xf32>
    %66 = vector.broadcast %65 : vector<8x1xf32> to vector<8x8xf32>
    %67 = arith.mulf %62, %66 : vector<8x8xf32>
    %68 = arith.truncf %67 : vector<8x8xf32> to vector<8x8xbf16>
    %cst_26 = arith.constant dense<0.000000e+00> : vector<8x8xf32>
    %69 = tpu.matmul %68, %52, %cst_26 {dimension_numbers = #tpu.dot_dimension_numbers<[1], [0], [0], [1], [0, 0, 1, 1], [], []>} : vector<8x8xbf16>, vector<8x8xbf16>, vector<8x8xf32> -> vector<8x8xf32>
    %c0_27 = arith.constant 0 : index
    %c16 = arith.constant 16 : index
    %70 = vector.load %arg5[%c0_27, %c16] : memref<8x32xf32, #tpu.memory_space<vmem>>, vector<8x8xf32>
    tpu.vector_store %arg5[%c0_27, %c16], %69 {strides = array<i32>} : memref<8x32xf32, #tpu.memory_space<vmem>>, vector<8x8xf32>,
    %71 = vector.extract_strided_slice %1 {offsets = [0, 24], sizes = [8, 8], strides = [1, 1]} : vector<8x32xbf16> to vector<8x8xbf16>
    %72 = vector.extract_strided_slice %3 {offsets = [0, 24], sizes = [8, 8], strides = [1, 1]} : vector<8x64xbf16> to vector<8x8xbf16>
    %73 = vector.extract_strided_slice %3 {offsets = [0, 56], sizes = [8, 8], strides = [1, 1]} : vector<8x64xbf16> to vector<8x8xbf16>
    %cst_28 = arith.constant dense<0.000000e+00> : vector<8x8xf32>
    %74 = tpu.matmul %71, %72, %cst_28 {dimension_numbers = #tpu.dot_dimension_numbers<[1], [1], [0], [0], [0, 0, 1, 0], [], []>} : vector<8x8xbf16>, vector<8x8xbf16>, vector<8x8xf32> -> vector<8x8xf32>
    %cst_29 = arith.constant -9.99999984E+17 : f32
    %75 = vector.shape_cast %7 : vector<1x8xi1> to vector<1x8xi1>
    %76 = vector.broadcast %75 : vector<1x8xi1> to vector<8x8xi1>
    %77 = vector.broadcast %cst_29 : f32 to vector<8x8xf32>
    %78 = arith.select %76, %77, %74 : vector<8x8xi1>, vector<8x8xf32>
    %cst_30 = arith.constant dense<0xFF800000> : vector<8xf32>
    %79 = vector.multi_reduction <maximumf>, %78, %cst_30 [1] : vector<8x8xf32> to vector<8xf32>
    %80 = vector.shape_cast %79 : vector<8xf32> to vector<8x1xf32>
    %81 = vector.broadcast %80 : vector<8x1xf32> to vector<8x8xf32>
    %82 = arith.subf %78, %81 : vector<8x8xf32>
    %83 = math.exp %82 : vector<8x8xf32>
    %cst_31 = arith.constant dense<0.000000e+00> : vector<8xf32>
    %84 = vector.multi_reduction <add>, %83, %cst_31 [1] : vector<8x8xf32> to vector<8xf32>
    %85 = vector.shape_cast %84 : vector<8xf32> to vector<8x1xf32>
    %86 = tpu.reciprocal %85 {approx = true} : vector<8x1xf32> -> vector<8x1xf32>
    %87 = vector.broadcast %86 : vector<8x1xf32> to vector<8x8xf32>
    %88 = arith.mulf %83, %87 : vector<8x8xf32>
    %89 = arith.truncf %88 : vector<8x8xf32> to vector<8x8xbf16>
    %cst_32 = arith.constant dense<0.000000e+00> : vector<8x8xf32>
    %90 = tpu.matmul %89, %73, %cst_32 {dimension_numbers = #tpu.dot_dimension_numbers<[1], [0], [0], [1], [0, 0, 1, 1], [], []>} : vector<8x8xbf16>, vector<8x8xbf16>, vector<8x8xf32> -> vector<8x8xf32>
    %c0_33 = arith.constant 0 : index
    %c24 = arith.constant 24 : index
    %91 = vector.load %arg5[%c0_33, %c24] : memref<8x32xf32, #tpu.memory_space<vmem>>, vector<8x8xf32>
    tpu.vector_store %arg5[%c0_33, %c24], %90 {strides = array<i32>} : memref<8x32xf32, #tpu.memory_space<vmem>>, vector<8x8xf32>,
    %c0_34 = arith.constant 0 : index
    %c0_35 = arith.constant 0 : index
    %92 = vector.load %arg5[%c0_34, %c0_35] : memref<8x32xf32, #tpu.memory_space<vmem>>, vector<8x32xf32>
    %93 = arith.truncf %92 : vector<8x32xf32> to vector<8x32xbf16>
    %c0_36 = arith.constant 0 : index
    %c0_37 = arith.constant 0 : index
    %c0_38 = arith.constant 0 : index
    %94 = vector.load %arg4[%c0_36, %c0_37, %c0_38] : memref<1x8x32xbf16, #tpu.memory_space<vmem>>, vector<1x8x32xbf16>
    %95 = vector.shape_cast %94 : vector<1x8x32xbf16> to vector<8x32xbf16>
    %96 = vector.shape_cast %93 : vector<8x32xbf16> to vector<1x8x32xbf16>
    tpu.vector_store %arg4[%c0_36, %c0_37, %c0_38], %96 {strides = array<i32>} : memref<1x8x32xbf16, #tpu.memory_space<vmem>>, vector<1x8x32xbf16>,
    return
  }
  func.func @transform_0(%arg0: i32) -> (i32, i32, i32) {
    %c0_i32 = arith.constant 0 : i32
    %c0_i32_0 = arith.constant 0 : i32
    %c0_i32_1 = arith.constant 0 : i32
    return %arg0, %c0_i32, %c0_i32_0 : i32, i32, i32
  }
  func.func @transform_1(%arg0: i32) -> (i32, i32, i32, i32) {
    %c0_i32 = arith.constant 0 : i32
    %c0_i32_0 = arith.constant 0 : i32
    %c0_i32_1 = arith.constant 0 : i32
    %c0_i32_2 = arith.constant 0 : i32
    return %c0_i32, %arg0, %c0_i32_0, %c0_i32_1 : i32, i32, i32, i32
  }
  func.func @transform_2(%arg0: i32) -> (i32, i32, i32) {
    %c0_i32 = arith.constant 0 : i32
    %c0_i32_0 = arith.constant 0 : i32
    %c0_i32_1 = arith.constant 0 : i32
    return %arg0, %c0_i32, %c0_i32_0 : i32, i32, i32
  }
  func.func @transform_3(%arg0: i32) -> (i32, i32, i32) {
    %c0_i32 = arith.constant 0 : i32
    %c0_i32_0 = arith.constant 0 : i32
    %c0_i32_1 = arith.constant 0 : i32
    return %arg0, %c0_i32, %c0_i32_0 : i32, i32, i32
  }
}

module attributes {stable_mosaic.version = 11 : i64} {
  func.func @_proj_res_ffn_kernel(%arg0: i32, %arg1: memref<8x32xbf16, #tpu.memory_space<vmem>>, %arg2: memref<32x32xbf16, #tpu.memory_space<vmem>>, %arg3: memref<1x32xf32, #tpu.memory_space<vmem>>, %arg4: memref<8x32xbf16, #tpu.memory_space<vmem>>, %arg5: memref<1x32xf32, #tpu.memory_space<vmem>>, %arg6: memref<1x32xf32, #tpu.memory_space<vmem>>, %arg7: memref<32x64xbf16, #tpu.memory_space<vmem>>, %arg8: memref<1x64xf32, #tpu.memory_space<vmem>>, %arg9: memref<64x32xbf16, #tpu.memory_space<vmem>>, %arg10: memref<1x32xf32, #tpu.memory_space<vmem>>, %arg11: memref<8x32xbf16, #tpu.memory_space<vmem>>) attributes {dimension_semantics = [#tpu.dimension_semantics<parallel>], iteration_bounds = array<i64: 2>, scalar_prefetch = 0 : i64, scratch_operands = 0 : i64, tpu.core_type = #tpu.core_type<tc>, window_params = [{transform_indices = @transform_0, window_bounds = array<i64: 8, 32>}, {pipeline_mode = #tpu.pipeline_mode<synchronous>, transform_indices = @transform_1, window_bounds = array<i64: 32, 32>}, {pipeline_mode = #tpu.pipeline_mode<synchronous>, transform_indices = @transform_2, window_bounds = array<i64: 1, 32>}, {transform_indices = @transform_3, window_bounds = array<i64: 8, 32>}, {pipeline_mode = #tpu.pipeline_mode<synchronous>, transform_indices = @transform_4, window_bounds = array<i64: 1, 32>}, {pipeline_mode = #tpu.pipeline_mode<synchronous>, transform_indices = @transform_5, window_bounds = array<i64: 1, 32>}, {pipeline_mode = #tpu.pipeline_mode<synchronous>, transform_indices = @transform_6, window_bounds = array<i64: 32, 64>}, {pipeline_mode = #tpu.pipeline_mode<synchronous>, transform_indices = @transform_7, window_bounds = array<i64: 1, 64>}, {pipeline_mode = #tpu.pipeline_mode<synchronous>, transform_indices = @transform_8, window_bounds = array<i64: 64, 32>}, {pipeline_mode = #tpu.pipeline_mode<synchronous>, transform_indices = @transform_9, window_bounds = array<i64: 1, 32>}, {transform_indices = @transform_10, window_bounds = array<i64: 8, 32>}]} {
    %c0 = arith.constant 0 : index
    %c0_0 = arith.constant 0 : index
    %0 = vector.load %arg1[%c0, %c0_0] : memref<8x32xbf16, #tpu.memory_space<vmem>>, vector<8x32xbf16>
    %c0_1 = arith.constant 0 : index
    %c0_2 = arith.constant 0 : index
    %1 = vector.load %arg2[%c0_1, %c0_2] : memref<32x32xbf16, #tpu.memory_space<vmem>>, vector<32x32xbf16>
    %cst = arith.constant dense<0.000000e+00> : vector<8x32xf32>
    %2 = tpu.matmul %0, %1, %cst {dimension_numbers = #tpu.dot_dimension_numbers<[1], [0], [0], [1], [0, 0, 1, 1], [], []>} : vector<8x32xbf16>, vector<32x32xbf16>, vector<8x32xf32> -> vector<8x32xf32>
    %c0_3 = arith.constant 0 : index
    %c0_4 = arith.constant 0 : index
    %3 = vector.load %arg3[%c0_3, %c0_4] : memref<1x32xf32, #tpu.memory_space<vmem>>, vector<1x32xf32>
    %4 = vector.broadcast %3 : vector<1x32xf32> to vector<8x32xf32>
    %5 = arith.addf %2, %4 : vector<8x32xf32>
    %c0_5 = arith.constant 0 : index
    %c0_6 = arith.constant 0 : index
    %6 = vector.load %arg4[%c0_5, %c0_6] : memref<8x32xbf16, #tpu.memory_space<vmem>>, vector<8x32xbf16>
    %7 = arith.extf %6 : vector<8x32xbf16> to vector<8x32xf32>
    %8 = arith.addf %5, %7 : vector<8x32xf32>
    %c0_7 = arith.constant 0 : index
    %c0_8 = arith.constant 0 : index
    %9 = vector.load %arg5[%c0_7, %c0_8] : memref<1x32xf32, #tpu.memory_space<vmem>>, vector<1x32xf32>
    %c0_9 = arith.constant 0 : index
    %c0_10 = arith.constant 0 : index
    %10 = vector.load %arg6[%c0_9, %c0_10] : memref<1x32xf32, #tpu.memory_space<vmem>>, vector<1x32xf32>
    %cst_11 = arith.constant dense<0.000000e+00> : vector<8xf32>
    %11 = vector.multi_reduction <add>, %8, %cst_11 [1] : vector<8x32xf32> to vector<8xf32>
    %12 = vector.shape_cast %11 : vector<8xf32> to vector<8x1xf32>
    %cst_12 = arith.constant 3.200000e+01 : f32
    %13 = vector.broadcast %cst_12 : f32 to vector<8x1xf32>
    %14 = arith.divf %12, %13 : vector<8x1xf32>
    %15 = vector.broadcast %14 : vector<8x1xf32> to vector<8x32xf32>
    %16 = arith.subf %8, %15 : vector<8x32xf32>
    %17 = arith.mulf %16, %16 : vector<8x32xf32>
    %cst_13 = arith.constant dense<0.000000e+00> : vector<8xf32>
    %18 = vector.multi_reduction <add>, %17, %cst_13 [1] : vector<8x32xf32> to vector<8xf32>
    %19 = vector.shape_cast %18 : vector<8xf32> to vector<8x1xf32>
    %cst_14 = arith.constant 3.200000e+01 : f32
    %20 = vector.broadcast %cst_14 : f32 to vector<8x1xf32>
    %21 = arith.divf %19, %20 : vector<8x1xf32>
    %22 = vector.broadcast %14 : vector<8x1xf32> to vector<8x32xf32>
    %23 = arith.subf %8, %22 : vector<8x32xf32>
    %cst_15 = arith.constant 9.99999997E-7 : f32
    %24 = vector.broadcast %cst_15 : f32 to vector<8x1xf32>
    %25 = arith.addf %21, %24 : vector<8x1xf32>
    %26 = math.rsqrt %25 : vector<8x1xf32>
    %27 = vector.broadcast %26 : vector<8x1xf32> to vector<8x32xf32>
    %28 = arith.mulf %23, %27 : vector<8x32xf32>
    %29 = vector.broadcast %9 : vector<1x32xf32> to vector<8x32xf32>
    %30 = arith.mulf %28, %29 : vector<8x32xf32>
    %31 = vector.broadcast %10 : vector<1x32xf32> to vector<8x32xf32>
    %32 = arith.addf %30, %31 : vector<8x32xf32>
    %33 = arith.truncf %32 : vector<8x32xf32> to vector<8x32xbf16>
    %c0_16 = arith.constant 0 : index
    %c0_17 = arith.constant 0 : index
    %34 = vector.load %arg7[%c0_16, %c0_17] : memref<32x64xbf16, #tpu.memory_space<vmem>>, vector<32x64xbf16>
    %cst_18 = arith.constant dense<0.000000e+00> : vector<8x64xf32>
    %35 = tpu.matmul %33, %34, %cst_18 {dimension_numbers = #tpu.dot_dimension_numbers<[1], [0], [0], [1], [0, 0, 1, 1], [], []>} : vector<8x32xbf16>, vector<32x64xbf16>, vector<8x64xf32> -> vector<8x64xf32>
    %c0_19 = arith.constant 0 : index
    %c0_20 = arith.constant 0 : index
    %36 = vector.load %arg8[%c0_19, %c0_20] : memref<1x64xf32, #tpu.memory_space<vmem>>, vector<1x64xf32>
    %37 = vector.broadcast %36 : vector<1x64xf32> to vector<8x64xf32>
    %38 = arith.addf %35, %37 : vector<8x64xf32>
    %cst_21 = arith.constant 0.000000e+00 : f32
    %39 = vector.broadcast %cst_21 : f32 to vector<8x64xf32>
    %40 = arith.maximumf %38, %39 : vector<8x64xf32>
    %41 = arith.truncf %40 : vector<8x64xf32> to vector<8x64xbf16>
    %c0_22 = arith.constant 0 : index
    %c0_23 = arith.constant 0 : index
    %42 = vector.load %arg9[%c0_22, %c0_23] : memref<64x32xbf16, #tpu.memory_space<vmem>>, vector<64x32xbf16>
    %cst_24 = arith.constant dense<0.000000e+00> : vector<8x32xf32>
    %43 = tpu.matmul %41, %42, %cst_24 {dimension_numbers = #tpu.dot_dimension_numbers<[1], [0], [0], [1], [0, 0, 1, 1], [], []>} : vector<8x64xbf16>, vector<64x32xbf16>, vector<8x32xf32> -> vector<8x32xf32>
    %c0_25 = arith.constant 0 : index
    %c0_26 = arith.constant 0 : index
    %44 = vector.load %arg10[%c0_25, %c0_26] : memref<1x32xf32, #tpu.memory_space<vmem>>, vector<1x32xf32>
    %45 = vector.broadcast %44 : vector<1x32xf32> to vector<8x32xf32>
    %46 = arith.addf %43, %45 : vector<8x32xf32>
    %47 = arith.addf %46, %8 : vector<8x32xf32>
    %48 = arith.truncf %47 : vector<8x32xf32> to vector<8x32xbf16>
    %c0_27 = arith.constant 0 : index
    %c0_28 = arith.constant 0 : index
    %49 = vector.load %arg11[%c0_27, %c0_28] : memref<8x32xbf16, #tpu.memory_space<vmem>>, vector<8x32xbf16>
    tpu.vector_store %arg11[%c0_27, %c0_28], %48 {strides = array<i32>} : memref<8x32xbf16, #tpu.memory_space<vmem>>, vector<8x32xbf16>,
    return
  }
  func.func @transform_0(%arg0: i32) -> (i32, i32) {
    %c0_i32 = arith.constant 0 : i32
    %c0_i32_0 = arith.constant 0 : i32
    return %arg0, %c0_i32 : i32, i32
  }
  func.func @transform_1(%arg0: i32) -> (i32, i32) {
    %c0_i32 = arith.constant 0 : i32
    %c0_i32_0 = arith.constant 0 : i32
    %c0_i32_1 = arith.constant 0 : i32
    return %c0_i32, %c0_i32_0 : i32, i32
  }
  func.func @transform_2(%arg0: i32) -> (i32, i32) {
    %c0_i32 = arith.constant 0 : i32
    %c0_i32_0 = arith.constant 0 : i32
    %c0_i32_1 = arith.constant 0 : i32
    return %c0_i32, %c0_i32_0 : i32, i32
  }
  func.func @transform_3(%arg0: i32) -> (i32, i32) {
    %c0_i32 = arith.constant 0 : i32
    %c0_i32_0 = arith.constant 0 : i32
    return %arg0, %c0_i32 : i32, i32
  }
  func.func @transform_4(%arg0: i32) -> (i32, i32) {
    %c0_i32 = arith.constant 0 : i32
    %c0_i32_0 = arith.constant 0 : i32
    %c0_i32_1 = arith.constant 0 : i32
    return %c0_i32, %c0_i32_0 : i32, i32
  }
  func.func @transform_5(%arg0: i32) -> (i32, i32) {
    %c0_i32 = arith.constant 0 : i32
    %c0_i32_0 = arith.constant 0 : i32
    %c0_i32_1 = arith.constant 0 : i32
    return %c0_i32, %c0_i32_0 : i32, i32
  }
  func.func @transform_6(%arg0: i32) -> (i32, i32) {
    %c0_i32 = arith.constant 0 : i32
    %c0_i32_0 = arith.constant 0 : i32
    %c0_i32_1 = arith.constant 0 : i32
    return %c0_i32, %c0_i32_0 : i32, i32
  }
  func.func @transform_7(%arg0: i32) -> (i32, i32) {
    %c0_i32 = arith.constant 0 : i32
    %c0_i32_0 = arith.constant 0 : i32
    %c0_i32_1 = arith.constant 0 : i32
    return %c0_i32, %c0_i32_0 : i32, i32
  }
  func.func @transform_8(%arg0: i32) -> (i32, i32) {
    %c0_i32 = arith.constant 0 : i32
    %c0_i32_0 = arith.constant 0 : i32
    %c0_i32_1 = arith.constant 0 : i32
    return %c0_i32, %c0_i32_0 : i32, i32
  }
  func.func @transform_9(%arg0: i32) -> (i32, i32) {
    %c0_i32 = arith.constant 0 : i32
    %c0_i32_0 = arith.constant 0 : i32
    %c0_i32_1 = arith.constant 0 : i32
    return %c0_i32, %c0_i32_0 : i32, i32
  }
  func.func @transform_10(%arg0: i32) -> (i32, i32) {
    %c0_i32 = arith.constant 0 : i32
    %c0_i32_0 = arith.constant 0 : i32
    return %arg0, %c0_i32 : i32, i32
  }
}

module attributes {stable_mosaic.version = 11 : i64} {
  func.func @_ctx_attn_kernel(%arg0: i32, %arg1: memref<1x8x32xbf16, #tpu.memory_space<vmem>>, %arg2: memref<1x1x8x64xbf16, #tpu.memory_space<vmem>>, %arg3: memref<1x1x8xbf16, #tpu.memory_space<vmem>>, %arg4: memref<1x8x32xbf16, #tpu.memory_space<vmem>>, %arg5: memref<1x4x8x8xbf16, #tpu.memory_space<vmem>>, %arg6: memref<8x32xf32, #tpu.memory_space<vmem>>) attributes {dimension_semantics = [#tpu.dimension_semantics<parallel>], iteration_bounds = array<i64: 2>, scalar_prefetch = 0 : i64, scratch_operands = 1 : i64, tpu.core_type = #tpu.core_type<tc>, window_params = [{transform_indices = @transform_0, window_bounds = array<i64: 1, 8, 32>}, {transform_indices = @transform_1, window_bounds = array<i64: 1, 1, 8, 64>}, {transform_indices = @transform_2, window_bounds = array<i64: 1, 1, 8>}, {transform_indices = @transform_3, window_bounds = array<i64: 1, 8, 32>}, {transform_indices = @transform_4, window_bounds = array<i64: 1, 4, 8, 8>}]} {
    %c0 = arith.constant 0 : index
    %c0_0 = arith.constant 0 : index
    %c0_1 = arith.constant 0 : index
    %0 = vector.load %arg1[%c0, %c0_0, %c0_1] : memref<1x8x32xbf16, #tpu.memory_space<vmem>>, vector<1x8x32xbf16>
    %1 = vector.shape_cast %0 : vector<1x8x32xbf16> to vector<8x32xbf16>
    %c0_2 = arith.constant 0 : index
    %c0_3 = arith.constant 0 : index
    %c0_4 = arith.constant 0 : index
    %c0_5 = arith.constant 0 : index
    %2 = vector.load %arg2[%c0_2, %c0_3, %c0_4, %c0_5] : memref<1x1x8x64xbf16, #tpu.memory_space<vmem>>, vector<1x1x8x64xbf16>
    %3 = vector.shape_cast %2 : vector<1x1x8x64xbf16> to vector<8x64xbf16>
    %c0_6 = arith.constant 0 : index
    %c0_7 = arith.constant 0 : index
    %c0_8 = arith.constant 0 : index
    %4 = vector.load %arg3[%c0_6, %c0_7, %c0_8] : memref<1x1x8xbf16, #tpu.memory_space<vmem>>, vector<1x1x8xbf16>
    %5 = vector.shape_cast %4 : vector<1x1x8xbf16> to vector<1x8xbf16>
    %cst = arith.constant 5.000000e-01 : bf16
    %6 = vector.broadcast %cst : bf16 to vector<1x8xbf16>
    %7 = arith.cmpf ogt, %5, %6 : vector<1x8xbf16>
    %8 = vector.extract_strided_slice %1 {offsets = [0, 0], sizes = [8, 8], strides = [1, 1]} : vector<8x32xbf16> to vector<8x8xbf16>
    %9 = vector.extract_strided_slice %3 {offsets = [0, 0], sizes = [8, 8], strides = [1, 1]} : vector<8x64xbf16> to vector<8x8xbf16>
    %10 = vector.extract_strided_slice %3 {offsets = [0, 32], sizes = [8, 8], strides = [1, 1]} : vector<8x64xbf16> to vector<8x8xbf16>
    %cst_9 = arith.constant dense<0.000000e+00> : vector<8x8xf32>
    %11 = tpu.matmul %8, %9, %cst_9 {dimension_numbers = #tpu.dot_dimension_numbers<[1], [1], [0], [0], [0, 0, 1, 0], [], []>} : vector<8x8xbf16>, vector<8x8xbf16>, vector<8x8xf32> -> vector<8x8xf32>
    %cst_10 = arith.constant -9.99999984E+17 : f32
    %12 = vector.shape_cast %7 : vector<1x8xi1> to vector<1x8xi1>
    %13 = vector.broadcast %12 : vector<1x8xi1> to vector<8x8xi1>
    %14 = vector.broadcast %cst_10 : f32 to vector<8x8xf32>
    %15 = arith.select %13, %14, %11 : vector<8x8xi1>, vector<8x8xf32>
    %cst_11 = arith.constant dense<0xFF800000> : vector<8xf32>
    %16 = vector.multi_reduction <maximumf>, %15, %cst_11 [1] : vector<8x8xf32> to vector<8xf32>
    %17 = vector.shape_cast %16 : vector<8xf32> to vector<8x1xf32>
    %18 = vector.broadcast %17 : vector<8x1xf32> to vector<8x8xf32>
    %19 = arith.subf %15, %18 : vector<8x8xf32>
    %20 = math.exp %19 : vector<8x8xf32>
    %cst_12 = arith.constant dense<0.000000e+00> : vector<8xf32>
    %21 = vector.multi_reduction <add>, %20, %cst_12 [1] : vector<8x8xf32> to vector<8xf32>
    %22 = vector.shape_cast %21 : vector<8xf32> to vector<8x1xf32>
    %23 = vector.broadcast %22 : vector<8x1xf32> to vector<8x8xf32>
    %24 = arith.divf %20, %23 : vector<8x8xf32>
    %25 = arith.truncf %24 : vector<8x8xf32> to vector<8x8xbf16>
    %c0_13 = arith.constant 0 : index
    %c0_14 = arith.constant 0 : index
    %c0_15 = arith.constant 0 : index
    %c0_16 = arith.constant 0 : index
    %26 = vector.load %arg5[%c0_13, %c0_14, %c0_15, %c0_16] : memref<1x4x8x8xbf16, #tpu.memory_space<vmem>>, vector<1x1x8x8xbf16>
    %27 = vector.shape_cast %26 : vector<1x1x8x8xbf16> to vector<8x8xbf16>
    %28 = vector.shape_cast %25 : vector<8x8xbf16> to vector<1x1x8x8xbf16>
    tpu.vector_store %arg5[%c0_13, %c0_14, %c0_15, %c0_16], %28 {strides = array<i32>} : memref<1x4x8x8xbf16, #tpu.memory_space<vmem>>, vector<1x1x8x8xbf16>,
    %29 = arith.truncf %24 : vector<8x8xf32> to vector<8x8xbf16>
    %cst_17 = arith.constant dense<0.000000e+00> : vector<8x8xf32>
    %30 = tpu.matmul %29, %10, %cst_17 {dimension_numbers = #tpu.dot_dimension_numbers<[1], [0], [0], [1], [0, 0, 1, 1], [], []>} : vector<8x8xbf16>, vector<8x8xbf16>, vector<8x8xf32> -> vector<8x8xf32>
    %c0_18 = arith.constant 0 : index
    %c0_19 = arith.constant 0 : index
    %31 = vector.load %arg6[%c0_18, %c0_19] : memref<8x32xf32, #tpu.memory_space<vmem>>, vector<8x8xf32>
    tpu.vector_store %arg6[%c0_18, %c0_19], %30 {strides = array<i32>} : memref<8x32xf32, #tpu.memory_space<vmem>>, vector<8x8xf32>,
    %32 = vector.extract_strided_slice %1 {offsets = [0, 8], sizes = [8, 8], strides = [1, 1]} : vector<8x32xbf16> to vector<8x8xbf16>
    %33 = vector.extract_strided_slice %3 {offsets = [0, 8], sizes = [8, 8], strides = [1, 1]} : vector<8x64xbf16> to vector<8x8xbf16>
    %34 = vector.extract_strided_slice %3 {offsets = [0, 40], sizes = [8, 8], strides = [1, 1]} : vector<8x64xbf16> to vector<8x8xbf16>
    %cst_20 = arith.constant dense<0.000000e+00> : vector<8x8xf32>
    %35 = tpu.matmul %32, %33, %cst_20 {dimension_numbers = #tpu.dot_dimension_numbers<[1], [1], [0], [0], [0, 0, 1, 0], [], []>} : vector<8x8xbf16>, vector<8x8xbf16>, vector<8x8xf32> -> vector<8x8xf32>
    %cst_21 = arith.constant -9.99999984E+17 : f32
    %36 = vector.shape_cast %7 : vector<1x8xi1> to vector<1x8xi1>
    %37 = vector.broadcast %36 : vector<1x8xi1> to vector<8x8xi1>
    %38 = vector.broadcast %cst_21 : f32 to vector<8x8xf32>
    %39 = arith.select %37, %38, %35 : vector<8x8xi1>, vector<8x8xf32>
    %cst_22 = arith.constant dense<0xFF800000> : vector<8xf32>
    %40 = vector.multi_reduction <maximumf>, %39, %cst_22 [1] : vector<8x8xf32> to vector<8xf32>
    %41 = vector.shape_cast %40 : vector<8xf32> to vector<8x1xf32>
    %42 = vector.broadcast %41 : vector<8x1xf32> to vector<8x8xf32>
    %43 = arith.subf %39, %42 : vector<8x8xf32>
    %44 = math.exp %43 : vector<8x8xf32>
    %cst_23 = arith.constant dense<0.000000e+00> : vector<8xf32>
    %45 = vector.multi_reduction <add>, %44, %cst_23 [1] : vector<8x8xf32> to vector<8xf32>
    %46 = vector.shape_cast %45 : vector<8xf32> to vector<8x1xf32>
    %47 = vector.broadcast %46 : vector<8x1xf32> to vector<8x8xf32>
    %48 = arith.divf %44, %47 : vector<8x8xf32>
    %49 = arith.truncf %48 : vector<8x8xf32> to vector<8x8xbf16>
    %c0_24 = arith.constant 0 : index
    %c1 = arith.constant 1 : index
    %c0_25 = arith.constant 0 : index
    %c0_26 = arith.constant 0 : index
    %50 = vector.load %arg5[%c0_24, %c1, %c0_25, %c0_26] : memref<1x4x8x8xbf16, #tpu.memory_space<vmem>>, vector<1x1x8x8xbf16>
    %51 = vector.shape_cast %50 : vector<1x1x8x8xbf16> to vector<8x8xbf16>
    %52 = vector.shape_cast %49 : vector<8x8xbf16> to vector<1x1x8x8xbf16>
    tpu.vector_store %arg5[%c0_24, %c1, %c0_25, %c0_26], %52 {strides = array<i32>} : memref<1x4x8x8xbf16, #tpu.memory_space<vmem>>, vector<1x1x8x8xbf16>,
    %53 = arith.truncf %48 : vector<8x8xf32> to vector<8x8xbf16>
    %cst_27 = arith.constant dense<0.000000e+00> : vector<8x8xf32>
    %54 = tpu.matmul %53, %34, %cst_27 {dimension_numbers = #tpu.dot_dimension_numbers<[1], [0], [0], [1], [0, 0, 1, 1], [], []>} : vector<8x8xbf16>, vector<8x8xbf16>, vector<8x8xf32> -> vector<8x8xf32>
    %c0_28 = arith.constant 0 : index
    %c8 = arith.constant 8 : index
    %55 = vector.load %arg6[%c0_28, %c8] : memref<8x32xf32, #tpu.memory_space<vmem>>, vector<8x8xf32>
    tpu.vector_store %arg6[%c0_28, %c8], %54 {strides = array<i32>} : memref<8x32xf32, #tpu.memory_space<vmem>>, vector<8x8xf32>,
    %56 = vector.extract_strided_slice %1 {offsets = [0, 16], sizes = [8, 8], strides = [1, 1]} : vector<8x32xbf16> to vector<8x8xbf16>
    %57 = vector.extract_strided_slice %3 {offsets = [0, 16], sizes = [8, 8], strides = [1, 1]} : vector<8x64xbf16> to vector<8x8xbf16>
    %58 = vector.extract_strided_slice %3 {offsets = [0, 48], sizes = [8, 8], strides = [1, 1]} : vector<8x64xbf16> to vector<8x8xbf16>
    %cst_29 = arith.constant dense<0.000000e+00> : vector<8x8xf32>
    %59 = tpu.matmul %56, %57, %cst_29 {dimension_numbers = #tpu.dot_dimension_numbers<[1], [1], [0], [0], [0, 0, 1, 0], [], []>} : vector<8x8xbf16>, vector<8x8xbf16>, vector<8x8xf32> -> vector<8x8xf32>
    %cst_30 = arith.constant -9.99999984E+17 : f32
    %60 = vector.shape_cast %7 : vector<1x8xi1> to vector<1x8xi1>
    %61 = vector.broadcast %60 : vector<1x8xi1> to vector<8x8xi1>
    %62 = vector.broadcast %cst_30 : f32 to vector<8x8xf32>
    %63 = arith.select %61, %62, %59 : vector<8x8xi1>, vector<8x8xf32>
    %cst_31 = arith.constant dense<0xFF800000> : vector<8xf32>
    %64 = vector.multi_reduction <maximumf>, %63, %cst_31 [1] : vector<8x8xf32> to vector<8xf32>
    %65 = vector.shape_cast %64 : vector<8xf32> to vector<8x1xf32>
    %66 = vector.broadcast %65 : vector<8x1xf32> to vector<8x8xf32>
    %67 = arith.subf %63, %66 : vector<8x8xf32>
    %68 = math.exp %67 : vector<8x8xf32>
    %cst_32 = arith.constant dense<0.000000e+00> : vector<8xf32>
    %69 = vector.multi_reduction <add>, %68, %cst_32 [1] : vector<8x8xf32> to vector<8xf32>
    %70 = vector.shape_cast %69 : vector<8xf32> to vector<8x1xf32>
    %71 = vector.broadcast %70 : vector<8x1xf32> to vector<8x8xf32>
    %72 = arith.divf %68, %71 : vector<8x8xf32>
    %73 = arith.truncf %72 : vector<8x8xf32> to vector<8x8xbf16>
    %c0_33 = arith.constant 0 : index
    %c2 = arith.constant 2 : index
    %c0_34 = arith.constant 0 : index
    %c0_35 = arith.constant 0 : index
    %74 = vector.load %arg5[%c0_33, %c2, %c0_34, %c0_35] : memref<1x4x8x8xbf16, #tpu.memory_space<vmem>>, vector<1x1x8x8xbf16>
    %75 = vector.shape_cast %74 : vector<1x1x8x8xbf16> to vector<8x8xbf16>
    %76 = vector.shape_cast %73 : vector<8x8xbf16> to vector<1x1x8x8xbf16>
    tpu.vector_store %arg5[%c0_33, %c2, %c0_34, %c0_35], %76 {strides = array<i32>} : memref<1x4x8x8xbf16, #tpu.memory_space<vmem>>, vector<1x1x8x8xbf16>,
    %77 = arith.truncf %72 : vector<8x8xf32> to vector<8x8xbf16>
    %cst_36 = arith.constant dense<0.000000e+00> : vector<8x8xf32>
    %78 = tpu.matmul %77, %58, %cst_36 {dimension_numbers = #tpu.dot_dimension_numbers<[1], [0], [0], [1], [0, 0, 1, 1], [], []>} : vector<8x8xbf16>, vector<8x8xbf16>, vector<8x8xf32> -> vector<8x8xf32>
    %c0_37 = arith.constant 0 : index
    %c16 = arith.constant 16 : index
    %79 = vector.load %arg6[%c0_37, %c16] : memref<8x32xf32, #tpu.memory_space<vmem>>, vector<8x8xf32>
    tpu.vector_store %arg6[%c0_37, %c16], %78 {strides = array<i32>} : memref<8x32xf32, #tpu.memory_space<vmem>>, vector<8x8xf32>,
    %80 = vector.extract_strided_slice %1 {offsets = [0, 24], sizes = [8, 8], strides = [1, 1]} : vector<8x32xbf16> to vector<8x8xbf16>
    %81 = vector.extract_strided_slice %3 {offsets = [0, 24], sizes = [8, 8], strides = [1, 1]} : vector<8x64xbf16> to vector<8x8xbf16>
    %82 = vector.extract_strided_slice %3 {offsets = [0, 56], sizes = [8, 8], strides = [1, 1]} : vector<8x64xbf16> to vector<8x8xbf16>
    %cst_38 = arith.constant dense<0.000000e+00> : vector<8x8xf32>
    %83 = tpu.matmul %80, %81, %cst_38 {dimension_numbers = #tpu.dot_dimension_numbers<[1], [1], [0], [0], [0, 0, 1, 0], [], []>} : vector<8x8xbf16>, vector<8x8xbf16>, vector<8x8xf32> -> vector<8x8xf32>
    %cst_39 = arith.constant -9.99999984E+17 : f32
    %84 = vector.shape_cast %7 : vector<1x8xi1> to vector<1x8xi1>
    %85 = vector.broadcast %84 : vector<1x8xi1> to vector<8x8xi1>
    %86 = vector.broadcast %cst_39 : f32 to vector<8x8xf32>
    %87 = arith.select %85, %86, %83 : vector<8x8xi1>, vector<8x8xf32>
    %cst_40 = arith.constant dense<0xFF800000> : vector<8xf32>
    %88 = vector.multi_reduction <maximumf>, %87, %cst_40 [1] : vector<8x8xf32> to vector<8xf32>
    %89 = vector.shape_cast %88 : vector<8xf32> to vector<8x1xf32>
    %90 = vector.broadcast %89 : vector<8x1xf32> to vector<8x8xf32>
    %91 = arith.subf %87, %90 : vector<8x8xf32>
    %92 = math.exp %91 : vector<8x8xf32>
    %cst_41 = arith.constant dense<0.000000e+00> : vector<8xf32>
    %93 = vector.multi_reduction <add>, %92, %cst_41 [1] : vector<8x8xf32> to vector<8xf32>
    %94 = vector.shape_cast %93 : vector<8xf32> to vector<8x1xf32>
    %95 = vector.broadcast %94 : vector<8x1xf32> to vector<8x8xf32>
    %96 = arith.divf %92, %95 : vector<8x8xf32>
    %97 = arith.truncf %96 : vector<8x8xf32> to vector<8x8xbf16>
    %c0_42 = arith.constant 0 : index
    %c3 = arith.constant 3 : index
    %c0_43 = arith.constant 0 : index
    %c0_44 = arith.constant 0 : index
    %98 = vector.load %arg5[%c0_42, %c3, %c0_43, %c0_44] : memref<1x4x8x8xbf16, #tpu.memory_space<vmem>>, vector<1x1x8x8xbf16>
    %99 = vector.shape_cast %98 : vector<1x1x8x8xbf16> to vector<8x8xbf16>
    %100 = vector.shape_cast %97 : vector<8x8xbf16> to vector<1x1x8x8xbf16>
    tpu.vector_store %arg5[%c0_42, %c3, %c0_43, %c0_44], %100 {strides = array<i32>} : memref<1x4x8x8xbf16, #tpu.memory_space<vmem>>, vector<1x1x8x8xbf16>,
    %101 = arith.truncf %96 : vector<8x8xf32> to vector<8x8xbf16>
    %cst_45 = arith.constant dense<0.000000e+00> : vector<8x8xf32>
    %102 = tpu.matmul %101, %82, %cst_45 {dimension_numbers = #tpu.dot_dimension_numbers<[1], [0], [0], [1], [0, 0, 1, 1], [], []>} : vector<8x8xbf16>, vector<8x8xbf16>, vector<8x8xf32> -> vector<8x8xf32>
    %c0_46 = arith.constant 0 : index
    %c24 = arith.constant 24 : index
    %103 = vector.load %arg6[%c0_46, %c24] : memref<8x32xf32, #tpu.memory_space<vmem>>, vector<8x8xf32>
    tpu.vector_store %arg6[%c0_46, %c24], %102 {strides = array<i32>} : memref<8x32xf32, #tpu.memory_space<vmem>>, vector<8x8xf32>,
    %c0_47 = arith.constant 0 : index
    %c0_48 = arith.constant 0 : index
    %104 = vector.load %arg6[%c0_47, %c0_48] : memref<8x32xf32, #tpu.memory_space<vmem>>, vector<8x32xf32>
    %105 = arith.truncf %104 : vector<8x32xf32> to vector<8x32xbf16>
    %c0_49 = arith.constant 0 : index
    %c0_50 = arith.constant 0 : index
    %c0_51 = arith.constant 0 : index
    %106 = vector.load %arg4[%c0_49, %c0_50, %c0_51] : memref<1x8x32xbf16, #tpu.memory_space<vmem>>, vector<1x8x32xbf16>
    %107 = vector.shape_cast %106 : vector<1x8x32xbf16> to vector<8x32xbf16>
    %108 = vector.shape_cast %105 : vector<8x32xbf16> to vector<1x8x32xbf16>
    tpu.vector_store %arg4[%c0_49, %c0_50, %c0_51], %108 {strides = array<i32>} : memref<1x8x32xbf16, #tpu.memory_space<vmem>>, vector<1x8x32xbf16>,
    return
  }
  func.func @transform_0(%arg0: i32) -> (i32, i32, i32) {
    %c0_i32 = arith.constant 0 : i32
    %c0_i32_0 = arith.constant 0 : i32
    %c0_i32_1 = arith.constant 0 : i32
    return %arg0, %c0_i32, %c0_i32_0 : i32, i32, i32
  }
  func.func @transform_1(%arg0: i32) -> (i32, i32, i32, i32) {
    %c1_i32 = arith.constant 1 : i32
    %c0_i32 = arith.constant 0 : i32
    %c0_i32_0 = arith.constant 0 : i32
    %c0_i32_1 = arith.constant 0 : i32
    return %c1_i32, %arg0, %c0_i32, %c0_i32_0 : i32, i32, i32, i32
  }
  func.func @transform_2(%arg0: i32) -> (i32, i32, i32) {
    %c0_i32 = arith.constant 0 : i32
    %c0_i32_0 = arith.constant 0 : i32
    %c0_i32_1 = arith.constant 0 : i32
    return %arg0, %c0_i32, %c0_i32_0 : i32, i32, i32
  }
  func.func @transform_3(%arg0: i32) -> (i32, i32, i32) {
    %c0_i32 = arith.constant 0 : i32
    %c0_i32_0 = arith.constant 0 : i32
    %c0_i32_1 = arith.constant 0 : i32
    return %arg0, %c0_i32, %c0_i32_0 : i32, i32, i32
  }
  func.func @transform_4(%arg0: i32) -> (i32, i32, i32, i32) {
    %c0_i32 = arith.constant 0 : i32
    %c0_i32_0 = arith.constant 0 : i32
    %c0_i32_1 = arith.constant 0 : i32
    %c0_i32_2 = arith.constant 0 : i32
    return %arg0, %c0_i32, %c0_i32_0, %c0_i32_1 : i32, i32, i32, i32
  }
}

module attributes {stable_mosaic.version = 11 : i64} {
  func.func @_layernorm_kernel(%arg0: i32, %arg1: memref<8x32xbf16, #tpu.memory_space<vmem>>, %arg2: memref<1x32xf32, #tpu.memory_space<vmem>>, %arg3: memref<1x32xf32, #tpu.memory_space<vmem>>, %arg4: memref<8x32xf32, #tpu.memory_space<vmem>>) attributes {dimension_semantics = [#tpu.dimension_semantics<parallel>], iteration_bounds = array<i64: 2>, scalar_prefetch = 0 : i64, scratch_operands = 0 : i64, tpu.core_type = #tpu.core_type<tc>, window_params = [{transform_indices = @transform_0, window_bounds = array<i64: 8, 32>}, {pipeline_mode = #tpu.pipeline_mode<synchronous>, transform_indices = @transform_1, window_bounds = array<i64: 1, 32>}, {pipeline_mode = #tpu.pipeline_mode<synchronous>, transform_indices = @transform_2, window_bounds = array<i64: 1, 32>}, {transform_indices = @transform_3, window_bounds = array<i64: 8, 32>}]} {
    %c0 = arith.constant 0 : index
    %c0_0 = arith.constant 0 : index
    %0 = vector.load %arg1[%c0, %c0_0] : memref<8x32xbf16, #tpu.memory_space<vmem>>, vector<8x32xbf16>
    %1 = arith.extf %0 : vector<8x32xbf16> to vector<8x32xf32>
    %c0_1 = arith.constant 0 : index
    %c0_2 = arith.constant 0 : index
    %2 = vector.load %arg2[%c0_1, %c0_2] : memref<1x32xf32, #tpu.memory_space<vmem>>, vector<1x32xf32>
    %c0_3 = arith.constant 0 : index
    %c0_4 = arith.constant 0 : index
    %3 = vector.load %arg3[%c0_3, %c0_4] : memref<1x32xf32, #tpu.memory_space<vmem>>, vector<1x32xf32>
    %cst = arith.constant dense<0.000000e+00> : vector<8xf32>
    %4 = vector.multi_reduction <add>, %1, %cst [1] : vector<8x32xf32> to vector<8xf32>
    %5 = vector.shape_cast %4 : vector<8xf32> to vector<8x1xf32>
    %cst_5 = arith.constant 3.200000e+01 : f32
    %6 = vector.broadcast %cst_5 : f32 to vector<8x1xf32>
    %7 = arith.divf %5, %6 : vector<8x1xf32>
    %8 = vector.broadcast %7 : vector<8x1xf32> to vector<8x32xf32>
    %9 = arith.subf %1, %8 : vector<8x32xf32>
    %10 = arith.mulf %9, %9 : vector<8x32xf32>
    %cst_6 = arith.constant dense<0.000000e+00> : vector<8xf32>
    %11 = vector.multi_reduction <add>, %10, %cst_6 [1] : vector<8x32xf32> to vector<8xf32>
    %12 = vector.shape_cast %11 : vector<8xf32> to vector<8x1xf32>
    %cst_7 = arith.constant 3.200000e+01 : f32
    %13 = vector.broadcast %cst_7 : f32 to vector<8x1xf32>
    %14 = arith.divf %12, %13 : vector<8x1xf32>
    %15 = vector.broadcast %7 : vector<8x1xf32> to vector<8x32xf32>
    %16 = arith.subf %1, %15 : vector<8x32xf32>
    %cst_8 = arith.constant 9.99999997E-7 : f32
    %17 = vector.broadcast %cst_8 : f32 to vector<8x1xf32>
    %18 = arith.addf %14, %17 : vector<8x1xf32>
    %19 = math.rsqrt %18 : vector<8x1xf32>
    %20 = vector.broadcast %19 : vector<8x1xf32> to vector<8x32xf32>
    %21 = arith.mulf %16, %20 : vector<8x32xf32>
    %22 = vector.broadcast %2 : vector<1x32xf32> to vector<8x32xf32>
    %23 = arith.mulf %21, %22 : vector<8x32xf32>
    %24 = vector.broadcast %3 : vector<1x32xf32> to vector<8x32xf32>
    %25 = arith.addf %23, %24 : vector<8x32xf32>
    %c0_9 = arith.constant 0 : index
    %c0_10 = arith.constant 0 : index
    %26 = vector.load %arg4[%c0_9, %c0_10] : memref<8x32xf32, #tpu.memory_space<vmem>>, vector<8x32xf32>
    tpu.vector_store %arg4[%c0_9, %c0_10], %25 {strides = array<i32>} : memref<8x32xf32, #tpu.memory_space<vmem>>, vector<8x32xf32>,
    return
  }
  func.func @transform_0(%arg0: i32) -> (i32, i32) {
    %c0_i32 = arith.constant 0 : i32
    %c0_i32_0 = arith.constant 0 : i32
    return %arg0, %c0_i32 : i32, i32
  }
  func.func @transform_1(%arg0: i32) -> (i32, i32) {
    %c0_i32 = arith.constant 0 : i32
    %c0_i32_0 = arith.constant 0 : i32
    %c0_i32_1 = arith.constant 0 : i32
    return %c0_i32, %c0_i32_0 : i32, i32
  }
  func.func @transform_2(%arg0: i32) -> (i32, i32) {
    %c0_i32 = arith.constant 0 : i32
    %c0_i32_0 = arith.constant 0 : i32
    %c0_i32_1 = arith.constant 0 : i32
    return %c0_i32, %c0_i32_0 : i32, i32
  }
  func.func @transform_3(%arg0: i32) -> (i32, i32) {
    %c0_i32 = arith.constant 0 : i32
    %c0_i32_0 = arith.constant 0 : i32
    return %arg0, %c0_i32 : i32, i32
  }
}

</mosaic_0001>

<bundles_post_ra>
// kernel: pointer_decoder_forward.13
= control target key start
LH: loop header
LB: loop body
LE: loop exit
PB: predicated region body
PF: predicated region fallthrough
CT: control target
= control target key end

     0   :  { %s457_s18 = smov 0   ;;  %s499_s0 = inlined_call_operand.vmem [shape: bf16[16,32], index: 0, kind: input, shape index: {}]   ;;  %s500_s1 = inlined_call_operand.vmem [shape: f32[1,32], index: 1, kind: input, shape index: {}]   ;;  %s501_s2 = inlined_call_operand.vmem [shape: f32[1,32], index: 2, kind: input, shape index: {}]   ;;  %s502_s3 = inlined_call_operand.vmem [shape: bf16[32,96], index: 3, kind: input, shape index: {}]   ;;  %s503_s4 = inlined_call_operand.vmem [shape: f32[1,96], index: 4, kind: input, shape index: {}]   ;;  %s504_s5 = inlined_call_operand.vmem [shape: bf16[16,96], index: 5, kind: output, shape index: {}]  }
   0x1 LB: > { %s377_s19 = sadd.s32 4294967295, %s423_s18   ;;  %p381_p0 = scmp.ge.s32.totalorder %s423_s18, 1  ;;  %s423_s18 = sphi %s457_s18, %s15_s18  }
   0x2   : > { %p186_p1 = scmp.lt.s32.totalorder %s423_s18, 3 }
   0x4   : > { %p187_p2 = pnand %p381_p0, %p186_p1 }
   0x5   : > { %p212_p3 = scmp.lt.s32.totalorder (!%p187_p2), %s377_s19, 1  ;;  %vm225_vm0 = vcmask (!%p187_p2), 261120   ;;  %v413_v8 = vld [vmem:[%s502_s3] sm:$0xff] (!%p187_p2)   ;;  %v425_v9 = vmov (!%p187_p2), 0.0   ;;  %v414_v10 = vld [vmem:[%s502_s3 + $0x8] sm:$0xff] (!%p187_p2)   ;;  %vm426_vm1 = vmmov (!%p187_p2), 0  }
   0x6   : > { %190 = sbr.rel (%p187_p2) target bundleno = 551 (0x227), region = 40  ;;  %395 = vmatprep.subr.bf16.mxu0 (!%p187_p2), %v425_v9  ;;  %399 = vmatprep.mubr.msk.bf16.mxu0 (!%p187_p2), %vm426_vm1, %v425_v9  ;;  %v384_v15 = vld [vmem:[%s500_s1] ss:$0 sm:$0xff] (!%p187_p2)  ;;  %vm322_vm2 = vcmask (!%p187_p2), 781312  }
   0x7   : > { %396 = vmatpush3.bf16.msra.mxu0 (!%p187_p2), %v413_v8  ;;  %v385_v17 = vld [vmem:[%s501_s2] ss:$0 sm:$0xff] (!%p187_p2) }
   0x8   : > { %397 = vmatprep.subr.bf16.mxu0 (!%p187_p2), %v425_v9  ;;  %v386_v21 = vld [vmem:[%s503_s4] ss:$0 sm:$0xff] (!%p187_p2) }
   0xb   : > { %398 = vmatpush3.bf16.msra.mxu0 (!%p187_p2), %v414_v10 }
   0xd   : > { %s506_s19 = smov (!%p212_p3, %s377_s19), 1 }
   0xe   : > { %s382_s20 = sshll.u32 %s506_s19, 2 }
   0xf   : > { %s215_s23 = scalar_lea.vmem %s499_s0, %s382_s20  ;;  %s219_s11 = scalar_lea.vmem %s504_s5, %s382_s20 }
  0x10   : > { %v221_v0 = vld [vmem:[%s215_s23] sm:$0xf] }
  0x11   : > { %v222_v1 = vunpack.c.l.bf16 %v221_v0 }
  0x13   : > { %v226_v2 = vsel %vm225_vm0, %v222_v1, 0.0 }
  0x14   : > { %227 = vadd.xlane.f32.xlu0 %v226_v2 }
  0xa1   : > { %v228_v3 = vpop.xlane.xlu0 %227 }
  0xa2   : > { %v230_v4 = vmul.f32 0.03125, %v228_v3 }
  0xa4   : > { %v231_v5 = vsub.f32 %v222_v1, %v230_v4 }
  0xa6   : > { %v232_v6 = vmul.f32 %v231_v5, %v231_v5 }
  0xa8   : > { %v233_v7 = vsel %vm225_vm0, %v232_v6, 0.0 }
  0xa9   : > { %234 = vadd.xlane.f32.xlu0 %v233_v7 }
 0x136   : > { %v235_v11 = vpop.xlane.xlu0 %234 }
 0x137   : > { %v236_v12 = vmul.f32 0.03125, %v235_v11 }
 0x139   : > { %v237_v13 = vadd.f32 1e-06, %v236_v12 }
 0x13b   : > { %415 = vrsqrt.f32 %v237_v13 }
 0x145   : > { %v416_v14 = vpop.eup %415 }
 0x146   : > { %v239_v16 = vmul.f32 %v416_v14, %v231_v5 }
 0x148   : > { %v246_v18 = vmul.f32 %v384_v15, %v239_v16 }
 0x14a   : > { %v253_v19 = vadd.f32 %v385_v17, %v246_v18 }
 0x14c   : > { %v254_v20 = vpack.c.bf16 %v253_v19, %v253_v19 }
 0x14e   : > { %400 = vmatmul.mubr.msk.bf16.vlgmr.msra.gmra.mrb[0].mxu0 %vm225_vm0, %v254_v20 }
 0x221   : > { %v315_v22 = vpop.f32.mrb[0].mxu0 }
 0x222   : > { %v316_v23 = vadd.f32 %v386_v21, %v315_v22  ;;  %v401_v24 = vpop.f32.mrb[1].mxu0 }
 0x223   : > { %v318_v25 = vpop.f32.mrb[2].mxu0 }
 0x224   : > { %v321_v26 = vpack.c.bf16 %v316_v23, %v316_v23  ;;  %v402_v27 = vpop.f32.mrb[3].mxu0 }
 0x226   : > { %323 = vst.msk [vmem:[%s219_s11] sm:$0xf] %vm322_vm2, %v321_v26 }
 0x227 PF: > { %s15_s18 = sadd.s32 1, %s423_s18  }
 0x228   : > { %p12_p4 = scmp.ge.s32.totalorder %s15_s18, 4  }
 0x22a   :  { %14 = sbr.rel (!%p12_p4) target bundleno = 1 (0x1), region = 70 }

// kernel: pointer_decoder_forward.12
= control target key start
LH: loop header
LB: loop body
LE: loop exit
PB: predicated region body
PF: predicated region fallthrough
CT: control target
= control target key end

     0   :  { %s529_s12 = smov 0   ;;  %s531_s13 = smov 0   ;;  %s586_s0 = inlined_call_operand.vmem [shape: bf16[16,32], index: 0, kind: input, shape index: {}]   ;;  %s587_s1 = inlined_call_operand.vmem [shape: bf16[2,32,64], index: 1, kind: input, shape index: {}]   ;;  %s588_s2 = inlined_call_operand.vmem [shape: f32[2,1,64], index: 2, kind: input, shape index: {}]   ;;  %s589_s3 = inlined_call_operand.vmem [shape: bf16[2,16,64], index: 3, kind: output, shape index: {}]  }
   0x1   :  { %s533_s14 = smov 0   ;;  %s535_s15 = smov 0  }
   0x2   :  { %s537_s16 = smov 0  }
   0x3 LB: > { %s22_s17 = sadd.s32 1, %s497_s14  ;;  %s25_s18 = sadd.s32 1, %s501_s15  ;;  %s505_s16 = sphi %s537_s16, %s13_s16   ;;  %s501_s15 = sphi %s535_s15, %s593_s15   ;;  %s497_s14 = sphi %s533_s14, %s592_s14   ;;  %s493_s13 = sphi %s531_s13, %s591_s13   ;;  %s489_s12 = sphi %s529_s12, %s590_s12  }
   0x4   : > { %p23_p0 = scmp.ge.s32.totalorder %s22_s17, 2  ;;  %p399_p1 = scmp.ge.s32.totalorder %s505_s16, 1 }
   0x5   : > { %p168_p2 = scmp.lt.s32.totalorder %s505_s16, 5 }
   0x6   : > { %s595_s17 = smov (%p23_p0, %s22_s17), 0  ;;  %s597_s18 = smov (!%p23_p0, %s25_s18), %s501_s15 }
   0x7   : > { %p169_p3 = pnand %p399_p1, %p168_p2  ;;  %p27_p4 = scmp.ge.s32.totalorder %s597_s18, 2 }
   0x8   : > { %p206_p5 = scmp.lt.s32.totalorder (!%p169_p3), %s493_s13, 1  ;;  %p202_p6 = scmp.lt.s32.totalorder (!%p169_p3), %s489_s12, 1  ;;  %v507_v0 = vmov (!%p169_p3), 0.0   ;;  %vm508_vm0 = vmmov (!%p169_p3), 0   ;;  %vm247_vm1 = vcmask (!%p169_p3), 261120   ;;  %vm292_vm2 = vcmask (!%p169_p3), 519168  }
   0x9   : > { %s599_s18 = smov (%p27_p4, %s597_s18), 0  ;;  %172 = sbr.rel (%p169_p3) target bundleno = 244 (0xf4), region = 32 }
   0xa   : > { %415 = vmatprep.subr.bf16.mxu0 (!%p169_p3), %v507_v0  ;;  %419 = vmatprep.mubr.msk.bf16.mxu0 (!%p169_p3), %vm508_vm0, %v507_v0 }
  0x10   : > { %s601_s13 = smov (!%p206_p5, %s493_s13), 1  ;;  %s603_s12 = smov (!%p202_p6, %s489_s12), 1 }
  0x11   : > { %s411_s19 = sshll.u32 %s601_s13, 4  ;;  %s403_s20 = sshll.u32 %s601_s13, 1 }
  0x12   : > { %s210_s23 = scalar_lea.vmem %s587_s1, %s411_s19  ;;  %s400_s24 = sshll.u32 %s603_s12, 2 }
  0x13   : > { %v465_v1 = vld [vmem:[%s210_s23] sm:$0xff]   ;;  %s219_s25 = sadd.s32 %s403_s20, %s603_s12  ;;  %v466_v2 = vld [vmem:[%s210_s23 + $0x8] sm:$0xff]   ;;  %s205_s28 = scalar_lea.vmem %s586_s0, %s400_s24 }
  0x14   : > { %416 = vmatpush3.bf16.msra.mxu0 %v465_v1  ;;  %v223_v3 = vld [vmem:[%s205_s28] sm:$0xf]  ;;  %s213_s4 = scalar_lea.vmem %s588_s2, %s601_s13  ;;  %s404_s5 = sshll.u32 %s219_s25, 2 }
  0x15   : > { %417 = vmatprep.subr.bf16.mxu0 %v507_v0  ;;  %v405_v4 = vld [vmem:[%s213_s4] ss:$0 sm:$0xff]  ;;  %s221_s8 = scalar_lea.vmem %s589_s3, %s404_s5 }
  0x18   : > { %418 = vmatpush3.bf16.msra.mxu0 %v466_v2 }
  0x1b   : > { %420 = vmatmul.mubr.msk.bf16.vlgmr.msra.gmra.mrb[0].mxu0 %vm247_vm1, %v223_v3 }
  0xee   : > { %v285_v5 = vpop.f32.mrb[0].mxu0 }
  0xef   : > { %v286_v6 = vadd.f32 %v405_v4, %v285_v5  ;;  %v421_v7 = vpop.f32.mrb[1].mxu0 }
  0xf0   : > { %v288_v8 = vpop.f32.mrb[2].mxu0 }
  0xf1   : > { %v291_v9 = vpack.c.bf16 %v286_v6, %v286_v6  ;;  %v422_v10 = vpop.f32.mrb[3].mxu0 }
  0xf3   : > { %293 = vst.msk [vmem:[%s221_s8] sm:$0xf] %vm292_vm2, %v291_v9 }
  0xf4 PF: > { %s13_s16 = sadd.s32 1, %s505_s16   ;;  %s590_s12 = smov %s497_s14 }
  0xf5   : > { %p10_p7 = scmp.ge.s32.totalorder %s13_s16, 6   ;;  %s591_s13 = smov %s501_s15 }
  0xf6   : > { %s592_s14 = smov %s595_s17  ;;  %s593_s15 = smov %s599_s18 }
  0xf7   :  { %12 = sbr.rel (!%p10_p7) target bundleno = 3 (0x3), region = 68 }

// kernel: pointer_decoder_forward.15
= control target key start
LH: loop header
LB: loop body
LE: loop exit
PB: predicated region body
PF: predicated region fallthrough
CT: control target
= control target key end

     0   :  { %s745_s30 = smov 0   ;;  %s804_s0 = inlined_call_operand.vmem [shape: bf16[16,32], index: 0, kind: input, shape index: {}]   ;;  %s805_s1 = inlined_call_operand.vmem [shape: bf16[32,32], index: 1, kind: input, shape index: {}]   ;;  %s806_s2 = inlined_call_operand.vmem [shape: f32[1,32], index: 2, kind: input, shape index: {}]   ;;  %s807_s3 = inlined_call_operand.vmem [shape: bf16[16,32], index: 3, kind: input, shape index: {}]   ;;  %s808_s4 = inlined_call_operand.vmem [shape: f32[1,32], index: 4, kind: input, shape index: {}]   ;;  %s809_s5 = inlined_call_operand.vmem [shape: f32[1,32], index: 5, kind: input, shape index: {}]   ;;  %s810_s6 = inlined_call_operand.vmem [shape: bf16[32,32], index: 6, kind: input, shape index: {}]   ;;  %s811_s7 = inlined_call_operand.vmem [shape: f32[1,32], index: 7, kind: input, shape index: {}]   ;;  %s812_s8 = inlined_call_operand.vmem [shape: bf16[16,32], index: 8, kind: output, shape index: {0}]   ;;  %s813_s9 = inlined_call_operand.vmem [shape: bf16[16,32], index: 9, kind: output, shape index: {1}]  }
   0x1 LB: > { %s626_s10 = sadd.s32 4294967295, %s691_s30   ;;  %p630_p0 = scmp.ge.s32.totalorder %s691_s30, 1  ;;  %s691_s30 = sphi %s745_s30, %s20_s30  }
   0x2   : > { %p298_p1 = scmp.lt.s32.totalorder %s691_s30, 3 }
   0x4   : > { %p299_p2 = pnand %p630_p0, %p298_p1 }
   0x5   : > { %v679_v0 = vld [vmem:[%s805_s1] sm:$0xff] (!%p299_p2)   ;;  %v693_v1 = vmov (!%p299_p2), 0.0   ;;  %v680_v2 = vld [vmem:[%s805_s1 + $0x8] sm:$0xff] (!%p299_p2)   ;;  %vm694_vm0 = vmmov (!%p299_p2), 0   ;;  %p340_p3 = scmp.lt.s32.totalorder (!%p299_p2), %s626_s10, 1  ;;  %vm381_vm1 = vcmask (!%p299_p2), 261120  }
   0x6   : > { %302 = sbr.rel (%p299_p2) target bundleno = 765 (0x2fd), region = 52  ;;  %653 = vmatprep.subr.bf16.mxu0 (!%p299_p2), %v693_v1  ;;  %661 = vmatprep.subr.bf16.mxu1 (!%p299_p2), %v693_v1  ;;  %v635_v5 = vld [vmem:[%s806_s2] ss:$0 sm:$0xff] (!%p299_p2)  ;;  %vm429_vm2 = vcmask (!%p299_p2), 257024   ;;  %v682_v21 = vld [vmem:[%s810_s6 + $0x8] sm:$0xff] (!%p299_p2)  }
   0x7   : > { %654 = vmatpush3.bf16.msra.mxu0 (!%p299_p2), %v679_v0  ;;  %657 = vmatprep.mubr.msk.bf16.mxu0 (!%p299_p2), %vm694_vm0, %v693_v1  ;;  %v681_v20 = vld [vmem:[%s810_s6] sm:$0xff] (!%p299_p2)  }
   0x8   : > { %655 = vmatprep.subr.bf16.mxu0 (!%p299_p2), %v693_v1  ;;  %665 = vmatprep.mubr.msk.bf16.mxu1 (!%p299_p2), %vm694_vm0, %v693_v1  ;;  %v639_v26 = vld [vmem:[%s808_s4] ss:$0 sm:$0xff] (!%p299_p2) }
   0x9   : > { %662 = vmatpush3.bf16.msra.mxu1 (!%p299_p2), %v681_v20  ;;  %v640_v28 = vld [vmem:[%s809_s5] ss:$0 sm:$0xff] (!%p299_p2) }
   0xa   : > { %663 = vmatprep.subr.bf16.mxu1 (!%p299_p2), %v693_v1  ;;  %v641_v32 = vld [vmem:[%s811_s7] ss:$0 sm:$0xff] (!%p299_p2) }
   0xb   : > { %656 = vmatpush3.bf16.msra.mxu0 (!%p299_p2), %v680_v2 }
   0xd   : > { %s815_s10 = smov (!%p340_p3, %s626_s10), 1  ;;  %664 = vmatpush3.bf16.msra.mxu1 %v682_v21 }
   0xe   : > { %s759_s15 = sshll.u32 %s815_s10, 2 }
   0xf   : > { %s343_s18 = scalar_lea.vmem %s804_s0, %s759_s15  ;;  %s347_s21 = scalar_lea.vmem %s807_s3, %s759_s15 }
  0x10   : > { %v357_v3 = vld [vmem:[%s343_s18] sm:$0xf]  ;;  %s351_s26 = scalar_lea.vmem %s812_s8, %s759_s15  ;;  %s355_s20 = scalar_lea.vmem %s813_s9, %s759_s15 }
  0x11   : > { %658 = vmatmul.mubr.msk.bf16.vlgmr.msra.gmra.mrb[0].mxu0 %vm381_vm1, %v357_v3  ;;  %v425_v4 = vld [vmem:[%s347_s21] sm:$0xf] }
  0x12   : > { %v426_v6 = vunpack.c.l.bf16 %v425_v4 }
  0xe4   : > { %v419_v7 = vpop.f32.mrb[0].mxu0 }
  0xe5   : > { %v420_v8 = vadd.f32 %v635_v5, %v419_v7  ;;  %v659_v9 = vpop.f32.mrb[1].mxu0 }
  0xe6   : > { %v422_v10 = vpop.f32.mrb[2].mxu0 }
  0xe7   : > { %v427_v11 = vadd.f32 %v426_v6, %v420_v8  ;;  %v660_v12 = vpop.f32.mrb[3].mxu0 }
  0xe9   : > { %v428_v13 = vpack.c.bf16 %v427_v11, %v427_v11  ;;  %v433_v14 = vsel %vm381_vm1, %v427_v11, 0.0 }
  0xea   : > { %434 = vadd.xlane.f32.xlu0 %v433_v14 }
  0xeb   : > { %430 = vst.msk [vmem:[%s351_s26] sm:$0xf] %vm429_vm2, %v428_v13 }
 0x177   : > { %v435_v15 = vpop.xlane.xlu0 %434 }
 0x178   : > { %v437_v16 = vmul.f32 0.03125, %v435_v15 }
 0x17a   : > { %v438_v17 = vsub.f32 %v427_v11, %v437_v16 }
 0x17c   : > { %v439_v18 = vmul.f32 %v438_v17, %v438_v17 }
 0x17e   : > { %v440_v19 = vsel %vm381_vm1, %v439_v18, 0.0 }
 0x17f   : > { %441 = vadd.xlane.f32.xlu0 %v440_v19 }
 0x20c   : > { %v442_v22 = vpop.xlane.xlu0 %441 }
 0x20d   : > { %v443_v23 = vmul.f32 0.03125, %v442_v22 }
 0x20f   : > { %v444_v24 = vadd.f32 1e-06, %v443_v23 }
 0x211   : > { %683 = vrsqrt.f32 %v444_v24 }
 0x21b   : > { %v684_v25 = vpop.eup %683 }
 0x21c   : > { %v446_v27 = vmul.f32 %v684_v25, %v438_v17 }
 0x21e   : > { %v453_v29 = vmul.f32 %v639_v26, %v446_v27 }
 0x220   : > { %v460_v30 = vadd.f32 %v640_v28, %v453_v29 }
 0x222   : > { %v461_v31 = vpack.c.bf16 %v460_v30, %v460_v30 }
 0x224   : > { %666 = vmatmul.mubr.msk.bf16.vlgmr.msra.gmra.mrb[0].mxu1 %vm381_vm1, %v461_v31 }
 0x2f7   : > { %v522_v33 = vpop.f32.mrb[0].mxu1 }
 0x2f8   : > { %v523_v34 = vadd.f32 %v641_v32, %v522_v33  ;;  %v667_v35 = vpop.f32.mrb[1].mxu1 }
 0x2f9   : > { %v525_v36 = vpop.f32.mrb[2].mxu1 }
 0x2fa   : > { %v528_v37 = vpack.c.bf16 %v523_v34, %v523_v34  ;;  %v668_v38 = vpop.f32.mrb[3].mxu1 }
 0x2fc   : > { %529 = vst.msk [vmem:[%s355_s20] sm:$0xf] %vm429_vm2, %v528_v37 }
 0x2fd PF: > { %s20_s30 = sadd.s32 1, %s691_s30  }
 0x2fe   : > { %p17_p4 = scmp.ge.s32.totalorder %s20_s30, 4  }
 0x300   :  { %19 = sbr.rel (!%p17_p4) target bundleno = 1 (0x1), region = 97 }

// kernel: pointer_decoder_forward.14
= control target key start
LH: loop header
LB: loop body
LE: loop exit
PB: predicated region body
PF: predicated region fallthrough
CT: control target
= control target key end

     0   :  { %s871_s9 = smov 0   ;;  %s973_s0 = inlined_call_operand.vmem [shape: bf16[2,8,96], index: 0, kind: input, shape index: {}]   ;;  %s974_s1 = inlined_call_operand.vmem [shape: bf16[2,1,8], index: 1, kind: input, shape index: {}]   ;;  %s975_s2 = inlined_call_operand.vmem [shape: bf16[2,8,32], index: 2, kind: output, shape index: {}]  }
   0x1 LB: > { %s707_s10 = sadd.s32 4294967295, %s837_s9   ;;  %p711_p0 = scmp.ge.s32.totalorder %s837_s9, 1  ;;  %s837_s9 = sphi %s871_s9, %s12_s9  }
   0x2   : > { %p119_p1 = scmp.lt.s32.totalorder %s837_s9, 3 }
   0x4   : > { %p120_p2 = pnand %p711_p0, %p119_p1 }
   0x5   : > { %p142_p3 = scmp.lt.s32.totalorder (!%p120_p2), %s707_s10, 1  ;;  %v839_v0 = vmov (!%p120_p2), 0.0   ;;  %vm840_vm0 = vmmov (!%p120_p2), 0   ;;  %s841_s15 = smov (!%p120_p2), 96   ;;  %vm180_vm1 = vcmask (!%p120_p2), 64512   ;;  %v844_v6 = vmov (!%p120_p2), 0  }
   0x6   : > { %123 = sbr.rel (%p120_p2) target bundleno = 1607 (0x647), region = 28  ;;  %741 = vmatprep.subr.bf16.mxu0 (!%p120_p2), %v839_v0  ;;  %743 = vmatprep.mubr.msk.bf16.mxu0 (!%p120_p2), %vm840_vm0, %v839_v0  ;;  %s842_s16 = smov (!%p120_p2), 64   ;;  %v158_v8 = vlaneseq (!%p120_p2)  ;;  %vm245_vm7 = vcmask (!%p120_p2), 1043456   ;;  %vm405_vm8 = vcmask (!%p120_p2), 130112   ;;  %vm522_vm9 = vcmask (!%p120_p2), 195712  }
   0x7   : > { %747 = vmatprep.subr.bf16.mxu1 (!%p120_p2), %v839_v0  ;;  %749 = vmatprep.mubr.msk.bf16.mxu1 (!%p120_p2), %vm840_vm0, %v839_v0  ;;  %s843_s17 = smov (!%p120_p2), 88   ;;  %s845_s21 = smov (!%p120_p2), 72   ;;  %vm639_vm10 = vcmask (!%p120_p2), 261312   ;;  %vm643_vm11 = vcmask (!%p120_p2), 257024  }
   0x8   : > { %v159_v10 = vshrl.u32 (!%p120_p2), %v158_v8, 7  ;;  %v161_v13 = vand.u32 (!%p120_p2), 127, %v158_v8  ;;  %s846_s22 = smov (!%p120_p2), 120   ;;  %s847_s23 = smov (!%p120_p2), 80  }
   0x9   : > { %s848_s24 = smov (!%p120_p2), 112   ;;  %s849_s25 = smov (!%p120_p2), 104  }
   0xa   : > { %v171_v11 = vsub.s32 (!%p120_p2), 0, %v159_v10  ;;  %vm162_vm4 = vcmp.gt.s32.totalorder (!%p120_p2), %v161_v13, %v159_v10  ;;  %s850_s26 = smov (!%p120_p2), 56   ;;  %s851_s27 = smov (!%p120_p2), 48  }
   0xb   : > { %s852_s28 = smov (!%p120_p2), 40   ;;  %s853_s29 = smov (!%p120_p2), 8  }
   0xc   : > { %s854_s30 = smov (!%p120_p2), 16   ;;  %s855_s3 = smov (!%p120_p2), 24  }
   0xd   : > { %s979_s10 = smov (!%p142_p3, %s707_s10), 1 }
   0xe   : > { %s712_s11 = sshll.u32 %s979_s10, 2  ;;  %s148_s20 = scalar_lea.vmem %s974_s1, %s979_s10 }
   0xf   : > { %s145_s14 = scalar_lea.vmem %s973_s0, %s712_s11  ;;  %v163_v5 = vld [vmem:[%s148_s20] sm:$0x1]  ;;  %s152_s6 = scalar_lea.vmem %s975_s2, %s712_s11 }
  0x10   : > { %v157_v1 = vld [vmem:[%s145_s14] sm:$0xf]  ;;  %vm164_vm2 = vcmp.gt.bf16.partialorder %v163_v5, 1056980736 }
  0x11   : > { %v893_v2 = vcombine.low %v157_v1, %v157_v1  ;;  %v165_v7 = vsel %vm164_vm2, 65537, %v844_v6 }
  0x12   : > { %v166_v9 = vunpack.c.l.b16 %v165_v7 }
  0x13   : > { %178 = vrot.lane.b32.xlu0 %v893_v2, %s841_s15  ;;  %240 = vrot.lane.b32.xlu1 %v893_v2, %s842_s16 }
  0x14   : > { %vm167_vm3 = vcmp.ne.s32.totalorder %v166_v9, 0 }
  0x15   : > { %v168_v12 = vsel %vm167_vm3, 1, %v844_v6 }
  0x16   : > { %v172_v14 = vrot.slane %v168_v12, %v171_v11 }
  0x17   : > { %292 = vrot.lane.b32.xlu1 %v893_v2, %s843_s17 }
  0x18   : > { %vm173_vm5 = vcmp.eq.s32.totalorder %v172_v14, 1 }
  0x19   : > { %vm907_vm6 = vmor %vm162_vm4, %vm173_vm5 }
  0x85   : > { %v179_v3 = vpop.permute.xlu0 %178  ;;  %v241_v22 = vpop.permute.xlu1 %240 }
  0x86   : > { %v185_v4 = vsel %vm180_vm1, %v179_v3, 0  ;;  %v247_v23 = vsel %vm245_vm7, %v241_v22, 0 }
  0x87   : > { %742 = vmatpush3.bf16.xpose.msra.mxu0 %v185_v4  ;;  %748 = vmatpush3.bf16.msra.mxu1 %v247_v23 }
  0x88   : > { %759 = vmatprep.subr.bf16.mxu0 %v839_v0  ;;  %753 = vmatprep.subr.bf16.mxu1 %v839_v0 }
  0x89   : > { %v293_v29 = vpop.permute.xlu1 %292 }
  0x8a   : > { %v298_v35 = vsel %vm180_vm1, %v293_v29, 0 }
  0x8e   : > { %744 = vmatmul.mubr.msk.bf16.vlgmr.msra.gmra.mrb[0].mxu0 %vm180_vm1, %v157_v1 }
  0x8f   : > { %761 = vmatprep.mubr.msk.bf16.mxu0 %vm840_vm0, %v839_v0 }
 0x161   : > { %v221_v16 = vpop.f32.mrb[0].mxu0 }
 0x162   : > { %v227_v17 = vsel %vm907_vm6, -1e+18, %v221_v16  ;;  %v745_v18 = vpop.f32.mrb[1].mxu0 }
 0x163   : > { %v224_v19 = vpop.f32.mrb[2].mxu0  ;;  %v228_v20 = vsel %vm180_vm1, %v227_v17, -inf }
 0x164   : > { %229 = vmax.xlane.f32.xlu0 %v228_v20  ;;  %v746_v21 = vpop.f32.mrb[3].mxu0 }
 0x17a   : > { %526 = vrot.lane.b32.xlu0 %v893_v2, %s845_s21 }
 0x1f1   : > { %v230_v24 = vpop.xlane.xlu0 %229 }
 0x1f2   : > { %v231_v25 = vsub.f32 %v227_v17, %v230_v24 }
 0x1f4   : > { %v232_v26 = vmul.f32 1.442695, %v231_v25 }
 0x1f5   : > { %v527_v38 = vpop.permute.xlu0 %526 }
 0x1f6   : > { %815 = vpow2.f32 %v232_v26  ;;  %v532_v40 = vsel %vm180_vm1, %v527_v38, 0 }
 0x200   : > { %v816_v27 = vpop.eup %815 }
 0x201   : > { %v234_v28 = vsel %vm180_vm1, %v816_v27, 0.0 }
 0x202   : > { %235 = vadd.xlane.f32.xlu1 %v234_v28 }
 0x213   : > { %290 = vrot.lane.b32.xlu1 %v893_v2, %s846_s22 }
 0x217   : > { %409 = vrot.lane.b32.xlu1 %v893_v2, %s847_s23 }
 0x21b   : > { %407 = vrot.lane.b32.xlu1 %v893_v2, %s848_s24 }
 0x21f   : > { %524 = vrot.lane.b32.xlu1 %v893_v2, %s849_s25 }
 0x28f   : > { %v236_v30 = vpop.xlane.xlu1 %235 }
 0x290   : > { %817 = vrcp.f32 %v236_v30 }
 0x293   : > { %v291_v33 = vpop.permute.xlu1 %290 }
 0x297   : > { %v410_v36 = vpop.permute.xlu1 %409 }
 0x298   : > { %v415_v37 = vsel %vm180_vm1, %v410_v36, 0 }
 0x29a   : > { %v818_v31 = vpop.eup %817 }
 0x29b   : > { %v238_v32 = vmul.f32 %v818_v31, %v816_v27  ;;  %v408_v39 = vpop.permute.xlu1 %407 }
 0x29d   : > { %v239_v34 = vpack.c.bf16 %v238_v32, %v238_v32 }
 0x29f   : > { %750 = vmatmul.mubr.msk.bf16.vlgmr.msra.gmra.mrb[0].mxu1 %vm180_vm1, %v239_v34  ;;  %v525_v41 = vpop.permute.xlu1 %524 }
 0x2a0   : > { %754 = vmatpush3.bf16.xpose.msra.mxu1 %v298_v35  ;;  %755 = vmatprep.mubr.msk.bf16.mxu1 %vm840_vm0, %v839_v0 }
 0x2a1   : > { %765 = vmatprep.subr.bf16.mxu1 %v839_v0 }
 0x2a7   : > { %756 = vmatmul.mubr.msk.bf16.vlgmr.msra.gmra.mrb[4].mxu1 %vm180_vm1, %v291_v33 }
 0x2a8   : > { %766 = vmatpush3.bf16.xpose.msra.mxu1 %v415_v37  ;;  %767 = vmatprep.mubr.msk.bf16.mxu1 %vm840_vm0, %v839_v0 }
 0x2a9   : > { %777 = vmatprep.subr.bf16.mxu1 %v839_v0 }
 0x2af   : > { %768 = vmatmul.mubr.msk.bf16.vlgmr.msra.gmra.mrb[8].mxu1 %vm180_vm1, %v408_v39 }
 0x2b0   : > { %778 = vmatpush3.bf16.xpose.msra.mxu1 %v532_v40  ;;  %779 = vmatprep.mubr.msk.bf16.mxu1 %vm840_vm0, %v839_v0 }
 0x2b7   : > { %780 = vmatmul.mubr.msk.bf16.vlgmr.msra.gmra.mrb[12].mxu1 %vm180_vm1, %v525_v41 }
 0x372   : > { %v283_v42 = vpop.f32.mrb[0].mxu1 }
 0x373   : > { %289 = vst.msk [vmem:[#allocation2] sm:$0xff] %vm180_vm1, %v283_v42  ;;  %v751_v43 = vpop.f32.mrb[1].mxu1 }
 0x374   : > { %v286_v44 = vpop.f32.mrb[2].mxu1 }
 0x375   : > { %v752_v45 = vpop.f32.mrb[3].mxu1 }
 0x37a   : > { %v334_v46 = vpop.f32.mrb[4].mxu1 }
 0x37b   : > { %v340_v47 = vsel %vm907_vm6, -1e+18, %v334_v46  ;;  %v757_v48 = vpop.f32.mrb[5].mxu1 }
 0x37c   : > { %v337_v49 = vpop.f32.mrb[6].mxu1  ;;  %v341_v50 = vsel %vm180_vm1, %v340_v47, -inf }
 0x37d   : > { %342 = vmax.xlane.f32.xlu1 %v341_v50  ;;  %v758_v51 = vpop.f32.mrb[7].mxu1 }
 0x382   : > { %v451_v52 = vpop.f32.mrb[8].mxu1 }
 0x383   : > { %v457_v53 = vsel %vm907_vm6, -1e+18, %v451_v52  ;;  %v769_v54 = vpop.f32.mrb[9].mxu1 }
 0x384   : > { %v458_v55 = vsel %vm180_vm1, %v457_v53, -inf  ;;  %v454_v56 = vpop.f32.mrb[10].mxu1 }
 0x385   : > { %459 = vmax.xlane.f32.xlu0 %v458_v55  ;;  %v770_v57 = vpop.f32.mrb[11].mxu1 }
 0x38a   : > { %v568_v58 = vpop.f32.mrb[12].mxu1 }
 0x38b   : > { %v574_v59 = vsel %vm907_vm6, -1e+18, %v568_v58  ;;  %v781_v60 = vpop.f32.mrb[13].mxu1 }
 0x38c   : > { %v575_v61 = vsel %vm180_vm1, %v574_v59, -inf  ;;  %v571_v62 = vpop.f32.mrb[14].mxu1 }
 0x38d   : > { %576 = vmax.xlane.f32.xlu1 %v575_v61  ;;  %v782_v63 = vpop.f32.mrb[15].mxu1 }
 0x40a   : > { %v343_v1 = vpop.xlane.xlu1 %342 }
 0x40b   : > { %v344_v3 = vsub.f32 %v340_v47, %v343_v1 }
 0x40d   : > { %v345_v4 = vmul.f32 1.442695, %v344_v3 }
 0x40f   : > { %819 = vpow2.f32 %v345_v4 }
 0x412   : > { %v460_v12 = vpop.xlane.xlu0 %459 }
 0x413   : > { %v461_v13 = vsub.f32 %v457_v53, %v460_v12 }
 0x415   : > { %v462_v14 = vmul.f32 1.442695, %v461_v13 }
 0x419   : > { %v820_v5 = vpop.eup %819 }
 0x41a   : > { %v577_v6 = vpop.xlane.xlu1 %576  ;;  %v347_v7 = vsel %vm180_vm1, %v820_v5, 0.0 }
 0x41b   : > { %v578_v8 = vsub.f32 %v574_v59, %v577_v6  ;;  %348 = vadd.xlane.f32.xlu1 %v347_v7 }
 0x41d   : > { %v579_v9 = vmul.f32 1.442695, %v578_v8 }
 0x41f   : > { %821 = vpow2.f32 %v579_v9 }
 0x420   : > { %823 = vpow2.f32 %v462_v14 }
 0x429   : > { %v822_v10 = vpop.eup %821 }
 0x42a   : > { %v581_v11 = vsel %vm180_vm1, %v822_v10, 0.0  ;;  %v824_v15 = vpop.eup %823 }
 0x42b   : > { %582 = vadd.xlane.f32.xlu0 %v581_v11  ;;  %v464_v16 = vsel %vm180_vm1, %v824_v15, 0.0 }
 0x42c   : > { %353 = vrot.lane.b32.xlu1 %v893_v2, %s850_s26 }
 0x441   : > { %470 = vrot.lane.b32.xlu0 %v893_v2, %s851_s27 }
 0x450   : > { %465 = vadd.xlane.f32.xlu1 %v464_v16 }
 0x461   : > { %587 = vrot.lane.b32.xlu1 %v893_v2, %s852_s28 }
 0x4a8   : > { %v349_v17 = vpop.xlane.xlu1 %348 }
 0x4a9   : > { %825 = vrcp.f32 %v349_v17 }
 0x4ac   : > { %v354_v18 = vpop.permute.xlu1 %353 }
 0x4ad   : > { %v359_v19 = vsel %vm245_vm7, %v354_v18, 0 }
 0x4ae   : > { %760 = vmatpush3.bf16.msra.mxu0 %v359_v19 }
 0x4af   : > { %771 = vmatprep.subr.bf16.mxu0 %v839_v0 }
 0x4b3   : > { %v826_v20 = vpop.eup %825 }
 0x4b4   : > { %v351_v21 = vmul.f32 %v826_v20, %v820_v5 }
 0x4b6   : > { %v352_v22 = vpack.c.bf16 %v351_v21, %v351_v21 }
 0x4b8   : > { %762 = vmatmul.mubr.msk.bf16.vlgmr.msra.gmra.mrb[4].mxu0 %vm180_vm1, %v352_v22  ;;  %v583_v23 = vpop.xlane.xlu0 %582 }
 0x4b9   : > { %773 = vmatprep.mubr.msk.bf16.mxu0 %vm840_vm0, %v839_v0 }
 0x4bc   : > { %v471_v24 = vpop.permute.xlu0 %470 }
 0x4bd   : > { %v476_v2 = vsel %vm245_vm7, %v471_v24, 0 }
 0x4be   : > { %772 = vmatpush3.bf16.msra.mxu0 %v476_v2 }
 0x4bf   : > { %783 = vmatprep.subr.bf16.mxu0 %v839_v0 }
 0x4dd   : > { %v466_v25 = vpop.xlane.xlu1 %465 }
 0x4de   : > { %827 = vrcp.f32 %v466_v25 }
 0x4df   : > { %829 = vrcp.f32 %v583_v23 }
 0x4e1   : > { %v588_v27 = vpop.permute.xlu1 %587 }
 0x4e2   : > { %v593_v29 = vsel %vm245_vm7, %v588_v27, 0 }
 0x4e8   : > { %v828_v26 = vpop.eup %827 }
 0x4e9   : > { %v468_v28 = vmul.f32 %v828_v26, %v824_v15  ;;  %v830_v31 = vpop.eup %829 }
 0x4ea   : > { %v585_v32 = vmul.f32 %v830_v31, %v822_v10 }
 0x4eb   : > { %v469_v30 = vpack.c.bf16 %v468_v28, %v468_v28 }
 0x4ec   : > { %v586_v33 = vpack.c.bf16 %v585_v32, %v585_v32 }
 0x4ed   : > { %774 = vmatmul.mubr.msk.bf16.vlgmr.msra.gmra.mrb[8].mxu0 %vm180_vm1, %v469_v30 }
 0x4ee   : > { %784 = vmatpush3.bf16.msra.mxu0 %v593_v29  ;;  %785 = vmatprep.mubr.msk.bf16.mxu0 %vm840_vm0, %v839_v0 }
 0x4f5   : > { %786 = vmatmul.mubr.msk.bf16.vlgmr.msra.gmra.mrb[12].mxu0 %vm180_vm1, %v586_v33 }
 0x58b   : > { %v395_v34 = vpop.f32.mrb[4].mxu0 }
 0x58c   : > { %402 = vrot.lane.b32.xlu1 %v395_v34, %s853_s29  ;;  %v763_v35 = vpop.f32.mrb[5].mxu0 }
 0x58d   : > { %v398_v36 = vpop.f32.mrb[6].mxu0 }
 0x58e   : > { %v764_v37 = vpop.f32.mrb[7].mxu0 }
 0x5c0   : > { %v512_v38 = vpop.f32.mrb[8].mxu0 }
 0x5c1   : > { %519 = vrot.lane.b32.xlu0 %v512_v38, %s854_s30  ;;  %v775_v39 = vpop.f32.mrb[9].mxu0 }
 0x5c2   : > { %v515_v40 = vpop.f32.mrb[10].mxu0 }
 0x5c3   : > { %v776_v41 = vpop.f32.mrb[11].mxu0 }
 0x5c8   : > { %v629_v42 = vpop.f32.mrb[12].mxu0 }
 0x5c9   : > { %636 = vrot.lane.b32.xlu1 %v629_v42, %s855_s3  ;;  %v787_v0 = vpop.f32.mrb[13].mxu0 }
 0x5ca   : > { %v632_v43 = vpop.f32.mrb[14].mxu0 }
 0x5cb   : > { %v788_v44 = vpop.f32.mrb[15].mxu0 }
 0x5fe   : > { %v403_v45 = vpop.permute.xlu1 %402 }
 0x5ff   : > { %406 = vst.msk [vmem:[#allocation2] sm:$0xff] %vm405_vm8, %v403_v45 }
 0x633   : > { %v520_v46 = vpop.permute.xlu0 %519 }
 0x634   : > { %523 = vst.msk [vmem:[#allocation2] sm:$0xff] %vm522_vm9, %v520_v46 }
 0x63b   : > { %v637_v47 = vpop.permute.xlu1 %636 }
 0x63c   : > { %640 = vst.msk [vmem:[#allocation2] sm:$0xff] %vm639_vm10, %v637_v47 }
 0x643   : > { %v641_v48 = vld [vmem:[#allocation2] sm:$0xff] }
 0x644   : > { %v642_v49 = vpack.c.bf16 %v641_v48, %v641_v48 }
 0x646   : > { %644 = vst.msk [vmem:[%s152_s6] sm:$0xf] %vm643_vm11, %v642_v49 }
 0x647 PF: > { %s12_s9 = sadd.s32 1, %s837_s9  }
 0x648   : > { %p9_p4 = scmp.ge.s32.totalorder %s12_s9, 4  }
 0x64a   :  { %11 = sbr.rel (!%p9_p4) target bundleno = 1 (0x1), region = 61 }

// kernel: pointer_decoder_forward.23
= control target key start
LH: loop header
LB: loop body
LE: loop exit
PB: predicated region body
PF: predicated region fallthrough
CT: control target
= control target key end

     0   :  { %s302_s12 = smov 0   ;;  %s328_s0 = inlined_call_operand.vmem [shape: bf16[16,32], index: 0, kind: input, shape index: {}]   ;;  %s329_s1 = inlined_call_operand.vmem [shape: f32[1,32], index: 1, kind: input, shape index: {}]   ;;  %s330_s2 = inlined_call_operand.vmem [shape: f32[1,32], index: 2, kind: input, shape index: {}]   ;;  %s331_s3 = inlined_call_operand.vmem [shape: f32[16,32], index: 3, kind: output, shape index: {}]  }
   0x1 LB: > { %s253_s13 = sadd.s32 4294967295, %s280_s12   ;;  %p257_p0 = scmp.ge.s32.totalorder %s280_s12, 1  ;;  %s280_s12 = sphi %s302_s12, %s13_s12  }
   0x2   : > { %p136_p1 = scmp.lt.s32.totalorder %s280_s12, 3 }
   0x4   : > { %p137_p2 = pnand %p257_p0, %p136_p1 }
   0x5   : > { %p158_p3 = scmp.lt.s32.totalorder (!%p137_p2), %s253_s13, 1  ;;  %vm170_vm0 = vcmask (!%p137_p2), 261120   ;;  %v260_v12 = vld [vmem:[%s329_s1] ss:$0 sm:$0xff] (!%p137_p2) }
   0x6   : > { %140 = sbr.rel (%p137_p2) target bundleno = 333 (0x14d), region = 32  ;;  %v261_v14 = vld [vmem:[%s330_s2] ss:$0 sm:$0xff] (!%p137_p2) }
   0xd   : > { %s333_s13 = smov (!%p158_p3, %s253_s13), 1 }
   0xe   : > { %s258_s14 = sshll.u32 %s333_s13, 2  ;;  %s259_s20 = sshll.u32 %s333_s13, 3 }
   0xf   : > { %s161_s17 = scalar_lea.vmem %s328_s0, %s258_s14  ;;  %s165_s25 = scalar_lea.vmem %s331_s3, %s259_s20 }
  0x10   : > { %v166_v0 = vld [vmem:[%s161_s17] sm:$0xf] }
  0x11   : > { %v167_v1 = vunpack.c.l.bf16 %v166_v0 }
  0x13   : > { %v171_v2 = vsel %vm170_vm0, %v167_v1, 0.0 }
  0x14   : > { %172 = vadd.xlane.f32.xlu0 %v171_v2 }
  0xa1   : > { %v173_v3 = vpop.xlane.xlu0 %172 }
  0xa2   : > { %v175_v4 = vmul.f32 0.03125, %v173_v3 }
  0xa4   : > { %v176_v5 = vsub.f32 %v167_v1, %v175_v4 }
  0xa6   : > { %v177_v6 = vmul.f32 %v176_v5, %v176_v5 }
  0xa8   : > { %v178_v7 = vsel %vm170_vm0, %v177_v6, 0.0 }
  0xa9   : > { %179 = vadd.xlane.f32.xlu0 %v178_v7 }
 0x136   : > { %v180_v8 = vpop.xlane.xlu0 %179 }
 0x137   : > { %v181_v9 = vmul.f32 0.03125, %v180_v8 }
 0x139   : > { %v182_v10 = vadd.f32 1e-06, %v181_v9 }
 0x13b   : > { %272 = vrsqrt.f32 %v182_v10 }
 0x145   : > { %v273_v11 = vpop.eup %272 }
 0x146   : > { %v184_v13 = vmul.f32 %v273_v11, %v176_v5 }
 0x148   : > { %v191_v15 = vmul.f32 %v260_v12, %v184_v13 }
 0x14a   : > { %v198_v16 = vadd.f32 %v261_v14, %v191_v15 }
 0x14c   : > { %199 = vst.msk [vmem:[%s165_s25] sm:$0xff] %vm170_vm0, %v198_v16 }
 0x14d PF: > { %s13_s12 = sadd.s32 1, %s280_s12  }
 0x14e   : > { %p10_p4 = scmp.ge.s32.totalorder %s13_s12, 4  }
 0x150   :  { %12 = sbr.rel (!%p10_p4) target bundleno = 1 (0x1), region = 62 }

// kernel: pointer_decoder_forward.17
= control target key start
LH: loop header
LB: loop body
LE: loop exit
PB: predicated region body
PF: predicated region fallthrough
CT: control target
= control target key end

     0   :  { %s845_s13 = smov 0   ;;  %s913_s0 = inlined_call_operand.vmem [shape: bf16[16,32], index: 0, kind: input, shape index: {}]   ;;  %s914_s1 = inlined_call_operand.vmem [shape: bf16[32,32], index: 1, kind: input, shape index: {}]   ;;  %s915_s2 = inlined_call_operand.vmem [shape: f32[1,32], index: 2, kind: input, shape index: {}]   ;;  %s916_s3 = inlined_call_operand.vmem [shape: bf16[16,32], index: 3, kind: input, shape index: {}]   ;;  %s917_s4 = inlined_call_operand.vmem [shape: f32[1,32], index: 4, kind: input, shape index: {}]   ;;  %s918_s5 = inlined_call_operand.vmem [shape: f32[1,32], index: 5, kind: input, shape index: {}]   ;;  %s919_s6 = inlined_call_operand.vmem [shape: bf16[32,64], index: 6, kind: input, shape index: {}]   ;;  %s920_s7 = inlined_call_operand.vmem [shape: f32[1,64], index: 7, kind: input, shape index: {}]   ;;  %s921_s8 = inlined_call_operand.vmem [shape: bf16[64,32], index: 8, kind: input, shape index: {}]   ;;  %s922_s9 = inlined_call_operand.vmem [shape: f32[1,32], index: 9, kind: input, shape index: {}]   ;;  %s923_s10 = inlined_call_operand.vmem [shape: bf16[16,32], index: 10, kind: output, shape index: {}]  }
   0x1 LB: > { %s695_s14 = sadd.s32 4294967295, %s786_s13   ;;  %p699_p0 = scmp.ge.s32.totalorder %s786_s13, 1  ;;  %s786_s13 = sphi %s845_s13, %s20_s13  }
   0x2   : > { %p320_p1 = scmp.lt.s32.totalorder %s786_s13, 3 }
   0x4   : > { %p321_p2 = pnand %p699_p0, %p320_p1 }
   0x5   : > { %v770_v0 = vld [vmem:[%s914_s1] sm:$0xff] (!%p321_p2)   ;;  %v788_v1 = vmov (!%p321_p2), 0.0   ;;  %v771_v2 = vld [vmem:[%s914_s1 + $0x8] sm:$0xff] (!%p321_p2)   ;;  %vm789_vm0 = vmmov (!%p321_p2), 0   ;;  %p360_p3 = scmp.lt.s32.totalorder (!%p321_p2), %s695_s14, 1  ;;  %vm397_vm1 = vcmask (!%p321_p2), 261120  }
   0x6   : > { %324 = sbr.rel (%p321_p2) target bundleno = 985 (0x3d9), region = 60  ;;  %732 = vmatprep.subr.bf16.mxu1 (!%p321_p2), %v788_v1  ;;  %748 = vmatprep.subr.bf16.mxu0 (!%p321_p2), %v788_v1  ;;  %v703_v5 = vld [vmem:[%s915_s2] ss:$0 sm:$0xff] (!%p321_p2)  ;;  %v773_v20 = vld [vmem:[%s919_s6 + $0x8] sm:$0xff] (!%p321_p2)   ;;  %v776_v33 = vld [vmem:[%s921_s8 + $0x10] sm:$0xff] (!%p321_p2)   ;;  %vm582_vm2 = vcmask (!%p321_p2), 523264  }
   0x7   : > { %733 = vmatpush3.bf16.msra.mxu1 (!%p321_p2), %v770_v0  ;;  %736 = vmatprep.mubr.msk.bf16.mxu1 (!%p321_p2), %vm789_vm0, %v788_v1  ;;  %v772_v19 = vld [vmem:[%s919_s6] sm:$0xff] (!%p321_p2)   ;;  %v775_v22 = vld [vmem:[%s921_s8 + $0x8] sm:$0xff] (!%p321_p2)   ;;  %v777_v34 = vld [vmem:[%s921_s8 + $0x18] sm:$0xff] (!%p321_p2)   ;;  %vm628_vm3 = vcmask (!%p321_p2), 257024  }
   0x8   : > { %734 = vmatprep.subr.bf16.mxu1 (!%p321_p2), %v788_v1  ;;  %756 = vmatprep.mubr.msk.bf16.mxu0 (!%p321_p2), %vm789_vm0, %v788_v1  ;;  %v774_v21 = vld [vmem:[%s921_s8] sm:$0xff] (!%p321_p2)  }
   0x9   : > { %749 = vmatpush3.bf16.msra.mxu0 (!%p321_p2), %v774_v21  ;;  %v707_v27 = vld [vmem:[%s917_s4] ss:$0 sm:$0xff] (!%p321_p2) }
   0xa   : > { %750 = vmatprep.subr.bf16.mxu0 (!%p321_p2), %v788_v1  ;;  %v708_v29 = vld [vmem:[%s918_s5] ss:$0 sm:$0xff] (!%p321_p2) }
   0xb   : > { %735 = vmatpush3.bf16.msra.mxu1 (!%p321_p2), %v771_v2  ;;  %v709_v35 = vld [vmem:[%s920_s7] ss:$0 sm:$0xff] (!%p321_p2) }
   0xc   : > { %740 = vmatprep.subr.bf16.mxu1 (!%p321_p2), %v788_v1  ;;  %v713_v43 = vld [vmem:[%s922_s9] ss:$0 sm:$0xff] (!%p321_p2) }
   0xd   : > { %s925_s14 = smov (!%p360_p3, %s695_s14), 1  ;;  %751 = vmatpush3.bf16.msra.mxu0 %v775_v22 }
   0xe   : > { %s859_s19 = sshll.u32 %s925_s14, 2  ;;  %752 = vmatprep.subr.bf16.mxu0 %v788_v1 }
   0xf   : > { %s363_s22 = scalar_lea.vmem %s913_s0, %s859_s19  ;;  %s367_s25 = scalar_lea.vmem %s916_s3, %s859_s19 }
  0x10   : > { %v373_v3 = vld [vmem:[%s363_s22] sm:$0xf]  ;;  %s371_s12 = scalar_lea.vmem %s923_s10, %s859_s19 }
  0x11   : > { %737 = vmatmul.mubr.msk.bf16.vlgmr.msra.gmra.mrb[0].mxu1 %vm397_vm1, %v373_v3  ;;  %v441_v4 = vld [vmem:[%s367_s25] sm:$0xf]  ;;  %753 = vmatpush3.bf16.msra.mxu0 %v776_v33 }
  0x12   : > { %744 = vmatprep.mubr.msk.bf16.mxu1 %vm789_vm0, %v788_v1  ;;  %v442_v6 = vunpack.c.l.bf16 %v441_v4  ;;  %741 = vmatpush3.bf16.msra.mxu1 %v772_v19 }
  0x13   : > { %742 = vmatprep.subr.bf16.mxu1 %v788_v1  ;;  %754 = vmatprep.subr.bf16.mxu0 %v788_v1 }
  0x15   : > { %755 = vmatpush3.bf16.msra.mxu0 %v777_v34 }
  0x16   : > { %743 = vmatpush3.bf16.msra.mxu1 %v773_v20 }
  0xe4   : > { %v435_v7 = vpop.f32.mrb[0].mxu1 }
  0xe5   : > { %v436_v8 = vadd.f32 %v703_v5, %v435_v7  ;;  %v738_v9 = vpop.f32.mrb[1].mxu1 }
  0xe6   : > { %v438_v10 = vpop.f32.mrb[2].mxu1 }
  0xe7   : > { %v443_v11 = vadd.f32 %v442_v6, %v436_v8  ;;  %v739_v12 = vpop.f32.mrb[3].mxu1 }
  0xe9   : > { %v446_v13 = vsel %vm397_vm1, %v443_v11, 0.0 }
  0xea   : > { %447 = vadd.xlane.f32.xlu0 %v446_v13 }
 0x177   : > { %v448_v14 = vpop.xlane.xlu0 %447 }
 0x178   : > { %v450_v15 = vmul.f32 0.03125, %v448_v14 }
 0x17a   : > { %v451_v16 = vsub.f32 %v443_v11, %v450_v15 }
 0x17c   : > { %v452_v17 = vmul.f32 %v451_v16, %v451_v16 }
 0x17e   : > { %v453_v18 = vsel %vm397_vm1, %v452_v17, 0.0 }
 0x17f   : > { %454 = vadd.xlane.f32.xlu0 %v453_v18 }
 0x20c   : > { %v455_v23 = vpop.xlane.xlu0 %454 }
 0x20d   : > { %v456_v24 = vmul.f32 0.03125, %v455_v23 }
 0x20f   : > { %v457_v25 = vadd.f32 1e-06, %v456_v24 }
 0x211   : > { %778 = vrsqrt.f32 %v457_v25 }
 0x21b   : > { %v779_v26 = vpop.eup %778 }
 0x21c   : > { %v459_v28 = vmul.f32 %v779_v26, %v451_v16 }
 0x21e   : > { %v466_v30 = vmul.f32 %v707_v27, %v459_v28 }
 0x220   : > { %v473_v31 = vadd.f32 %v708_v29, %v466_v30 }
 0x222   : > { %v474_v32 = vpack.c.bf16 %v473_v31, %v473_v31 }
 0x224   : > { %745 = vmatmul.mubr.msk.bf16.vlgmr.msra.gmra.mrb[4].mxu1 %vm397_vm1, %v474_v32 }
 0x2f7   : > { %v535_v36 = vpop.f32.mrb[4].mxu1 }
 0x2f8   : > { %v536_v37 = vadd.f32 %v709_v35, %v535_v36  ;;  %v746_v38 = vpop.f32.mrb[5].mxu1 }
 0x2f9   : > { %v538_v39 = vpop.f32.mrb[6].mxu1 }
 0x2fa   : > { %v541_v40 = vmax.f32 %v536_v37, 0.0  ;;  %v747_v41 = vpop.f32.mrb[7].mxu1 }
 0x2fc   : > { %v542_v42 = vpack.c.bf16 %v541_v40, %v541_v40 }
 0x2fe   : > { %757 = vmatmul.mubr.msk.bf16.vlgmr.msra.gmra.mrb[0].mxu0 %vm582_vm2, %v542_v42 }
 0x3d1   : > { %v620_v44 = vpop.f32.mrb[0].mxu0 }
 0x3d2   : > { %v621_v45 = vadd.f32 %v713_v43, %v620_v44  ;;  %v758_v46 = vpop.f32.mrb[1].mxu0 }
 0x3d3   : > { %v623_v47 = vpop.f32.mrb[2].mxu0 }
 0x3d4   : > { %v626_v48 = vadd.f32 %v621_v45, %v443_v11  ;;  %v759_v49 = vpop.f32.mrb[3].mxu0 }
 0x3d6   : > { %v627_v50 = vpack.c.bf16 %v626_v48, %v626_v48 }
 0x3d8   : > { %629 = vst.msk [vmem:[%s371_s12] sm:$0xf] %vm628_vm3, %v627_v50 }
 0x3d9 PF: > { %s20_s13 = sadd.s32 1, %s786_s13  }
 0x3da   : > { %p17_p4 = scmp.ge.s32.totalorder %s20_s13, 4  }
 0x3dc   :  { %19 = sbr.rel (!%p17_p4) target bundleno = 1 (0x1), region = 93 }

// kernel: pointer_decoder_forward.16
= control target key start
LH: loop header
LB: loop body
LE: loop exit
PB: predicated region body
PF: predicated region fallthrough
CT: control target
= control target key end

     0   :  { %s923_s12 = smov 0   ;;  %s1020_s0 = inlined_call_operand.vmem [shape: bf16[2,8,32], index: 0, kind: input, shape index: {}]   ;;  %s1021_s1 = inlined_call_operand.vmem [shape: bf16[2,2,8,64], index: 1, kind: input, shape index: {}]   ;;  %s1022_s2 = inlined_call_operand.vmem [shape: bf16[2,1,8], index: 2, kind: input, shape index: {}]   ;;  %s1023_s3 = inlined_call_operand.vmem [shape: bf16[2,8,32], index: 3, kind: output, shape index: {}]  }
   0x1 LB: > { %s759_s13 = sadd.s32 4294967295, %s888_s12   ;;  %p763_p0 = scmp.ge.s32.totalorder %s888_s12, 1  ;;  %s888_s12 = sphi %s923_s12, %s13_s12  }
   0x2   : > { %p153_p1 = scmp.lt.s32.totalorder %s888_s12, 3 }
   0x4   : > { %p154_p2 = pnand %p763_p0, %p153_p1 }
   0x5   : > { %p182_p3 = scmp.lt.s32.totalorder (!%p154_p2), %s759_s13, 1  ;;  %v890_v0 = vmov (!%p154_p2), 0.0   ;;  %vm891_vm0 = vmmov (!%p154_p2), 0   ;;  %vm205_vm1 = vcmask (!%p154_p2), 64512   ;;  %v892_v5 = vmov (!%p154_p2), 0   ;;  %s893_s24 = smov (!%p154_p2), 96  }
   0x6   : > { %157 = sbr.rel (%p154_p2) target bundleno = 1446 (0x5a6), region = 32  ;;  %795 = vmatprep.subr.bf16.mxu0 (!%p154_p2), %v890_v0  ;;  %797 = vmatprep.mubr.msk.bf16.mxu0 (!%p154_p2), %vm891_vm0, %v890_v0  ;;  %v256_v7 = vlaneseq (!%p154_p2)  ;;  %s894_s25 = smov (!%p154_p2), 120   ;;  %vm282_vm5 = vcmask (!%p154_p2), 1043456   ;;  %vm445_vm6 = vcmask (!%p154_p2), 130112   ;;  %vm562_vm7 = vcmask (!%p154_p2), 195712  }
   0x7   : > { %801 = vmatprep.subr.bf16.mxu1 (!%p154_p2), %v890_v0  ;;  %803 = vmatprep.mubr.msk.bf16.mxu1 (!%p154_p2), %vm891_vm0, %v890_v0  ;;  %s895_s26 = smov (!%p154_p2), 112   ;;  %s896_s27 = smov (!%p154_p2), 104   ;;  %vm679_vm8 = vcmask (!%p154_p2), 261312   ;;  %vm683_vm9 = vcmask (!%p154_p2), 257024  }
   0x8   : > { %v257_v9 = vshrl.u32 (!%p154_p2), %v256_v7, 7  ;;  %s897_s28 = smov (!%p154_p2), 88   ;;  %s898_s29 = smov (!%p154_p2), 72  }
   0x9   : > { %s899_s30 = smov (!%p154_p2), 80   ;;  %s900_s4 = smov (!%p154_p2), 8  }
   0xa   : > { %v258_v10 = vsub.s32 (!%p154_p2), 0, %v257_v9  ;;  %s901_s5 = smov (!%p154_p2), 16   ;;  %s902_s6 = smov (!%p154_p2), 24  }
   0xd   : > { %s1025_s13 = smov (!%p182_p3, %s759_s13), 1 }
   0xe   : > { %s937_s14 = sshll.u32 %s1025_s13, 2  ;;  %s192_s23 = scalar_lea.vmem %s1022_s2, %s1025_s13 }
   0xf   : > { %s189_s17 = scalar_lea.vmem %s1021_s1, %s937_s14  ;;  %s185_s20 = scalar_lea.vmem %s1020_s0, %s937_s14  ;;  %v203_v4 = vld [vmem:[%s192_s23] sm:$0x1] }
  0x10   : > { %v202_v1 = vld [vmem:[%s189_s17] sm:$0xf]  ;;  %vm204_vm2 = vcmp.gt.bf16.partialorder %v203_v4, 1056980736  ;;  %s196_s9 = scalar_lea.vmem %s1023_s3, %s937_s14 }
  0x11   : > { %v210_v2 = vsel %vm205_vm1, %v202_v1, 0  ;;  %v201_v3 = vld [vmem:[%s185_s20] sm:$0xf]  ;;  %v252_v6 = vsel %vm204_vm2, 65537, %v892_v5  ;;  %v961_v19 = vcombine.low %v202_v1, %v202_v1 }
  0x12   : > { %796 = vmatpush3.bf16.xpose.msra.mxu0 %v210_v2  ;;  %v253_v8 = vunpack.c.l.b16 %v252_v6  ;;  %v770_v20 = vcombine.low %v201_v3, %v201_v3 }
  0x13   : > { %813 = vmatprep.subr.bf16.mxu0 %v890_v0  ;;  %277 = vrot.lane.b32.xlu1 %v961_v19, %s893_s24 }
  0x14   : > { %vm254_vm3 = vcmp.ne.s32.totalorder %v253_v8, 0 }
  0x15   : > { %v255_v11 = vsel %vm254_vm3, 1, %v892_v5 }
  0x16   : > { %v955_v12 = vrot.slane %v255_v11, %v258_v10 }
  0x17   : > { %332 = vrot.lane.b32.xlu1 %v961_v19, %s894_s25 }
  0x18   : > { %vm260_vm4 = vcmp.eq.s32.totalorder %v955_v12, 1 }
  0x19   : > { %798 = vmatmul.mubr.msk.bf16.vlgmr.msra.gmra.mrb[0].mxu0 %vm205_vm1, %v201_v3 }
  0x1a   : > { %815 = vmatprep.mubr.msk.bf16.mxu0 %vm891_vm0, %v890_v0 }
  0x1b   : > { %449 = vrot.lane.b32.xlu1 %v961_v19, %s895_s26 }
  0x1f   : > { %447 = vrot.lane.b32.xlu1 %v770_v20, %s895_s26 }
  0x23   : > { %566 = vrot.lane.b32.xlu1 %v961_v19, %s896_s27 }
  0x27   : > { %564 = vrot.lane.b32.xlu1 %v770_v20, %s896_s27 }
  0x85   : > { %v278_v26 = vpop.permute.xlu1 %277 }
  0x86   : > { %v284_v27 = vsel %vm282_vm5, %v278_v26, 0 }
  0x87   : > { %802 = vmatpush3.bf16.msra.mxu1 %v284_v27 }
  0x88   : > { %807 = vmatprep.subr.bf16.mxu1 %v890_v0 }
  0x89   : > { %v333_v30 = vpop.permute.xlu1 %332 }
  0x8a   : > { %v338_v32 = vsel %vm205_vm1, %v333_v30, 0 }
  0x8d   : > { %v450_v34 = vpop.permute.xlu1 %449 }
  0x8e   : > { %v455_v37 = vsel %vm205_vm1, %v450_v34, 0 }
  0x91   : > { %v448_v36 = vpop.permute.xlu1 %447 }
  0x95   : > { %v567_v38 = vpop.permute.xlu1 %566 }
  0x96   : > { %v572_v39 = vsel %vm205_vm1, %v567_v38, 0 }
  0x99   : > { %v565_v40 = vpop.permute.xlu1 %564 }
  0xec   : > { %v246_v13 = vpop.f32.mrb[0].mxu0 }
  0xed   : > { %v261_v14 = vsel %vm260_vm4, -1e+18, %v246_v13  ;;  %v799_v15 = vpop.f32.mrb[1].mxu0 }
  0xee   : > { %v249_v16 = vpop.f32.mrb[2].mxu0  ;;  %v262_v17 = vsel %vm205_vm1, %v261_v14, -inf }
  0xef   : > { %263 = vmax.xlane.f32.xlu0 %v262_v17  ;;  %v800_v18 = vpop.f32.mrb[3].mxu0 }
 0x17c   : > { %v264_v21 = vpop.xlane.xlu0 %263 }
 0x17d   : > { %v265_v22 = vsub.f32 %v261_v14, %v264_v21 }
 0x17f   : > { %v266_v23 = vmul.f32 1.442695, %v265_v22 }
 0x181   : > { %866 = vpow2.f32 %v266_v23 }
 0x18b   : > { %v867_v24 = vpop.eup %866 }
 0x18c   : > { %v268_v25 = vsel %vm205_vm1, %v867_v24, 0.0 }
 0x18d   : > { %269 = vadd.xlane.f32.xlu0 %v268_v25 }
 0x1a3   : > { %330 = vrot.lane.b32.xlu0 %v770_v20, %s894_s25 }
 0x21a   : > { %v270_v28 = vpop.xlane.xlu0 %269 }
 0x21b   : > { %868 = vrcp.f32 %v270_v28 }
 0x21e   : > { %v331_v35 = vpop.permute.xlu0 %330 }
 0x225   : > { %v869_v29 = vpop.eup %868 }
 0x226   : > { %v272_v31 = vmul.f32 %v869_v29, %v867_v24 }
 0x228   : > { %v273_v33 = vpack.c.bf16 %v272_v31, %v272_v31 }
 0x22a   : > { %804 = vmatmul.mubr.msk.bf16.vlgmr.msra.gmra.mrb[0].mxu1 %vm205_vm1, %v273_v33 }
 0x22b   : > { %808 = vmatpush3.bf16.xpose.msra.mxu1 %v338_v32  ;;  %809 = vmatprep.mubr.msk.bf16.mxu1 %vm891_vm0, %v890_v0 }
 0x22c   : > { %819 = vmatprep.subr.bf16.mxu1 %v890_v0 }
 0x232   : > { %810 = vmatmul.mubr.msk.bf16.vlgmr.msra.gmra.mrb[4].mxu1 %vm205_vm1, %v331_v35 }
 0x233   : > { %820 = vmatpush3.bf16.xpose.msra.mxu1 %v455_v37  ;;  %821 = vmatprep.mubr.msk.bf16.mxu1 %vm891_vm0, %v890_v0 }
 0x234   : > { %831 = vmatprep.subr.bf16.mxu1 %v890_v0 }
 0x23a   : > { %822 = vmatmul.mubr.msk.bf16.vlgmr.msra.gmra.mrb[8].mxu1 %vm205_vm1, %v448_v36 }
 0x23b   : > { %832 = vmatpush3.bf16.xpose.msra.mxu1 %v572_v39  ;;  %833 = vmatprep.mubr.msk.bf16.mxu1 %vm891_vm0, %v890_v0 }
 0x242   : > { %834 = vmatmul.mubr.msk.bf16.vlgmr.msra.gmra.mrb[12].mxu1 %vm205_vm1, %v565_v40 }
 0x2fd   : > { %v320_v41 = vpop.f32.mrb[0].mxu1 }
 0x2fe   : > { %326 = vst.msk [vmem:[#allocation2] sm:$0xff] %vm205_vm1, %v320_v41  ;;  %v805_v42 = vpop.f32.mrb[1].mxu1 }
 0x2ff   : > { %v323_v43 = vpop.f32.mrb[2].mxu1 }
 0x300   : > { %v806_v44 = vpop.f32.mrb[3].mxu1 }
 0x305   : > { %v374_v45 = vpop.f32.mrb[4].mxu1 }
 0x306   : > { %v380_v46 = vsel %vm260_vm4, -1e+18, %v374_v45  ;;  %v811_v47 = vpop.f32.mrb[5].mxu1 }
 0x307   : > { %v377_v48 = vpop.f32.mrb[6].mxu1  ;;  %v381_v49 = vsel %vm205_vm1, %v380_v46, -inf }
 0x308   : > { %382 = vmax.xlane.f32.xlu1 %v381_v49  ;;  %v812_v50 = vpop.f32.mrb[7].mxu1 }
 0x30d   : > { %v491_v51 = vpop.f32.mrb[8].mxu1 }
 0x30e   : > { %v497_v52 = vsel %vm260_vm4, -1e+18, %v491_v51  ;;  %v823_v53 = vpop.f32.mrb[9].mxu1 }
 0x30f   : > { %v494_v54 = vpop.f32.mrb[10].mxu1  ;;  %v498_v55 = vsel %vm205_vm1, %v497_v52, -inf }
 0x310   : > { %499 = vmax.xlane.f32.xlu0 %v498_v55  ;;  %v824_v56 = vpop.f32.mrb[11].mxu1 }
 0x315   : > { %v608_v57 = vpop.f32.mrb[12].mxu1 }
 0x316   : > { %v614_v58 = vsel %vm260_vm4, -1e+18, %v608_v57  ;;  %v835_v59 = vpop.f32.mrb[13].mxu1 }
 0x317   : > { %v611_v60 = vpop.f32.mrb[14].mxu1  ;;  %v615_v61 = vsel %vm205_vm1, %v614_v58, -inf }
 0x318   : > { %616 = vmax.xlane.f32.xlu1 %v615_v61  ;;  %v836_v62 = vpop.f32.mrb[15].mxu1 }
 0x329   : > { %393 = vrot.lane.b32.xlu1 %v961_v19, %s897_s28 }
 0x395   : > { %v383_v63 = vpop.xlane.xlu1 %382 }
 0x396   : > { %v384_v1 = vsub.f32 %v380_v46, %v383_v63 }
 0x398   : > { %v385_v2 = vmul.f32 1.442695, %v384_v1 }
 0x39a   : > { %870 = vpow2.f32 %v385_v2 }
 0x39d   : > { %v500_v3 = vpop.xlane.xlu0 %499 }
 0x39e   : > { %v501_v4 = vsub.f32 %v497_v52, %v500_v3 }
 0x3a0   : > { %v502_v5 = vmul.f32 1.442695, %v501_v4 }
 0x3a2   : > { %872 = vpow2.f32 %v502_v5 }
 0x3a4   : > { %v871_v6 = vpop.eup %870 }
 0x3a5   : > { %v617_v7 = vpop.xlane.xlu1 %616  ;;  %v387_v8 = vsel %vm205_vm1, %v871_v6, 0.0 }
 0x3a6   : > { %v618_v9 = vsub.f32 %v614_v58, %v617_v7  ;;  %388 = vadd.xlane.f32.xlu0 %v387_v8 }
 0x3a8   : > { %v619_v10 = vmul.f32 1.442695, %v618_v9 }
 0x3a9   : > { %v394_v11 = vpop.permute.xlu1 %393 }
 0x3aa   : > { %874 = vpow2.f32 %v619_v10  ;;  %v399_v12 = vsel %vm282_vm5, %v394_v11, 0 }
 0x3ab   : > { %814 = vmatpush3.bf16.msra.mxu0 %v399_v12 }
 0x3ac   : > { %v873_v13 = vpop.eup %872  ;;  %825 = vmatprep.subr.bf16.mxu0 %v890_v0 }
 0x3ad   : > { %v504_v14 = vsel %vm205_vm1, %v873_v13, 0.0 }
 0x3ae   : > { %505 = vadd.xlane.f32.xlu1 %v504_v14 }
 0x3b4   : > { %v875_v15 = vpop.eup %874 }
 0x3b5   : > { %v621_v16 = vsel %vm205_vm1, %v875_v15, 0.0 }
 0x3b6   : > { %622 = vadd.xlane.f32.xlu0 %v621_v16 }
 0x3bf   : > { %627 = vrot.lane.b32.xlu1 %v961_v19, %s898_s29 }
 0x3cc   : > { %510 = vrot.lane.b32.xlu0 %v961_v19, %s899_s30 }
 0x433   : > { %v389_v17 = vpop.xlane.xlu0 %388 }
 0x434   : > { %876 = vrcp.f32 %v389_v17 }
 0x43b   : > { %v506_v18 = vpop.xlane.xlu1 %505 }
 0x43c   : > { %878 = vrcp.f32 %v506_v18 }
 0x43e   : > { %v877_v20 = vpop.eup %876 }
 0x43f   : > { %v391_v21 = vmul.f32 %v877_v20, %v871_v6  ;;  %v628_v27 = vpop.permute.xlu1 %627 }
 0x440   : > { %v633_v29 = vsel %vm282_vm5, %v628_v27, 0 }
 0x441   : > { %v392_v22 = vpack.c.bf16 %v391_v21, %v391_v21 }
 0x443   : > { %v623_v23 = vpop.xlane.xlu0 %622  ;;  %816 = vmatmul.mubr.msk.bf16.vlgmr.msra.gmra.mrb[4].mxu0 %vm205_vm1, %v392_v22 }
 0x444   : > { %880 = vrcp.f32 %v623_v23  ;;  %827 = vmatprep.mubr.msk.bf16.mxu0 %vm891_vm0, %v890_v0 }
 0x446   : > { %v879_v24 = vpop.eup %878 }
 0x447   : > { %v508_v25 = vmul.f32 %v879_v24, %v873_v13  ;;  %v511_v26 = vpop.permute.xlu0 %510 }
 0x448   : > { %v516_v19 = vsel %vm282_vm5, %v511_v26, 0 }
 0x449   : > { %826 = vmatpush3.bf16.msra.mxu0 %v516_v19  ;;  %v509_v28 = vpack.c.bf16 %v508_v25, %v508_v25 }
 0x44a   : > { %837 = vmatprep.subr.bf16.mxu0 %v890_v0 }
 0x44c   : > { %828 = vmatmul.mubr.msk.bf16.vlgmr.msra.gmra.mrb[8].mxu0 %vm205_vm1, %v509_v28 }
 0x44d   : > { %838 = vmatpush3.bf16.msra.mxu0 %v633_v29  ;;  %839 = vmatprep.mubr.msk.bf16.mxu0 %vm891_vm0, %v890_v0 }
 0x44e   : > { %v881_v30 = vpop.eup %880 }
 0x44f   : > { %v625_v31 = vmul.f32 %v881_v30, %v875_v15 }
 0x451   : > { %v626_v32 = vpack.c.bf16 %v625_v31, %v625_v31 }
 0x454   : > { %840 = vmatmul.mubr.msk.bf16.vlgmr.msra.gmra.mrb[12].mxu0 %vm205_vm1, %v626_v32 }
 0x516   : > { %v435_v33 = vpop.f32.mrb[4].mxu0 }
 0x517   : > { %442 = vrot.lane.b32.xlu1 %v435_v33, %s900_s4  ;;  %v817_v34 = vpop.f32.mrb[5].mxu0 }
 0x518   : > { %v438_v35 = vpop.f32.mrb[6].mxu0 }
 0x519   : > { %v818_v36 = vpop.f32.mrb[7].mxu0 }
 0x51f   : > { %v552_v37 = vpop.f32.mrb[8].mxu0 }
 0x520   : > { %559 = vrot.lane.b32.xlu0 %v552_v37, %s901_s5  ;;  %v829_v38 = vpop.f32.mrb[9].mxu0 }
 0x521   : > { %v555_v39 = vpop.f32.mrb[10].mxu0 }
 0x522   : > { %v830_v40 = vpop.f32.mrb[11].mxu0 }
 0x527   : > { %v669_v41 = vpop.f32.mrb[12].mxu0 }
 0x528   : > { %676 = vrot.lane.b32.xlu1 %v669_v41, %s902_s6  ;;  %v841_v0 = vpop.f32.mrb[13].mxu0 }
 0x529   : > { %v672_v42 = vpop.f32.mrb[14].mxu0 }
 0x52a   : > { %v842_v43 = vpop.f32.mrb[15].mxu0 }
 0x589   : > { %v443_v44 = vpop.permute.xlu1 %442 }
 0x58a   : > { %446 = vst.msk [vmem:[#allocation2] sm:$0xff] %vm445_vm6, %v443_v44 }
 0x592   : > { %v560_v45 = vpop.permute.xlu0 %559 }
 0x593   : > { %563 = vst.msk [vmem:[#allocation2] sm:$0xff] %vm562_vm7, %v560_v45 }
 0x59a   : > { %v677_v46 = vpop.permute.xlu1 %676 }
 0x59b   : > { %680 = vst.msk [vmem:[#allocation2] sm:$0xff] %vm679_vm8, %v677_v46 }
 0x5a2   : > { %v681_v47 = vld [vmem:[#allocation2] sm:$0xff] }
 0x5a3   : > { %v682_v48 = vpack.c.bf16 %v681_v47, %v681_v47 }
 0x5a5   : > { %684 = vst.msk [vmem:[%s196_s9] sm:$0xf] %vm683_vm9, %v682_v48 }
 0x5a6 PF: > { %s13_s12 = sadd.s32 1, %s888_s12  }
 0x5a7   : > { %p10_p4 = scmp.ge.s32.totalorder %s13_s12, 4  }
 0x5a9   :  { %12 = sbr.rel (!%p10_p4) target bundleno = 1 (0x1), region = 68 }

// kernel: pointer_decoder_forward.21
= control target key start
LH: loop header
LB: loop body
LE: loop exit
PB: predicated region body
PF: predicated region fallthrough
CT: control target
= control target key end

     0   :  { %10 = vsyncpa [#allocation4], 0  ;;  %s1335_s0 = inlined_call_operand.vmem [shape: bf16[2,8,32], index: 0, kind: input, shape index: {}]   ;;  %s1336_s1 = inlined_call_operand.vmem [shape: bf16[2,2,8,64], index: 1, kind: input, shape index: {}]   ;;  %s1337_s2 = inlined_call_operand.vmem [shape: bf16[2,1,8], index: 2, kind: input, shape index: {}]   ;;  %s1338_s3 = inlined_call_operand.vmem [shape: bf16[2,8,32], index: 3, kind: output, shape index: {0}]   ;;  %s1339_s4 = inlined_call_operand.hbm [shape: bf16[2,4,8,8], index: 4, kind: output, shape index: {1}]  }
   0x1   :  { %12 = vsyncpa [#allocation4 + $0x1], 0  ;;  %s1134_s15 = smov 0   ;;  %s1136_s16 = smov 0  }
   0x2   :  { %s1138_s17 = smov 0   ;;  %s1140_s18 = smov 0  }
   0x3 LB: > { %s1155_s19 = sadd.s32 4294967295, %s1091_s18   ;;  %s865_s20 = sadd.s32 4294967294, %s1091_s18   ;;  %s1091_s18 = sphi %s1140_s18, %s1345_s18   ;;  %s1087_s17 = sphi %s1138_s17, %s1344_s17   ;;  %s1083_s16 = sphi %s1136_s16, %s1343_s16   ;;  %s1079_s15 = sphi %s1134_s15, %s1342_s15  }
   0x4   : > { %s1159_s21 = sadd.s32 1, %s1091_s18   ;;  %s129_s22 = sadd.s32 1, %s1087_s17 }
   0x5   : > { %s126_s23 = ssub.s32 %s1091_s18, %s1159_s21  ;;  %p139_p0 = scmp.ne.s32.totalorder %s1087_s17, %s1083_s16 }
   0x6   : > { %p127_p1 = scmp.eq.s32.totalorder %s126_s23, 0  ;;  %p140_p2 = scmp.eq.s32.totalorder %s1155_s19, 1 }
   0x7   : > { %p145_p3 = scmp.ne.s32.totalorder %s1083_s16, %s1079_s15  ;;  %p146_p4 = scmp.eq.s32.totalorder %s865_s20, 1 }
   0x8   : > { %s1170_s24 = scalar_select %p127_p1, %s1087_s17, %s129_s22  }
   0x9   : > { %p1172_p5 = por %p140_p2, %p139_p0  ;;  %p1176_p6 = por %p146_p4, %p145_p3 }
   0xa   : > { %p868_p7 = scmp.ge.s32.totalorder %s1091_s18, 1  ;;  %p185_p8 = scmp.lt.s32.totalorder %s1091_s18, 3 }
   0xc   : > { %p186_p9 = pnand %p868_p7, %p185_p8 }
   0xd   : > { %p222_p10 = scmp.lt.s32.totalorder (!%p186_p9), %s1155_s19, 1  ;;  %v1093_v0 = vmov (!%p186_p9), 0.0   ;;  %vm1094_vm0 = vmmov (!%p186_p9), 0   ;;  %vm246_vm1 = vcmask (!%p186_p9), 64512   ;;  %v1095_v5 = vmov (!%p186_p9), 0   ;;  %s1096_s12 = smov (!%p186_p9), 96  }
   0xe   : > { %189 = sbr.rel (%p186_p9) target bundleno = 1470 (0x5be), region = 32  ;;  %909 = vmatprep.subr.bf16.mxu0 (!%p186_p9), %v1093_v0  ;;  %911 = vmatprep.mubr.msk.bf16.mxu0 (!%p186_p9), %vm1094_vm0, %v1093_v0  ;;  %v297_v7 = vlaneseq (!%p186_p9)  ;;  %s1097_s13 = smov (!%p186_p9), 120   ;;  %vm325_vm5 = vcmask (!%p186_p9), 1043456   ;;  %vm315_vm6 = vcmask (!%p186_p9), 60416  }
   0xf   : > { %915 = vmatprep.subr.bf16.mxu1 (!%p186_p9), %v1093_v0  ;;  %917 = vmatprep.mubr.msk.bf16.mxu1 (!%p186_p9), %vm1094_vm0, %v1093_v0  ;;  %s1098_s14 = smov (!%p186_p9), 112   ;;  %s1099_s20 = smov (!%p186_p9), 104  }
  0x10   : > { %v298_v9 = vshrl.u32 (!%p186_p9), %v297_v7, 7  ;;  %s219_s22 = sand.u32 (!%p186_p9), 1, %s1083_s16   ;;  %s1100_s29 = smov (!%p186_p9), 88  }
  0x11   : > { %s869_s23 = sshll.u32 (!%p186_p9), %s219_s22, 4  ;;  %s1101_s30 = smov (!%p186_p9), 72  }
  0x12   : > { %v299_v10 = vsub.s32 (!%p186_p9), 0, %v298_v9  ;;  %s1103_s6 = smov (!%p186_p9), 8   ;;  %s1104_s7 = smov (!%p186_p9), 16  }
  0x15   : > { %s223_s27 = scalar_select %p222_p10, %s1155_s19, 1 }
  0x17   : > { %s1190_s28 = sshll.u32 %s223_s27, 2  ;;  %s233_s11 = scalar_lea.vmem %s1337_s2, %s223_s27 }
  0x18   : > { %s806_s5 = scalar_lea.vmem %s1336_s1, %s1190_s28  ;;  %s225_s8 = scalar_lea.vmem %s1335_s0, %s1190_s28  ;;  %v244_v4 = vld [vmem:[%s233_s11] sm:$0x1] }
  0x19   : > { %v873_v1 = vld [vmem:[%s806_s5 + $0x8] sm:$0xf]  ;;  %v242_v3 = vld [vmem:[%s225_s8] sm:$0xf]  ;;  %vm245_vm2 = vcmp.gt.bf16.partialorder %v244_v4, 1056980736 }
  0x1a   : > { %v251_v2 = vsel %vm246_vm1, %v873_v1, 0  ;;  %v293_v6 = vsel %vm245_vm2, 65537, %v1095_v5  ;;  %v1214_v19 = vcombine.low %v873_v1, %v873_v1  ;;  %v877_v20 = vcombine.low %v242_v3, %v242_v3  ;;  %s1227_s27 = scalar_lea.vmem [#allocation3], %s869_s23  ;;  %s1102_s5 = smov 80  }
  0x1b   : > { %910 = vmatpush3.bf16.xpose.msra.mxu0 %v251_v2  ;;  %v294_v8 = vunpack.c.l.b16 %v293_v6  ;;  %s892_s8 = sshll.u32 %s1155_s19, 8  ;;  %s755_s9 = sshll.u32 %s1227_s27, 4  ;;  %s1286_s9 = int_to_ptr.vmem [resolvable:$true] %s755_s9 }
  0x1c   : > { %927 = vmatprep.subr.bf16.mxu0 %v1093_v0  ;;  %320 = vrot.lane.b32.xlu1 %v1214_v19, %s1096_s12  ;;  %s1284_s12 = scalar_lea.hbm %s1339_s4, %s892_s8  ;;  %s1105_s19 = smov [#allocation3]  }
  0x1d   : > { %vm295_vm3 = vcmp.ne.s32.totalorder %v294_v8, 0 }
  0x1e   : > { %v296_v11 = vsel %vm295_vm3, 1, %v1095_v5 }
  0x1f   : > { %v1208_v12 = vrot.slane %v296_v11, %v299_v10 }
  0x20   : > { %375 = vrot.lane.b32.xlu1 %v1214_v19, %s1097_s13 }
  0x21   : > { %vm301_vm4 = vcmp.eq.s32.totalorder %v1208_v12, 1 }
  0x22   : > { %912 = vmatmul.mubr.msk.bf16.vlgmr.msra.gmra.mrb[0].mxu0 %vm246_vm1, %v242_v3 }
  0x23   : > { %929 = vmatprep.mubr.msk.bf16.mxu0 %vm1094_vm0, %v1093_v0 }
  0x24   : > { %494 = vrot.lane.b32.xlu1 %v1214_v19, %s1098_s14 }
  0x28   : > { %492 = vrot.lane.b32.xlu1 %v877_v20, %s1098_s14  ;;  %s1029_s14 = scalar_lea.vmem %s1286_s9, 256 }
  0x29   : > { %p1030_p11 = scmp.ne.s32.totalorder %s1286_s9, %s1029_s14 }
  0x2b   : > { %p1031_p12 = pnand %p1030_p11, %p1172_p5 }
  0x2c   : > { %613 = vrot.lane.b32.xlu1 %v1214_v19, %s1099_s20 }
  0x2d   : > { %p1032_p13 = pneg %p1031_p12 }
  0x30   : > { %611 = vrot.lane.b32.xlu1 %v877_v20, %s1099_s20  ;;  %s1033_s20 = sshll.u32 %s1105_s19, 4  ;;  %s1034_s20 = int_to_ptr.vmem [resolvable:$false] %s1033_s20 }
  0x31   : > { %s1035_s23 = scalar_lea.vmem %s1034_s20, 512  ;;  %p1036_p0 = scmp.lt.s32.totalorder %s1286_s9, %s1034_s20 }
  0x32   : > { %p1037_p1 = scmp.lt.s32.totalorder %s1035_s23, %s1029_s14 }
  0x34   : > { %p1038_p2 = por %p1037_p1, %p1036_p0 }
  0x36   : > { %p1039_p3 = pnand %p1038_p2, %p1032_p13 }
  0x8e   : > { %v321_v26 = vpop.permute.xlu1 %320 }
  0x8f   : > { %v327_v27 = vsel %vm325_vm5, %v321_v26, 0 }
  0x90   : > { %916 = vmatpush3.bf16.msra.mxu1 %v327_v27 }
  0x91   : > { %921 = vmatprep.subr.bf16.mxu1 %v1093_v0 }
  0x92   : > { %v376_v30 = vpop.permute.xlu1 %375 }
  0x93   : > { %v381_v32 = vsel %vm246_vm1, %v376_v30, 0 }
  0x96   : > { %v495_v34 = vpop.permute.xlu1 %494 }
  0x97   : > { %v500_v37 = vsel %vm246_vm1, %v495_v34, 0 }
  0x9a   : > { %v493_v36 = vpop.permute.xlu1 %492 }
  0x9e   : > { %v614_v38 = vpop.permute.xlu1 %613 }
  0x9f   : > { %v619_v39 = vsel %vm246_vm1, %v614_v38, 0 }
  0xa2   : > { %v612_v40 = vpop.permute.xlu1 %611 }
  0xf5   : > { %v287_v13 = vpop.f32.mrb[0].mxu0 }
  0xf6   : > { %v302_v14 = vsel %vm301_vm4, -1e+18, %v287_v13  ;;  %v913_v15 = vpop.f32.mrb[1].mxu0 }
  0xf7   : > { %v290_v16 = vpop.f32.mrb[2].mxu0  ;;  %v303_v17 = vsel %vm246_vm1, %v302_v14, -inf }
  0xf8   : > { %304 = vmax.xlane.f32.xlu0 %v303_v17  ;;  %v914_v18 = vpop.f32.mrb[3].mxu0 }
 0x185   : > { %v305_v21 = vpop.xlane.xlu0 %304 }
 0x186   : > { %v306_v22 = vsub.f32 %v302_v14, %v305_v21 }
 0x188   : > { %v307_v23 = vmul.f32 1.442695, %v306_v22 }
 0x18a   : > { %1013 = vpow2.f32 %v307_v23 }
 0x194   : > { %v1014_v24 = vpop.eup %1013 }
 0x195   : > { %v309_v25 = vsel %vm246_vm1, %v1014_v24, 0.0 }
 0x196   : > { %310 = vadd.xlane.f32.xlu0 %v309_v25 }
 0x1ac   : > { %373 = vrot.lane.b32.xlu0 %v877_v20, %s1097_s13  ;;  %s1290_s13 = scalar_lea.sflag [#allocation4], %s219_s22 }
 0x223   : > { %v311_v28 = vpop.xlane.xlu0 %310 }
 0x224   : > { %1015 = vrcp.f32 %v311_v28 }
 0x227   : > { %v374_v35 = vpop.permute.xlu0 %373 }
 0x22e   : > { %v1016_v29 = vpop.eup %1015 }
 0x22f   : > { %v313_v31 = vmul.f32 %v1016_v29, %v1014_v24 }
 0x231   : > { %v314_v33 = vpack.c.bf16 %v313_v31, %v313_v31 }
 0x233   : > { %316 = vst.msk [vmem:[%s1227_s27] sm:$0xf] %vm315_vm6, %v314_v33  ;;  %918 = vmatmul.mubr.msk.bf16.vlgmr.msra.gmra.mrb[0].mxu1 %vm246_vm1, %v314_v33 }
 0x234   : > { %922 = vmatpush3.bf16.xpose.msra.mxu1 %v381_v32  ;;  %923 = vmatprep.mubr.msk.bf16.mxu1 %vm1094_vm0, %v1093_v0 }
 0x235   : > { %933 = vmatprep.subr.bf16.mxu1 %v1093_v0 }
 0x23b   : > { %924 = vmatmul.mubr.msk.bf16.vlgmr.msra.gmra.mrb[4].mxu1 %vm246_vm1, %v374_v35 }
 0x23c   : > { %934 = vmatpush3.bf16.xpose.msra.mxu1 %v500_v37  ;;  %935 = vmatprep.mubr.msk.bf16.mxu1 %vm1094_vm0, %v1093_v0 }
 0x23d   : > { %945 = vmatprep.subr.bf16.mxu1 %v1093_v0 }
 0x243   : > { %936 = vmatmul.mubr.msk.bf16.vlgmr.msra.gmra.mrb[8].mxu1 %vm246_vm1, %v493_v36 }
 0x244   : > { %946 = vmatpush3.bf16.xpose.msra.mxu1 %v619_v39  ;;  %947 = vmatprep.mubr.msk.bf16.mxu1 %vm1094_vm0, %v1093_v0 }
 0x24b   : > { %948 = vmatmul.mubr.msk.bf16.vlgmr.msra.gmra.mrb[12].mxu1 %vm246_vm1, %v612_v40 }
 0x306   : > { %v363_v41 = vpop.f32.mrb[0].mxu1 }
 0x307   : > { %369 = vst.msk [vmem:[#allocation2] sm:$0xff] %vm246_vm1, %v363_v41  ;;  %v919_v42 = vpop.f32.mrb[1].mxu1 }
 0x308   : > { %v366_v43 = vpop.f32.mrb[2].mxu1 }
 0x309   : > { %v920_v44 = vpop.f32.mrb[3].mxu1 }
 0x30e   : > { %v417_v45 = vpop.f32.mrb[4].mxu1 }
 0x30f   : > { %v423_v46 = vsel %vm301_vm4, -1e+18, %v417_v45  ;;  %v925_v47 = vpop.f32.mrb[5].mxu1 }
 0x310   : > { %v420_v48 = vpop.f32.mrb[6].mxu1  ;;  %v424_v49 = vsel %vm246_vm1, %v423_v46, -inf }
 0x311   : > { %425 = vmax.xlane.f32.xlu1 %v424_v49  ;;  %v926_v50 = vpop.f32.mrb[7].mxu1 }
 0x316   : > { %v536_v51 = vpop.f32.mrb[8].mxu1 }
 0x317   : > { %v542_v52 = vsel %vm301_vm4, -1e+18, %v536_v51  ;;  %v937_v53 = vpop.f32.mrb[9].mxu1 }
 0x318   : > { %v539_v54 = vpop.f32.mrb[10].mxu1  ;;  %v543_v55 = vsel %vm246_vm1, %v542_v52, -inf }
 0x319   : > { %544 = vmax.xlane.f32.xlu0 %v543_v55  ;;  %v938_v56 = vpop.f32.mrb[11].mxu1 }
 0x31e   : > { %v655_v57 = vpop.f32.mrb[12].mxu1 }
 0x31f   : > { %v661_v58 = vsel %vm301_vm4, -1e+18, %v655_v57  ;;  %v949_v59 = vpop.f32.mrb[13].mxu1 }
 0x320   : > { %v658_v60 = vpop.f32.mrb[14].mxu1  ;;  %v662_v61 = vsel %vm246_vm1, %v661_v58, -inf }
 0x321   : > { %663 = vmax.xlane.f32.xlu1 %v662_v61  ;;  %v950_v62 = vpop.f32.mrb[15].mxu1 }
 0x332   : > { %438 = vrot.lane.b32.xlu1 %v1214_v19, %s1100_s29 }
 0x39e   : > { %v426_v63 = vpop.xlane.xlu1 %425 }
 0x39f   : > { %v427_v1 = vsub.f32 %v423_v46, %v426_v63 }
 0x3a1   : > { %v428_v2 = vmul.f32 1.442695, %v427_v1 }
 0x3a3   : > { %1017 = vpow2.f32 %v428_v2 }
 0x3a6   : > { %v545_v3 = vpop.xlane.xlu0 %544 }
 0x3a7   : > { %v546_v4 = vsub.f32 %v542_v52, %v545_v3 }
 0x3a9   : > { %v547_v5 = vmul.f32 1.442695, %v546_v4 }
 0x3ab   : > { %1019 = vpow2.f32 %v547_v5 }
 0x3ad   : > { %v1018_v6 = vpop.eup %1017 }
 0x3ae   : > { %v664_v7 = vpop.xlane.xlu1 %663  ;;  %v430_v8 = vsel %vm246_vm1, %v1018_v6, 0.0 }
 0x3af   : > { %v665_v9 = vsub.f32 %v661_v58, %v664_v7  ;;  %431 = vadd.xlane.f32.xlu0 %v430_v8 }
 0x3b1   : > { %v666_v10 = vmul.f32 1.442695, %v665_v9 }
 0x3b2   : > { %v439_v11 = vpop.permute.xlu1 %438 }
 0x3b3   : > { %1021 = vpow2.f32 %v666_v10  ;;  %v444_v12 = vsel %vm325_vm5, %v439_v11, 0 }
 0x3b4   : > { %928 = vmatpush3.bf16.msra.mxu0 %v444_v12 }
 0x3b5   : > { %v1020_v13 = vpop.eup %1019  ;;  %939 = vmatprep.subr.bf16.mxu0 %v1093_v0 }
 0x3b6   : > { %v549_v14 = vsel %vm246_vm1, %v1020_v13, 0.0 }
 0x3b7   : > { %550 = vadd.xlane.f32.xlu1 %v549_v14 }
 0x3bd   : > { %v1022_v15 = vpop.eup %1021 }
 0x3be   : > { %v668_v16 = vsel %vm246_vm1, %v1022_v15, 0.0 }
 0x3bf   : > { %669 = vadd.xlane.f32.xlu0 %v668_v16 }
 0x3c8   : > { %676 = vrot.lane.b32.xlu1 %v1214_v19, %s1101_s30 }
 0x3d5   : > { %557 = vrot.lane.b32.xlu0 %v1214_v19, %s1102_s5 }
 0x43c   : > { %v432_v17 = vpop.xlane.xlu0 %431 }
 0x43d   : > { %1023 = vrcp.f32 %v432_v17 }
 0x444   : > { %v551_v18 = vpop.xlane.xlu1 %550 }
 0x445   : > { %1025 = vrcp.f32 %v551_v18 }
 0x447   : > { %v1024_v20 = vpop.eup %1023 }
 0x448   : > { %v434_v21 = vmul.f32 %v1024_v20, %v1018_v6  ;;  %v677_v26 = vpop.permute.xlu1 %676 }
 0x449   : > { %v682_v29 = vsel %vm325_vm5, %v677_v26, 0 }
 0x44a   : > { %v435_v22 = vpack.c.bf16 %v434_v21, %v434_v21 }
 0x44c   : > { %v670_v23 = vpop.xlane.xlu0 %669  ;;  %879 = vst.msk [vmem:[%s1227_s27 + $0x4] sm:$0xf] %vm315_vm6, %v435_v22  ;;  %930 = vmatmul.mubr.msk.bf16.vlgmr.msra.gmra.mrb[4].mxu0 %vm246_vm1, %v435_v22 }
 0x44d   : > { %1027 = vrcp.f32 %v670_v23  ;;  %941 = vmatprep.mubr.msk.bf16.mxu0 %vm1094_vm0, %v1093_v0 }
 0x44f   : > { %v1026_v24 = vpop.eup %1025 }
 0x450   : > { %v553_v19 = vmul.f32 %v1026_v24, %v1020_v13  ;;  %v558_v25 = vpop.permute.xlu0 %557 }
 0x451   : > { %v563_v27 = vsel %vm325_vm5, %v558_v25, 0 }
 0x452   : > { %940 = vmatpush3.bf16.msra.mxu0 %v563_v27  ;;  %v554_v28 = vpack.c.bf16 %v553_v19, %v553_v19 }
 0x453   : > { %951 = vmatprep.subr.bf16.mxu0 %v1093_v0 }
 0x454   : > { %882 = vst.msk [vmem:[%s1227_s27 + $0x8] sm:$0xf] %vm315_vm6, %v554_v28 }
 0x455   : > { %942 = vmatmul.mubr.msk.bf16.vlgmr.msra.gmra.mrb[8].mxu0 %vm246_vm1, %v554_v28 }
 0x456   : > { %952 = vmatpush3.bf16.msra.mxu0 %v682_v29  ;;  %953 = vmatprep.mubr.msk.bf16.mxu0 %vm1094_vm0, %v1093_v0 }
 0x457   : > { %v1028_v30 = vpop.eup %1027 }
 0x458   : > { %v672_v31 = vmul.f32 %v1028_v30, %v1022_v15 }
 0x45a   : > { %v673_v32 = vpack.c.bf16 %v672_v31, %v672_v31 }
 0x45c   : > { %885 = vst.msk [vmem:[%s1227_s27 + $0xc] sm:$0xf] %vm315_vm6, %v673_v32 }
 0x45d   : > { %954 = vmatmul.mubr.msk.bf16.vlgmr.msra.gmra.mrb[12].mxu0 %vm246_vm1, %v673_v32 }
 0x51f   : > { %v480_v33 = vpop.f32.mrb[4].mxu0 }
 0x520   : > { %487 = vrot.lane.b32.xlu1 %v480_v33, %s1103_s6  ;;  %v931_v34 = vpop.f32.mrb[5].mxu0 }
 0x521   : > { %v483_v35 = vpop.f32.mrb[6].mxu0 }
 0x522   : > { %v932_v36 = vpop.f32.mrb[7].mxu0 }
 0x528   : > { %v599_v37 = vpop.f32.mrb[8].mxu0 }
 0x529   : > { %606 = vrot.lane.b32.xlu0 %v599_v37, %s1104_s7  ;;  %v943_v0 = vpop.f32.mrb[9].mxu0 }
 0x52a   : > { %v602_v38 = vpop.f32.mrb[10].mxu0 }
 0x52b   : > { %v944_v39 = vpop.f32.mrb[11].mxu0 }
 0x530   : > { %v718_v40 = vpop.f32.mrb[12].mxu0 }
 0x531   : > { %1042 = shalt.err (!%p1039_p3)
}
 0x532   : > { %s1043_s22 = scalar_lea.hbm %s1284_s12, 256  ;;  %s1047_s30 = scalar_lea.hbm %s1339_s4, 512 }
 0x533   : > { %p1044_p4 = scmp.ne.s32.totalorder %s1284_s12, %s1043_s22  ;;  %p1048_p9 = scmp.lt.u32.totalorder %s1284_s12, %s1339_s4 }
 0x534   : > { %p1049_p10 = scmp.lt.u32.totalorder %s1047_s30, %s1043_s22  ;;  %p1051_p12 = scmp.lt.u32.totalorder %s1043_s22, %s1284_s12 }
 0x535   : > { %p1045_p7 = pnand %p1044_p4, %p1172_p5 }
 0x536   : > { %p1050_p11 = por %p1049_p10, %p1048_p9 }
 0x537   : > { %p1046_p8 = pneg %p1045_p7 }
 0x538   : > { %p1052_p13 = por %p1051_p12, %p1050_p11 }
 0x53a   : > { %p1053_p0 = pnand %p1052_p13, %p1046_p8 }
 0x53c   : > { %1056 = shalt.err (!%p1053_p0)
}
 0x53d   : > { %s1106_s7 = smov 64   ;;  %s1107_s8 = smov 4   ;;  %v955_v41 = vpop.f32.mrb[13].mxu0  ;;  %vm490_vm7 = vcmask 130112   ;;  %vm609_vm8 = vcmask 195712   ;;  %vm728_vm9 = vcmask 261312  }
 0x53e   : > { %957 = dma.vmem_to_hbm [thread:$0]  (%p1172_p5), %s1286_s9, 256, %s1284_s12, %s1290_s13, %s1106_s7, %s1106_s7, %s1107_s8   ;;  %v721_v42 = vpop.f32.mrb[14].mxu0  ;;  %vm732_vm10 = vcmask 257024  }
 0x53f   : > { %s1108_s10 = smov 24   ;;  %v956_v43 = vpop.f32.mrb[15].mxu0  ;;  %s237_s25 = scalar_lea.vmem %s1338_s3, %s1190_s28 }
 0x540   : > { %725 = vrot.lane.b32.xlu1 %v718_v40, %s1108_s10 }
 0x592   : > { %v488_v44 = vpop.permute.xlu1 %487 }
 0x593   : > { %491 = vst.msk [vmem:[#allocation2] sm:$0xff] %vm490_vm7, %v488_v44 }
 0x59b   : > { %v607_v45 = vpop.permute.xlu0 %606 }
 0x59c   : > { %610 = vst.msk [vmem:[#allocation2] sm:$0xff] %vm609_vm8, %v607_v45 }
 0x5b2   : > { %v726_v46 = vpop.permute.xlu1 %725 }
 0x5b3   : > { %729 = vst.msk [vmem:[#allocation2] sm:$0xff] %vm728_vm9, %v726_v46 }
 0x5ba   : > { %v730_v47 = vld [vmem:[#allocation2] sm:$0xff] }
 0x5bb   : > { %v731_v48 = vpack.c.bf16 %v730_v47, %v730_v47 }
 0x5bd   : > { %733 = vst.msk [vmem:[%s237_s25] sm:$0xf] %vm732_vm10, %v731_v48 }
 0x5be PF: > { %p963_p5 = scmp.ge.s32.totalorder %s1091_s18, 2  ;;  %s777_s9 = sand.u32 1, %s1079_s15  }
 0x5bf   : > { %s778_s12 = scalar_lea.sflag [#allocation4], %s777_s9 }
 0x5c0   : > { %p960_p1 = pnand %p963_p5, %p1176_p6 }
 0x5c2   : > { %1074 = dma.done.wait (!%p960_p1), %s778_s12, 256  }
 0x5c3   : > { %1076 = vsyncadd (!%p960_p1), %s778_s12, 4294967040  ;;  %p15_p2 = scmp.ge.s32.totalorder %s1159_s21, 4   ;;  %s1342_s15 = smov %s1083_s16 }
 0x5c4   : > { %s1343_s16 = smov %s1087_s17  ;;  %s1344_s17 = smov %s1170_s24 }
 0x5c5   : > { %s1345_s18 = smov %s1159_s21  ;;  %17 = sbr.rel (!%p15_p2) target bundleno = 3 (0x3), region = 88 }
 0x5cc   :  { %783 = vsyncpa [#allocation4], 1 }
 0x5cd   :  { %785 = vsyncpa [#allocation4 + $0x1], 1 }

</bundles_post_ra>
